<compile_context>
chip_gen: v5e
topology: v5e:2x2
jax: 0.10.0
libtpu: 0.0.40
codegen_flags: <defaults>
</compile_context>

<pallas_src>
import functools
import math

import jax
import jax.numpy as jnp
from jax import lax
from jax.experimental import pallas as pl
from jax.experimental.pallas import tpu as pltpu


def _round_up(x, m):
  return (x + m - 1) // m * m


# -----------------------------------------------------------------------------------------------
# Kernel A: SSL (MLM) head, grid = (num_row_tiles, num_vocab_tiles), vocab axis last/"arbitrary".
# -----------------------------------------------------------------------------------------------
def ssl_head_kernel(x_ref, w1_ref, b1_ref, w2_ref, b2_ref, labels_ref,
                    ssl_out_ref, nll_ref,
                    h_ref, m_ref, l_ref, picked_ref,
                    *, vocab_size, v_tile):
  v = pl.program_id(1)
  last_v = pl.num_programs(1) - 1

  @pl.when(v == 0)
  def _init():
    # Linear(768,768) -> ReLU -> (Dropout = identity); computed once per row tile, kept resident.
    h = jnp.dot(x_ref[...], w1_ref[...], preferred_element_type=jnp.float32) + b1_ref[...]
    h_ref[...] = jnp.maximum(h, 0.0).astype(jnp.bfloat16)
    m_ref[...] = jnp.full(m_ref.shape, -1e30, jnp.float32)
    l_ref[...] = jnp.zeros(l_ref.shape, jnp.float32)
    picked_ref[...] = jnp.zeros(picked_ref.shape, jnp.float32)

  # Linear(768, V) on this vocab tile; f32 MXU accumulate, bf16 store of the logits.
  logits = jnp.dot(h_ref[...], w2_ref[...], preferred_element_type=jnp.float32) + b2_ref[...]
  ssl_out_ref[...] = logits.astype(jnp.bfloat16)

  labels = labels_ref[...]                                           # (TN, 1) int32, -1 = ignore
  vcol = lax.broadcasted_iota(jnp.int32, logits.shape, 1) + v * v_tile
  if vocab_size % v_tile == 0:
    masked_logits = logits                                           # no vocab padding: skip mask
  else:
    masked_logits = jnp.where(vcol < vocab_size, logits, -1e30)      # mask padded vocab columns

  # online LSE accumulation across vocab tiles (all in f32)
  tile_max = jnp.max(masked_logits, axis=-1, keepdims=True)
  m_new = jnp.maximum(m_ref[...], tile_max)
  l_ref[...] = (l_ref[...] * jnp.exp(m_ref[...] - m_new)
                + jnp.sum(jnp.exp(masked_logits - m_new), axis=-1, keepdims=True))
  m_ref[...] = m_new
  picked_ref[...] += jnp.sum(jnp.where(vcol == labels, logits, 0.0), axis=-1, keepdims=True)

  @pl.when(v == last_v)
  def _finalize():
    valid = labels != -1
    lse = m_ref[...] + jnp.log(l_ref[...])
    nll_ref[...] = jnp.where(valid, lse - picked_ref[...], 0.0)      # per-row masked NLL


# -----------------------------------------------------------------------------------------------
# Kernel B: shared Classifier (top -> ReLU -> bottom) on concatenated [CLS hidden ; OOD pooled],
#           plus intent CE and KL(log_softmax || uniform) reduced to one SMEM scalar.
# -----------------------------------------------------------------------------------------------
def classifier_kernel(x_ref, w_top_ref, b_top_ref, w_bot_ref, b_bot_ref, tgt_ref,
                      logits_ref, loss_ref, *, num_classes, batch):
  x = x_ref[...]                                                     # (2B, D) bf16
  mid = jnp.dot(x, w_top_ref[...], preferred_element_type=jnp.float32) + b_top_ref[...]
  mid = jnp.maximum(mid, 0.0).astype(jnp.bfloat16)
  logits = jnp.dot(mid, w_bot_ref[...], preferred_element_type=jnp.float32) + b_bot_ref[...]
  logits_ref[...] = logits                                           # (2B, CP) f32, lane-padded

  rows, cp = logits.shape
  ccol = lax.broadcasted_iota(jnp.int32, (rows, cp), 1)
  cmask = ccol < num_classes                                         # real (non-padded) classes
  masked = jnp.where(cmask, logits, -1e30)
  m = jnp.max(masked, axis=-1, keepdims=True)
  lse = m + jnp.log(jnp.sum(jnp.exp(masked - m), axis=-1, keepdims=True))

  row = lax.broadcasted_iota(jnp.int32, (rows, 1), 0)
  is_cls = (row < batch).astype(jnp.float32)                         # first B rows = intent branch

  # intent CE: CrossEntropyLoss(reduction='none') then mean over batch
  picked = jnp.sum(jnp.where(ccol == tgt_ref[...], logits, 0.0), axis=-1, keepdims=True)
  loss_cls = jnp.sum((lse - picked) * is_cls) * (1.0 / batch)

  # OOD: F.kl_div(log_softmax(logits), uniform), default reduction 'mean' over all elements
  logp = logits - lse
  unif = 1.0 / num_classes
  kl = jnp.where(cmask, unif * (math.log(unif) - logp), 0.0)
  kl_row = jnp.sum(kl, axis=-1, keepdims=True)
  loss_ent = jnp.sum(kl_row * (1.0 - is_cls)) * (1.0 / (batch * num_classes))

  loss_ref[0, 0] = loss_cls + 1e-4 * loss_ent


# -----------------------------------------------------------------------------------------------
# Wrapper
# -----------------------------------------------------------------------------------------------
def masker_intent_forward(params, seq_masked, seq_clean, pooled_ood, targets, masked_labels,
                          num_classes):
  B, S, D = seq_masked.shape
  V = params["w_ssl2"].shape[1]
  CP = params["w_bot"].shape[1]
  N = B * S

  # Lane/sublane-friendly tiles, sized for v7x's 64 MiB VMEM (comfortable on v5e/v6e too):
  # W2 tile (768 x 2048 bf16) ~3 MiB, bf16 logits tile (256 x 2048) ~1 MiB, x2 double buffering.
  TN = min(256, _round_up(N, 16))
  N_pad = _round_up(N, TN)
  TV = min(2048, _round_up(V, 128))
  V_pad = _round_up(V, TV)

  x_ssl = seq_masked.reshape(N, D)
  mlabels = masked_labels.reshape(N, 1).astype(jnp.int32)
  if N_pad != N:
    x_ssl = jnp.pad(x_ssl, ((0, N_pad - N), (0, 0)))
    mlabels = jnp.pad(mlabels, ((0, N_pad - N), (0, 0)), constant_values=-1)
  w_ssl2, b_ssl2 = params["w_ssl2"], params["b_ssl2"]
  if V_pad != V:                         # one-time padding of the vocab projection (hoistable)
    w_ssl2 = jnp.pad(w_ssl2, ((0, 0), (0, V_pad - V)))
    b_ssl2 = jnp.pad(b_ssl2, ((0, 0), (0, V_pad - V)))

  grid = (N_pad // TN, V_pad // TV)

  ssl_logits_p, nll = pl.pallas_call(
      functools.partial(ssl_head_kernel, vocab_size=V, v_tile=TV),
      out_shape=(
          jax.ShapeDtypeStruct((N_pad, V_pad), jnp.bfloat16),        # MLM logits (bf16 to halve HBM writes)
          jax.ShapeDtypeStruct((N_pad, 1), jnp.float32),             # per-row masked NLL
      ),
      grid_spec=pltpu.PrefetchScalarGridSpec(
          num_scalar_prefetch=0,
          grid=grid,
          in_specs=[
              pl.BlockSpec((TN, D), lambda i, v: (i, 0)),            # x row tile, resident over V
              pl.BlockSpec((D, D), lambda i, v: (0, 0)),             # W1 (constant across grid)
              pl.BlockSpec((1, D), lambda i, v: (0, 0)),             # b1
              pl.BlockSpec((D, TV), lambda i, v: (0, v)),            # W2 streamed over vocab tiles
              pl.BlockSpec((1, TV), lambda i, v: (0, v)),            # b2 tile
              pl.BlockSpec((TN, 1), lambda i, v: (i, 0)),            # MLM labels (-1 = ignore)
          ],
          out_specs=(
              pl.BlockSpec((TN, TV), lambda i, v: (i, v)),
              pl.BlockSpec((TN, 1), lambda i, v: (i, 0)),            # revisited across V; written on last v
          ),
          scratch_shapes=[
              pltpu.VMEM((TN, D), jnp.bfloat16),                     # h = relu(x @ W1 + b1)
              pltpu.VMEM((TN, 1), jnp.float32),                      # running max
              pltpu.VMEM((TN, 1), jnp.float32),                      # running sum-exp
              pltpu.VMEM((TN, 1), jnp.float32),                      # picked target logit
          ]),
      compiler_params=pltpu.CompilerParams(
          dimension_semantics=("parallel", "arbitrary"),
          vmem_limit_bytes=32 * 1024 * 1024),
  )(x_ssl, params["w_ssl1"], params["b_ssl1"], w_ssl2, b_ssl2, mlabels)

  # finish the scalar MLM loss (tiny reduction, f32)
  # NOTE: PyTorch CE with ignore_index returns NaN when no token is valid; here it returns 0.
  count = jnp.sum((masked_labels != -1).astype(jnp.float32))
  loss_ssl = jnp.sum(nll[:N, 0]) / jnp.maximum(count, 1.0)

  # Classifier branch: slice the CLS token in the wrapper (no full clean-sequence DMA) and fuse the
  # intent + OOD classify() calls into a single (2B, D) matmul path.
  hidden_cls = seq_clean[:, 0, :]                                    # (B, D) bf16, dropout = id
  x_cat = jnp.concatenate([hidden_cls, pooled_ood], axis=0)          # (2B, D)
  tgt = jnp.concatenate([targets.reshape(B, 1).astype(jnp.int32),
                         jnp.full((B, 1), -1, jnp.int32)], axis=0)   # OOD rows get dummy target

  vmem = pl.BlockSpec(memory_space=pltpu.MemorySpace.VMEM)
  smem = pl.BlockSpec(memory_space=pltpu.MemorySpace.SMEM)
  logits_cat, loss_cls_ent = pl.pallas_call(
      functools.partial(classifier_kernel, num_classes=num_classes, batch=B),
      out_shape=(
          jax.ShapeDtypeStruct((2 * B, CP), jnp.float32),
          jax.ShapeDtypeStruct((1, 1), jnp.float32),
      ),
      in_specs=[vmem] * 6,
      out_specs=(vmem, smem),
      compiler_params=pltpu.CompilerParams(vmem_limit_bytes=32 * 1024 * 1024),
  )(x_cat, params["w_top"], params["b_top"], params["w_bot"], params["b_bot"], tgt)

  logit = logits_cat[:B, :num_classes]
  out_ood_logits = logits_cat[B:, :num_classes]
  out_ssl_logits = ssl_logits_p[:N, :V].reshape(B, S, V)
  loss = loss_cls_ent[0, 0] + 1e-6 * loss_ssl                        # loss_cls + 1e-6*ssl + 1e-4*ent
  return logit, out_ssl_logits, out_ood_logits, loss


def init_params(key, D, V, H, C, HP=128, CP=128):
  ks = jax.random.split(key, 8)
  s = 0.02
  w_top = jax.random.normal(ks[4], (D, H), jnp.float32) * s
  b_top = jax.random.normal(ks[5], (1, H), jnp.float32) * s
  w_bot = jax.random.normal(ks[6], (H, C), jnp.float32) * s
  b_bot = jax.random.normal(ks[7], (1, C), jnp.float32) * s
  # Zero-pad the classifier to lane-friendly widths once (H->HP, C->CP); padded hidden lanes are
  # exactly 0 after ReLU and padded class columns are masked in the CE/KL epilogues.
  w_top_p = jnp.zeros((D, HP), jnp.float32).at[:, :H].set(w_top)
  b_top_p = jnp.zeros((1, HP), jnp.float32).at[:, :H].set(b_top)
  w_bot_p = jnp.zeros((HP, CP), jnp.float32).at[:H, :C].set(w_bot)
  b_bot_p = jnp.zeros((1, CP), jnp.float32).at[:, :C].set(b_bot)
  return {
      "w_ssl1": (jax.random.normal(ks[0], (D, D), jnp.float32) * s).astype(jnp.bfloat16),
      "b_ssl1": jax.random.normal(ks[1], (1, D), jnp.float32) * s,
      "w_ssl2": (jax.random.normal(ks[2], (D, V), jnp.float32) * s).astype(jnp.bfloat16),
      "b_ssl2": jax.random.normal(ks[3], (1, V), jnp.float32) * s,
      "w_top": w_top_p.astype(jnp.bfloat16),
      "b_top": b_top_p,
      "w_bot": w_bot_p.astype(jnp.bfloat16),
      "b_bot": b_bot_p,
  }


if __name__ == "__main__":
  B, S, D = 2, 8, 768          # D=768 is hard-coded by the module (net_ssl / dense)
  V, H, C = 128, 32, 16        # vocab_size, args.hidden_dim, target_size

  key = jax.random.PRNGKey(0)
  kp, k1, k2, k3, k4, k5 = jax.random.split(key, 6)
  params = init_params(kp, D, V, H, C)

  # Synthetic encoder outputs (stand-ins for BERT last_hidden_state / pooler_output), fed as bf16.
  seq_masked = jax.random.normal(k1, (B, S, D), jnp.float32).astype(jnp.bfloat16)
  seq_clean = jax.random.normal(k2, (B, S, D), jnp.float32).astype(jnp.bfloat16)
  pooled_ood = jax.random.normal(k3, (B, D), jnp.float32).astype(jnp.bfloat16)

  targets = jax.random.randint(k4, (B,), 0, C, jnp.int32)
  masked_labels = jax.random.randint(k5, (B, S), -1, V, jnp.int32)   # -1 => ignored token

  fwd = jax.jit(masker_intent_forward, static_argnames=("num_classes",))
  logit, out_ssl_logits, out_ood_logits, loss = fwd(
      params, seq_masked, seq_clean, pooled_ood, targets, masked_labels, num_classes=C)
  jax.block_until_ready((logit, out_ssl_logits, out_ood_logits, loss))

  assert logit.shape == (B, C)
  assert out_ssl_logits.shape == (B, S, V)
  assert out_ood_logits.shape == (B, C)
  assert loss.shape == ()
  print("KERNEL_OK")
</pallas_src>

<mosaic_0001>
module attributes {stable_mosaic.version = 11 : i64} {
  func.func @classifier_kernel(%arg0: memref<4x768xbf16, #tpu.memory_space<vmem>>, %arg1: memref<768x128xbf16, #tpu.memory_space<vmem>>, %arg2: memref<1x128xf32, #tpu.memory_space<vmem>>, %arg3: memref<128x128xbf16, #tpu.memory_space<vmem>>, %arg4: memref<1x128xf32, #tpu.memory_space<vmem>>, %arg5: memref<4x1xi32, #tpu.memory_space<vmem>>, %arg6: memref<4x128xf32, #tpu.memory_space<vmem>>, %arg7: memref<1x1xf32, #tpu.memory_space<smem>>) attributes {dimension_semantics = [], scalar_prefetch = 0 : i64, scratch_operands = 0 : i64, tpu.core_type = #tpu.core_type<tc>} {
    %c0 = arith.constant 0 : index
    %c0_0 = arith.constant 0 : index
    %0 = vector.load %arg0[%c0, %c0_0] : memref<4x768xbf16, #tpu.memory_space<vmem>>, vector<4x768xbf16>
    %c0_1 = arith.constant 0 : index
    %c0_2 = arith.constant 0 : index
    %1 = vector.load %arg1[%c0_1, %c0_2] : memref<768x128xbf16, #tpu.memory_space<vmem>>, vector<768x128xbf16>
    %cst = arith.constant dense<0.000000e+00> : vector<4x128xf32>
    %2 = tpu.matmul %0, %1, %cst {dimension_numbers = #tpu.dot_dimension_numbers<[1], [0], [0], [1], [0, 0, 1, 1], [], []>} : vector<4x768xbf16>, vector<768x128xbf16>, vector<4x128xf32> -> vector<4x128xf32>
    %c0_3 = arith.constant 0 : index
    %c0_4 = arith.constant 0 : index
    %3 = vector.load %arg2[%c0_3, %c0_4] : memref<1x128xf32, #tpu.memory_space<vmem>>, vector<1x128xf32>
    %4 = vector.broadcast %3 : vector<1x128xf32> to vector<4x128xf32>
    %5 = arith.addf %2, %4 : vector<4x128xf32>
    %cst_5 = arith.constant 0.000000e+00 : f32
    %6 = vector.broadcast %cst_5 : f32 to vector<4x128xf32>
    %7 = arith.maximumf %5, %6 : vector<4x128xf32>
    %8 = arith.truncf %7 : vector<4x128xf32> to vector<4x128xbf16>
    %c0_6 = arith.constant 0 : index
    %c0_7 = arith.constant 0 : index
    %9 = vector.load %arg3[%c0_6, %c0_7] : memref<128x128xbf16, #tpu.memory_space<vmem>>, vector<128x128xbf16>
    %cst_8 = arith.constant dense<0.000000e+00> : vector<4x128xf32>
    %10 = tpu.matmul %8, %9, %cst_8 {dimension_numbers = #tpu.dot_dimension_numbers<[1], [0], [0], [1], [0, 0, 1, 1], [], []>} : vector<4x128xbf16>, vector<128x128xbf16>, vector<4x128xf32> -> vector<4x128xf32>
    %c0_9 = arith.constant 0 : index
    %c0_10 = arith.constant 0 : index
    %11 = vector.load %arg4[%c0_9, %c0_10] : memref<1x128xf32, #tpu.memory_space<vmem>>, vector<1x128xf32>
    %12 = vector.broadcast %11 : vector<1x128xf32> to vector<4x128xf32>
    %13 = arith.addf %10, %12 : vector<4x128xf32>
    %c0_11 = arith.constant 0 : index
    %c0_12 = arith.constant 0 : index
    %14 = vector.load %arg6[%c0_11, %c0_12] : memref<4x128xf32, #tpu.memory_space<vmem>>, vector<4x128xf32>
    tpu.vector_store %arg6[%c0_11, %c0_12], %13 {strides = array<i32>} : memref<4x128xf32, #tpu.memory_space<vmem>>, vector<4x128xf32>,
    %15 = tpu.iota {dimensions = array<i32: 1>} : vector<4x128xi32>
    %c16_i32 = arith.constant 16 : i32
    %16 = vector.broadcast %c16_i32 : i32 to vector<4x128xi32>
    %17 = arith.cmpi slt, %15, %16 : vector<4x128xi32>
    %cst_13 = arith.constant -1.000000e+30 : f32
    %18 = vector.broadcast %cst_13 : f32 to vector<4x128xf32>
    %19 = arith.select %17, %13, %18 : vector<4x128xi1>, vector<4x128xf32>
    %cst_14 = arith.constant dense<0xFF800000> : vector<4xf32>
    %20 = vector.multi_reduction <maximumf>, %19, %cst_14 [1] : vector<4x128xf32> to vector<4xf32>
    %21 = vector.shape_cast %20 : vector<4xf32> to vector<4x1xf32>
    %22 = vector.broadcast %21 : vector<4x1xf32> to vector<4x128xf32>
    %23 = arith.subf %19, %22 : vector<4x128xf32>
    %24 = math.exp %23 : vector<4x128xf32>
    %cst_15 = arith.constant dense<0.000000e+00> : vector<4xf32>
    %25 = vector.multi_reduction <add>, %24, %cst_15 [1] : vector<4x128xf32> to vector<4xf32>
    %26 = vector.shape_cast %25 : vector<4xf32> to vector<4x1xf32>
    %27 = math.log %26 : vector<4x1xf32>
    %28 = arith.addf %21, %27 : vector<4x1xf32>
    %29 = tpu.iota {dimensions = array<i32: 0>} : vector<4x1xi32>
    %c2_i32 = arith.constant 2 : i32
    %30 = vector.broadcast %c2_i32 : i32 to vector<4x1xi32>
    %31 = arith.cmpi slt, %29, %30 : vector<4x1xi32>
    %32 = arith.extui %31 : vector<4x1xi1> to vector<4x1xi32>
    %33 = arith.sitofp %32 : vector<4x1xi32> to vector<4x1xf32>
    %c0_16 = arith.constant 0 : index
    %c0_17 = arith.constant 0 : index
    %34 = vector.load %arg5[%c0_16, %c0_17] : memref<4x1xi32, #tpu.memory_space<vmem>>, vector<4x1xi32>
    %35 = vector.broadcast %34 : vector<4x1xi32> to vector<4x128xi32>
    %36 = arith.cmpi eq, %15, %35 : vector<4x128xi32>
    %cst_18 = arith.constant 0.000000e+00 : f32
    %37 = vector.broadcast %cst_18 : f32 to vector<4x128xf32>
    %38 = arith.select %36, %13, %37 : vector<4x128xi1>, vector<4x128xf32>
    %cst_19 = arith.constant dense<0.000000e+00> : vector<4xf32>
    %39 = vector.multi_reduction <add>, %38, %cst_19 [1] : vector<4x128xf32> to vector<4xf32>
    %40 = vector.shape_cast %39 : vector<4xf32> to vector<4x1xf32>
    %41 = arith.subf %28, %40 : vector<4x1xf32>
    %42 = arith.mulf %41, %33 : vector<4x1xf32>
    %43 = vector.shape_cast %42 : vector<4x1xf32> to vector<1x4x1xf32>
    %cst_20 = arith.constant dense<0.000000e+00> : vector<1xf32>
    %44 = vector.multi_reduction <add>, %43, %cst_20 [1, 2] : vector<1x4x1xf32> to vector<1xf32>
    %45 = vector.shape_cast %44 : vector<1xf32> to vector<1x1x1xf32>
    %46 = vector.extract %45[0, 0, 0] : f32 from vector<1x1x1xf32>
    %cst_21 = arith.constant 5.000000e-01 : f32
    %47 = arith.mulf %46, %cst_21 : f32
    %48 = vector.broadcast %28 : vector<4x1xf32> to vector<4x128xf32>
    %49 = arith.subf %13, %48 : vector<4x128xf32>
    %cst_22 = arith.constant -2.77258873 : f32
    %50 = vector.broadcast %cst_22 : f32 to vector<4x128xf32>
    %51 = arith.subf %50, %49 : vector<4x128xf32>
    %cst_23 = arith.constant 6.250000e-02 : f32
    %52 = vector.broadcast %cst_23 : f32 to vector<4x128xf32>
    %53 = arith.mulf %52, %51 : vector<4x128xf32>
    %cst_24 = arith.constant 0.000000e+00 : f32
    %54 = vector.broadcast %cst_24 : f32 to vector<4x128xf32>
    %55 = arith.select %17, %53, %54 : vector<4x128xi1>, vector<4x128xf32>
    %cst_25 = arith.constant dense<0.000000e+00> : vector<4xf32>
    %56 = vector.multi_reduction <add>, %55, %cst_25 [1] : vector<4x128xf32> to vector<4xf32>
    %57 = vector.shape_cast %56 : vector<4xf32> to vector<4x1xf32>
    %cst_26 = arith.constant 1.000000e+00 : f32
    %58 = vector.broadcast %cst_26 : f32 to vector<4x1xf32>
    %59 = arith.subf %58, %33 : vector<4x1xf32>
    %60 = arith.mulf %57, %59 : vector<4x1xf32>
    %61 = vector.shape_cast %60 : vector<4x1xf32> to vector<1x4x1xf32>
    %cst_27 = arith.constant dense<0.000000e+00> : vector<1xf32>
    %62 = vector.multi_reduction <add>, %61, %cst_27 [1, 2] : vector<1x4x1xf32> to vector<1xf32>
    %63 = vector.shape_cast %62 : vector<1xf32> to vector<1x1x1xf32>
    %64 = vector.extract %63[0, 0, 0] : f32 from vector<1x1x1xf32>
    %cst_28 = arith.constant 3.125000e-02 : f32
    %65 = arith.mulf %64, %cst_28 : f32
    %cst_29 = arith.constant 9.99999974E-5 : f32
    %66 = arith.mulf %cst_29, %65 : f32
    %67 = arith.addf %47, %66 : f32
    %c0_30 = arith.constant 0 : index
    %c0_31 = arith.constant 0 : index
    %68 = memref.load %arg7[%c0_30, %c0_31] : memref<1x1xf32, #tpu.memory_space<smem>>
    memref.store %67, %arg7[%c0_30, %c0_31] : memref<1x1xf32, #tpu.memory_space<smem>>
    return
  }
}

module attributes {stable_mosaic.version = 11 : i64} {
  func.func @ssl_head_kernel(%arg0: i32, %arg1: i32, %arg2: memref<16x768xbf16, #tpu.memory_space<vmem>>, %arg3: memref<768x768xbf16, #tpu.memory_space<vmem>>, %arg4: memref<1x768xf32, #tpu.memory_space<vmem>>, %arg5: memref<768x128xbf16, #tpu.memory_space<vmem>>, %arg6: memref<1x128xf32, #tpu.memory_space<vmem>>, %arg7: memref<16x1xi32, #tpu.memory_space<vmem>>, %arg8: memref<16x128xbf16, #tpu.memory_space<vmem>>, %arg9: memref<16x1xf32, #tpu.memory_space<vmem>>, %arg10: memref<16x768xbf16, #tpu.memory_space<vmem>>, %arg11: memref<16x1xf32, #tpu.memory_space<vmem>>, %arg12: memref<16x1xf32, #tpu.memory_space<vmem>>, %arg13: memref<16x1xf32, #tpu.memory_space<vmem>>) attributes {dimension_semantics = [#tpu.dimension_semantics<parallel>, #tpu.dimension_semantics<arbitrary>], iteration_bounds = array<i64: 1, 1>, scalar_prefetch = 0 : i64, scratch_operands = 4 : i64, tpu.core_type = #tpu.core_type<tc>, window_params = [{transform_indices = @transform_0, window_bounds = array<i64: 16, 768>}, {pipeline_mode = #tpu.pipeline_mode<synchronous>, transform_indices = @transform_1, window_bounds = array<i64: 768, 768>}, {pipeline_mode = #tpu.pipeline_mode<synchronous>, transform_indices = @transform_2, window_bounds = array<i64: 1, 768>}, {transform_indices = @transform_3, window_bounds = array<i64: 768, 128>}, {transform_indices = @transform_4, window_bounds = array<i64: 1, 128>}, {transform_indices = @transform_5, window_bounds = array<i64: 16, 1>}, {transform_indices = @transform_6, window_bounds = array<i64: 16, 128>}, {transform_indices = @transform_7, window_bounds = array<i64: 16, 1>}]} {
    %c0_i32 = arith.constant 0 : i32
    %0 = arith.cmpi eq, %arg1, %c0_i32 : i32
    %1 = arith.extui %0 : i1 to i32
    %c0_i32_0 = arith.constant 0 : i32
    %2 = arith.cmpi ne, %1, %c0_i32_0 : i32
    scf.if %2 {
      %c0_30 = arith.constant 0 : index
      %c0_31 = arith.constant 0 : index
      %45 = vector.load %arg2[%c0_30, %c0_31] : memref<16x768xbf16, #tpu.memory_space<vmem>>, vector<16x768xbf16>
      %c0_32 = arith.constant 0 : index
      %c0_33 = arith.constant 0 : index
      %46 = vector.load %arg3[%c0_32, %c0_33] : memref<768x768xbf16, #tpu.memory_space<vmem>>, vector<768x768xbf16>
      %cst_34 = arith.constant dense<0.000000e+00> : vector<16x768xf32>
      %47 = tpu.matmul %45, %46, %cst_34 {dimension_numbers = #tpu.dot_dimension_numbers<[1], [0], [0], [1], [0, 0, 1, 1], [], []>} : vector<16x768xbf16>, vector<768x768xbf16>, vector<16x768xf32> -> vector<16x768xf32>
      %c0_35 = arith.constant 0 : index
      %c0_36 = arith.constant 0 : index
      %48 = vector.load %arg4[%c0_35, %c0_36] : memref<1x768xf32, #tpu.memory_space<vmem>>, vector<1x768xf32>
      %49 = vector.broadcast %48 : vector<1x768xf32> to vector<16x768xf32>
      %50 = arith.addf %47, %49 : vector<16x768xf32>
      %cst_37 = arith.constant 0.000000e+00 : f32
      %51 = vector.broadcast %cst_37 : f32 to vector<16x768xf32>
      %52 = arith.maximumf %50, %51 : vector<16x768xf32>
      %53 = arith.truncf %52 : vector<16x768xf32> to vector<16x768xbf16>
      %c0_38 = arith.constant 0 : index
      %c0_39 = arith.constant 0 : index
      %54 = vector.load %arg10[%c0_38, %c0_39] : memref<16x768xbf16, #tpu.memory_space<vmem>>, vector<16x768xbf16>
      tpu.vector_store %arg10[%c0_38, %c0_39], %53 {strides = array<i32>} : memref<16x768xbf16, #tpu.memory_space<vmem>>, vector<16x768xbf16>,
      %cst_40 = arith.constant -1.000000e+30 : f32
      %55 = vector.broadcast %cst_40 : f32 to vector<16x1xf32>
      %c0_41 = arith.constant 0 : index
      %c0_42 = arith.constant 0 : index
      %56 = vector.load %arg11[%c0_41, %c0_42] : memref<16x1xf32, #tpu.memory_space<vmem>>, vector<16x1xf32>
      tpu.vector_store %arg11[%c0_41, %c0_42], %55 {strides = array<i32>} : memref<16x1xf32, #tpu.memory_space<vmem>>, vector<16x1xf32>,
      %cst_43 = arith.constant 0.000000e+00 : f32
      %57 = vector.broadcast %cst_43 : f32 to vector<16x1xf32>
      %c0_44 = arith.constant 0 : index
      %c0_45 = arith.constant 0 : index
      %58 = vector.load %arg12[%c0_44, %c0_45] : memref<16x1xf32, #tpu.memory_space<vmem>>, vector<16x1xf32>
      tpu.vector_store %arg12[%c0_44, %c0_45], %57 {strides = array<i32>} : memref<16x1xf32, #tpu.memory_space<vmem>>, vector<16x1xf32>,
      %cst_46 = arith.constant 0.000000e+00 : f32
      %59 = vector.broadcast %cst_46 : f32 to vector<16x1xf32>
      %c0_47 = arith.constant 0 : index
      %c0_48 = arith.constant 0 : index
      %60 = vector.load %arg13[%c0_47, %c0_48] : memref<16x1xf32, #tpu.memory_space<vmem>>, vector<16x1xf32>
      tpu.vector_store %arg13[%c0_47, %c0_48], %59 {strides = array<i32>} : memref<16x1xf32, #tpu.memory_space<vmem>>, vector<16x1xf32>,
    } else {
    }
    %c0 = arith.constant 0 : index
    %c0_1 = arith.constant 0 : index
    %3 = vector.load %arg10[%c0, %c0_1] : memref<16x768xbf16, #tpu.memory_space<vmem>>, vector<16x768xbf16>
    %c0_2 = arith.constant 0 : index
    %c0_3 = arith.constant 0 : index
    %4 = vector.load %arg5[%c0_2, %c0_3] : memref<768x128xbf16, #tpu.memory_space<vmem>>, vector<768x128xbf16>
    %cst = arith.constant dense<0.000000e+00> : vector<16x128xf32>
    %5 = tpu.matmul %3, %4, %cst {dimension_numbers = #tpu.dot_dimension_numbers<[1], [0], [0], [1], [0, 0, 1, 1], [], []>} : vector<16x768xbf16>, vector<768x128xbf16>, vector<16x128xf32> -> vector<16x128xf32>
    %c0_4 = arith.constant 0 : index
    %c0_5 = arith.constant 0 : index
    %6 = vector.load %arg6[%c0_4, %c0_5] : memref<1x128xf32, #tpu.memory_space<vmem>>, vector<1x128xf32>
    %7 = vector.broadcast %6 : vector<1x128xf32> to vector<16x128xf32>
    %8 = arith.addf %5, %7 : vector<16x128xf32>
    %9 = arith.truncf %8 : vector<16x128xf32> to vector<16x128xbf16>
    %c0_6 = arith.constant 0 : index
    %c0_7 = arith.constant 0 : index
    %10 = vector.load %arg8[%c0_6, %c0_7] : memref<16x128xbf16, #tpu.memory_space<vmem>>, vector<16x128xbf16>
    tpu.vector_store %arg8[%c0_6, %c0_7], %9 {strides = array<i32>} : memref<16x128xbf16, #tpu.memory_space<vmem>>, vector<16x128xbf16>,
    %c0_8 = arith.constant 0 : index
    %c0_9 = arith.constant 0 : index
    %11 = vector.load %arg7[%c0_8, %c0_9] : memref<16x1xi32, #tpu.memory_space<vmem>>, vector<16x1xi32>
    %12 = tpu.iota {dimensions = array<i32: 1>} : vector<16x128xi32>
    %c128_i32 = arith.constant 128 : i32
    %13 = arith.muli %arg1, %c128_i32 : i32
    %14 = vector.broadcast %13 : i32 to vector<16x128xi32>
    %15 = arith.addi %12, %14 : vector<16x128xi32>
    %cst_10 = arith.constant dense<0xFF800000> : vector<16xf32>
    %16 = vector.multi_reduction <maximumf>, %8, %cst_10 [1] : vector<16x128xf32> to vector<16xf32>
    %17 = vector.shape_cast %16 : vector<16xf32> to vector<16x1xf32>
    %c0_11 = arith.constant 0 : index
    %c0_12 = arith.constant 0 : index
    %18 = vector.load %arg11[%c0_11, %c0_12] : memref<16x1xf32, #tpu.memory_space<vmem>>, vector<16x1xf32>
    %19 = arith.maximumf %18, %17 : vector<16x1xf32>
    %c0_13 = arith.constant 0 : index
    %c0_14 = arith.constant 0 : index
    %20 = vector.load %arg12[%c0_13, %c0_14] : memref<16x1xf32, #tpu.memory_space<vmem>>, vector<16x1xf32>
    %c0_15 = arith.constant 0 : index
    %c0_16 = arith.constant 0 : index
    %21 = vector.load %arg11[%c0_15, %c0_16] : memref<16x1xf32, #tpu.memory_space<vmem>>, vector<16x1xf32>
    %22 = arith.subf %21, %19 : vector<16x1xf32>
    %23 = math.exp %22 : vector<16x1xf32>
    %24 = arith.mulf %20, %23 : vector<16x1xf32>
    %25 = vector.broadcast %19 : vector<16x1xf32> to vector<16x128xf32>
    %26 = arith.subf %8, %25 : vector<16x128xf32>
    %27 = math.exp %26 : vector<16x128xf32>
    %cst_17 = arith.constant dense<0.000000e+00> : vector<16xf32>
    %28 = vector.multi_reduction <add>, %27, %cst_17 [1] : vector<16x128xf32> to vector<16xf32>
    %29 = vector.shape_cast %28 : vector<16xf32> to vector<16x1xf32>
    %30 = arith.addf %24, %29 : vector<16x1xf32>
    %c0_18 = arith.constant 0 : index
    %c0_19 = arith.constant 0 : index
    %31 = vector.load %arg12[%c0_18, %c0_19] : memref<16x1xf32, #tpu.memory_space<vmem>>, vector<16x1xf32>
    tpu.vector_store %arg12[%c0_18, %c0_19], %30 {strides = array<i32>} : memref<16x1xf32, #tpu.memory_space<vmem>>, vector<16x1xf32>,
    %c0_20 = arith.constant 0 : index
    %c0_21 = arith.constant 0 : index
    %32 = vector.load %arg11[%c0_20, %c0_21] : memref<16x1xf32, #tpu.memory_space<vmem>>, vector<16x1xf32>
    tpu.vector_store %arg11[%c0_20, %c0_21], %19 {strides = array<i32>} : memref<16x1xf32, #tpu.memory_space<vmem>>, vector<16x1xf32>,
    %c0_22 = arith.constant 0 : index
    %c0_23 = arith.constant 0 : index
    %33 = vector.load %arg13[%c0_22, %c0_23] : memref<16x1xf32, #tpu.memory_space<vmem>>, vector<16x1xf32>
    %34 = vector.broadcast %11 : vector<16x1xi32> to vector<16x128xi32>
    %35 = arith.cmpi eq, %15, %34 : vector<16x128xi32>
    %cst_24 = arith.constant 0.000000e+00 : f32
    %36 = vector.broadcast %cst_24 : f32 to vector<16x128xf32>
    %37 = arith.select %35, %8, %36 : vector<16x128xi1>, vector<16x128xf32>
    %cst_25 = arith.constant dense<0.000000e+00> : vector<16xf32>
    %38 = vector.multi_reduction <add>, %37, %cst_25 [1] : vector<16x128xf32> to vector<16xf32>
    %39 = vector.shape_cast %38 : vector<16xf32> to vector<16x1xf32>
    %40 = arith.addf %33, %39 : vector<16x1xf32>
    %c0_26 = arith.constant 0 : index
    %c0_27 = arith.constant 0 : index
    %41 = vector.load %arg13[%c0_26, %c0_27] : memref<16x1xf32, #tpu.memory_space<vmem>>, vector<16x1xf32>
    tpu.vector_store %arg13[%c0_26, %c0_27], %40 {strides = array<i32>} : memref<16x1xf32, #tpu.memory_space<vmem>>, vector<16x1xf32>,
    %c0_i32_28 = arith.constant 0 : i32
    %42 = arith.cmpi eq, %arg1, %c0_i32_28 : i32
    %43 = arith.extui %42 : i1 to i32
    %c0_i32_29 = arith.constant 0 : i32
    %44 = arith.cmpi ne, %43, %c0_i32_29 : i32
    scf.if %44 {
      %c-1_i32 = arith.constant -1 : i32
      %45 = vector.broadcast %c-1_i32 : i32 to vector<16x1xi32>
      %46 = arith.cmpi ne, %11, %45 : vector<16x1xi32>
      %c0_30 = arith.constant 0 : index
      %c0_31 = arith.constant 0 : index
      %47 = vector.load %arg11[%c0_30, %c0_31] : memref<16x1xf32, #tpu.memory_space<vmem>>, vector<16x1xf32>
      %c0_32 = arith.constant 0 : index
      %c0_33 = arith.constant 0 : index
      %48 = vector.load %arg12[%c0_32, %c0_33] : memref<16x1xf32, #tpu.memory_space<vmem>>, vector<16x1xf32>
      %49 = math.log %48 : vector<16x1xf32>
      %50 = arith.addf %47, %49 : vector<16x1xf32>
      %c0_34 = arith.constant 0 : index
      %c0_35 = arith.constant 0 : index
      %51 = vector.load %arg13[%c0_34, %c0_35] : memref<16x1xf32, #tpu.memory_space<vmem>>, vector<16x1xf32>
      %52 = arith.subf %50, %51 : vector<16x1xf32>
      %cst_36 = arith.constant 0.000000e+00 : f32
      %53 = vector.broadcast %cst_36 : f32 to vector<16x1xf32>
      %54 = arith.select %46, %52, %53 : vector<16x1xi1>, vector<16x1xf32>
      %c0_37 = arith.constant 0 : index
      %c0_38 = arith.constant 0 : index
      %55 = vector.load %arg9[%c0_37, %c0_38] : memref<16x1xf32, #tpu.memory_space<vmem>>, vector<16x1xf32>
      tpu.vector_store %arg9[%c0_37, %c0_38], %54 {strides = array<i32>} : memref<16x1xf32, #tpu.memory_space<vmem>>, vector<16x1xf32>,
    } else {
    }
    return
  }
  func.func @transform_0(%arg0: i32, %arg1: i32) -> (i32, i32) {
    %c0_i32 = arith.constant 0 : i32
    %c0_i32_0 = arith.constant 0 : i32
    return %arg0, %c0_i32 : i32, i32
  }
  func.func @transform_1(%arg0: i32, %arg1: i32) -> (i32, i32) {
    %c0_i32 = arith.constant 0 : i32
    %c0_i32_0 = arith.constant 0 : i32
    %c0_i32_1 = arith.constant 0 : i32
    return %c0_i32, %c0_i32_0 : i32, i32
  }
  func.func @transform_2(%arg0: i32, %arg1: i32) -> (i32, i32) {
    %c0_i32 = arith.constant 0 : i32
    %c0_i32_0 = arith.constant 0 : i32
    %c0_i32_1 = arith.constant 0 : i32
    return %c0_i32, %c0_i32_0 : i32, i32
  }
  func.func @transform_3(%arg0: i32, %arg1: i32) -> (i32, i32) {
    %c0_i32 = arith.constant 0 : i32
    %c0_i32_0 = arith.constant 0 : i32
    return %c0_i32, %arg1 : i32, i32
  }
  func.func @transform_4(%arg0: i32, %arg1: i32) -> (i32, i32) {
    %c0_i32 = arith.constant 0 : i32
    %c0_i32_0 = arith.constant 0 : i32
    return %c0_i32, %arg1 : i32, i32
  }
  func.func @transform_5(%arg0: i32, %arg1: i32) -> (i32, i32) {
    %c0_i32 = arith.constant 0 : i32
    %c0_i32_0 = arith.constant 0 : i32
    return %arg0, %c0_i32 : i32, i32
  }
  func.func @transform_6(%arg0: i32, %arg1: i32) -> (i32, i32) {
    %c0_i32 = arith.constant 0 : i32
    return %arg0, %arg1 : i32, i32
  }
  func.func @transform_7(%arg0: i32, %arg1: i32) -> (i32, i32) {
    %c0_i32 = arith.constant 0 : i32
    %c0_i32_0 = arith.constant 0 : i32
    return %arg0, %c0_i32 : i32, i32
  }
}

</mosaic_0001>

<bundles_post_ra>
// kernel: masker_intent_forward.3
= control target key start
LH: loop header
LB: loop body
LE: loop exit
PB: predicated region body
PF: predicated region fallthrough
CT: control target
= control target key end

     0   :  { %13 = vsyncpa [#allocation3], 0  ;;  %s1245_s0 = inlined_call_operand.vmem [shape: bf16[4,768], index: 0, kind: input, shape index: {}]   ;;  %s1246_s1 = inlined_call_operand.hbm [shape: bf16[768,128], index: 1, kind: input, shape index: {}]   ;;  %s1247_s2 = inlined_call_operand.hbm [shape: f32[1,128], index: 2, kind: input, shape index: {}]   ;;  %s1248_s3 = inlined_call_operand.hbm [shape: bf16[128,128], index: 3, kind: input, shape index: {}]   ;;  %s1249_s4 = inlined_call_operand.hbm [shape: f32[1,128], index: 4, kind: input, shape index: {}]   ;;  %s1250_s5 = inlined_call_operand.vmem [shape: s32[4,1], index: 5, kind: input, shape index: {}]   ;;  %s1251_s6 = inlined_call_operand.vmem [shape: f32[4,128], index: 6, kind: output, shape index: {0}]   ;;  %s1252_s7 = inlined_call_operand.hbm [shape: f32[1,1], index: 7, kind: output, shape index: {1}]  }
   0x1   :  { %14 = vsyncpa [#allocation6], 0 }
   0x2   :  { %15 = vsyncpa [#allocation9], 0  ;;  %s37_s26 = sshll.u32 %s1247_s2, 4  ;;  %s38_s26 = int_to_ptr.hbm [resolvable:$true] %s37_s26 }
   0x3   :  { %16 = vsyncpa [#allocation4], 0  ;;  %s1163_s27 = smov [#allocation5]   ;;  %s23_s8 = sshll.u32 %s1246_s1, 4  ;;  %s24_s8 = int_to_ptr.hbm [resolvable:$true] %s23_s8 }
   0x4   :  { %s39_s28 = sshll.u32 %s1163_s27, 4  ;;  %s1164_s9 = smov [#allocation2]   ;;  %s40_s28 = int_to_ptr.vmem [resolvable:$true] %s39_s28 }
   0x5   :  { %42 = dma.hbm_to_vmem [thread:$0]  %s38_s26, 16, %s40_s28, [#allocation6]  }
   0x6   :  { %s25_s10 = sshll.u32 %s1164_s9, 4  ;;  %s1165_s11 = smov 64   ;;  %s26_s10 = int_to_ptr.vmem [resolvable:$true] %s25_s10 }
   0x7   :  { %s1166_s12 = smov 4   ;;  %s47_s2 = sshll.u32 %s1248_s3, 4  ;;  %s48_s2 = int_to_ptr.hbm [resolvable:$true] %s47_s2 }
   0x8   :  { %31 = dma.hbm_to_vmem [thread:$0]  %s24_s8, 6144, %s26_s10, [#allocation3], %s1165_s11, %s1165_s11, %s1166_s12  }
   0x9   :  { %s1167_s15 = smov [#allocation7]   ;;  %s61_s1 = sshll.u32 %s1249_s4, 4  ;;  %s62_s1 = int_to_ptr.hbm [resolvable:$true] %s61_s1 }
   0xa   :  { %s49_s16 = sshll.u32 %s1167_s15, 4  ;;  %s1168_s19 = smov [#allocation8]   ;;  %s50_s16 = int_to_ptr.vmem [resolvable:$true] %s49_s16 }
   0xb   :  { %55 = dma.hbm_to_vmem [thread:$0]  %s48_s2, 1024, %s50_s16, [#allocation6], %s1165_s11, %s1165_s11, %s1166_s12  }
   0xc   :  { %s63_s20 = sshll.u32 %s1168_s19, 4  ;;  %s64_s20 = int_to_ptr.vmem [resolvable:$true] %s63_s20 }
   0xd   :  { %66 = dma.hbm_to_vmem [thread:$0]  %s62_s1, 16, %s64_s20, [#allocation9]  }
   0xe   :  { %1155 = dma.done.wait [#allocation3], 6144  }
   0xf   :  { %1156 = vsyncadd [#allocation3], 4294961152 }
  0x10   :  { %1157 = dma.done.wait [#allocation6], 1040  }
  0x11   :  { %1158 = vsyncadd [#allocation6], 4294966256 }
  0x12   :  { %1159 = dma.done.wait [#allocation9], 16  }
  0x13   :  { %1160 = vsyncadd [#allocation9], 4294967280  ;;  %v977_v0 = vld [vmem:[#allocation2 + $0x38] sm:$0xff]  ;;  %v976_v2 = vld [vmem:[#allocation2 + $0x30] sm:$0xff]  ;;  %vm658_vm2 = vcmask 1043456   ;;  %vm687_vm4 = vcmask 3072  }
  0x14   :  { %v985_v1 = vld [vmem:[#allocation2 + $0x78] sm:$0xff]  ;;  %492 = vmatpush.bf16.msra.mxu0 %v977_v0  ;;  %v984_v3 = vld [vmem:[#allocation2 + $0x70] sm:$0xff]  ;;  %v975_v8 = vld [vmem:[#allocation2 + $0x28] sm:$0xff]  ;;  %s730_s29 = sshll.u32 %s1252_s7, 4  ;;  %s1171_s10 = smov [#allocation10]   ;;  %s731_s29 = int_to_ptr.hbm [resolvable:$true] %s730_s29 }
  0x15   :  { %505 = vmatpush.bf16.msra.mxu1 %v985_v1  ;;  %v993_v4 = vld [vmem:[#allocation2 + $0xb8] sm:$0xff]  ;;  %v992_v6 = vld [vmem:[#allocation2 + $0xb0] sm:$0xff]  ;;  %v983_v9 = vld [vmem:[#allocation2 + $0x68] sm:$0xff] }
  0x16   :  { %v1001_v5 = vld [vmem:[#allocation2 + $0xf8] sm:$0xff]  ;;  %518 = vmatpush.bf16.msra.mxu2 %v993_v4  ;;  %v1000_v7 = vld [vmem:[#allocation2 + $0xf0] sm:$0xff]  ;;  %v991_v10 = vld [vmem:[#allocation2 + $0xa8] sm:$0xff] }
  0x17   :  { %531 = vmatpush.bf16.msra.mxu3 %v1001_v5  ;;  %v999_v11 = vld [vmem:[#allocation2 + $0xe8] sm:$0xff]  ;;  %v974_v12 = vld [vmem:[#allocation2 + $0x20] sm:$0xff]  ;;  %v85_v14 = vld [vmem:[%s1245_s0] sm:$0xff] }
  0x18   :  { %493 = vmatpush.bf16.msra.mxu0 %v976_v2  ;;  %v982_v13 = vld [vmem:[#allocation2 + $0x60] sm:$0xff]  ;;  %188 = vst [vmem:[#allocation1] ss:$4 sm:$0xff] %v85_v14  ;;  %v973_v16 = vld [vmem:[#allocation2 + $0x18] sm:$0xff]  ;;  %v972_v21 = vld [vmem:[#allocation2 + $0x10] sm:$0xff] }
  0x19   :  { %506 = vmatpush.bf16.msra.mxu1 %v984_v3  ;;  %v990_v15 = vld [vmem:[#allocation2 + $0xa0] sm:$0xff]  ;;  %v981_v18 = vld [vmem:[#allocation2 + $0x58] sm:$0xff]  ;;  %v980_v22 = vld [vmem:[#allocation2 + $0x50] sm:$0xff]  ;;  %v1169_v3 = vmov 0  }
  0x1a   :  { %519 = vmatpush.bf16.msra.mxu2 %v992_v6  ;;  %v998_v17 = vld [vmem:[#allocation2 + $0xe0] sm:$0xff]  ;;  %v989_v19 = vld [vmem:[#allocation2 + $0x98] sm:$0xff]  ;;  %v988_v23 = vld [vmem:[#allocation2 + $0x90] sm:$0xff]  ;;  %1039 = vset.pattern.permute.xlu1 %v1169_v3 }
  0x1b   :  { %532 = vmatpush.bf16.msra.mxu3 %v1000_v7  ;;  %v997_v20 = vld [vmem:[#allocation2 + $0xd8] sm:$0xff]  ;;  %v996_v24 = vld [vmem:[#allocation2 + $0xd0] sm:$0xff]  ;;  %v86_v25 = vld [vmem:[%s1245_s0 + $0x8] sm:$0xf]  ;;  %1040 = vset.pattern.permute.xlu0 %v1169_v3 }
  0x1c   :  { %494 = vmatpush.bf16.msra.mxu0 %v975_v8  ;;  %v971_v26 = vld [vmem:[#allocation2 + $0x8] sm:$0xff]  ;;  %191 = vst [vmem:[#allocation1 + $0x20] ss:$4 sm:$0xff] %v86_v25  ;;  %v970_v30 = vld [vmem:[#allocation2] sm:$0xff]  ;;  %v1009_v32 = vld [vmem:[#allocation2 + $0x138] sm:$0xff] }
  0x1d   :  { %507 = vmatpush.bf16.msra.mxu1 %v983_v9  ;;  %v979_v27 = vld [vmem:[#allocation2 + $0x48] sm:$0xff]  ;;  %v978_v31 = vld [vmem:[#allocation2 + $0x40] sm:$0xff]  ;;  %v1017_v33 = vld [vmem:[#allocation2 + $0x178] sm:$0xff] }
  0x1e   :  { %520 = vmatpush.bf16.msra.mxu2 %v991_v10  ;;  %v987_v28 = vld [vmem:[#allocation2 + $0x88] sm:$0xff]  ;;  %v986_v34 = vld [vmem:[#allocation2 + $0x80] sm:$0xff]  ;;  %v1008_v38 = vld [vmem:[#allocation2 + $0x130] sm:$0xff] }
  0x1f   :  { %533 = vmatpush.bf16.msra.mxu3 %v999_v11  ;;  %v995_v29 = vld [vmem:[#allocation2 + $0xc8] sm:$0xff]  ;;  %v994_v35 = vld [vmem:[#allocation2 + $0xc0] sm:$0xff]  ;;  %v192_v36 = vld.sshfl [vmem:[#allocation1] sm:$0xff pattern:$0x73625140] }
  0x20   :  { %495 = vmatpush.bf16.msra.mxu0 %v974_v12  ;;  %v193_v37 = vld.sshfl [vmem:[#allocation1 + $0x8] sm:$0xff pattern:$0x73625140]  ;;  %v1016_v39 = vld [vmem:[#allocation2 + $0x170] sm:$0xff]  ;;  %v1007_v42 = vld [vmem:[#allocation2 + $0x128] sm:$0xff] }
  0x21   :  { %508 = vmatpush.bf16.msra.mxu1 %v982_v13  ;;  %v194_v40 = vld.sshfl [vmem:[#allocation1 + $0x10] sm:$0xff pattern:$0x73625140]  ;;  %v195_v41 = vld.sshfl [vmem:[#allocation1 + $0x18] sm:$0xff pattern:$0x73625140] }
  0x22   :  { %521 = vmatpush.bf16.msra.mxu2 %v990_v15  ;;  %v1015_v43 = vld [vmem:[#allocation2 + $0x168] sm:$0xff]  ;;  %v1006_v44 = vld [vmem:[#allocation2 + $0x120] sm:$0xff]  ;;  %v1005_v46 = vld [vmem:[#allocation2 + $0x118] sm:$0xff] }
  0x23   :  { %534 = vmatpush.bf16.msra.mxu3 %v998_v17  ;;  %v1014_v45 = vld [vmem:[#allocation2 + $0x160] sm:$0xff]  ;;  %v1013_v47 = vld [vmem:[#allocation2 + $0x158] sm:$0xff]  ;;  %v1004_v48 = vld [vmem:[#allocation2 + $0x110] sm:$0xff] }
  0x24   :  { %496 = vmatpush.bf16.msra.mxu0 %v973_v16  ;;  %v1012_v49 = vld [vmem:[#allocation2 + $0x150] sm:$0xff]  ;;  %v1003_v50 = vld [vmem:[#allocation2 + $0x108] sm:$0xff]  ;;  %v1002_v52 = vld [vmem:[#allocation2 + $0x100] sm:$0xff] }
  0x25   :  { %509 = vmatpush.bf16.msra.mxu1 %v981_v18  ;;  %v1011_v51 = vld [vmem:[#allocation2 + $0x148] sm:$0xff]  ;;  %v1010_v53 = vld [vmem:[#allocation2 + $0x140] sm:$0xff]  ;;  %v196_v54 = vld.sshfl [vmem:[#allocation1 + $0x20] sm:$0xff pattern:$0x73625140] }
  0x26   :  { %522 = vmatpush.bf16.msra.mxu2 %v989_v19  ;;  %v197_v55 = vld.sshfl [vmem:[#allocation1 + $0x28] sm:$0xff pattern:$0x73625140]  ;;  %v1024_v57 = vld [vmem:[#allocation7 + $0x30] sm:$0xff]  ;;  %v1023_v58 = vld [vmem:[#allocation7 + $0x28] sm:$0xff] }
  0x27   :  { %535 = vmatpush.bf16.msra.mxu3 %v997_v20  ;;  %v1025_v56 = vld [vmem:[#allocation7 + $0x38] sm:$0xff]  ;;  %v1022_v59 = vld [vmem:[#allocation7 + $0x20] sm:$0xff]  ;;  %v1020_v61 = vld [vmem:[#allocation7 + $0x10] sm:$0xff] }
  0x28   :  { %497 = vmatpush.bf16.msra.mxu0 %v972_v21  ;;  %v1021_v60 = vld [vmem:[#allocation7 + $0x18] sm:$0xff]  ;;  %v1019_v62 = vld [vmem:[#allocation7 + $0x8] sm:$0xff]  ;;  %v1018_v1 = vld [vmem:[#allocation7] sm:$0xff] }
  0x29   :  { %510 = vmatpush.bf16.msra.mxu1 %v980_v22  ;;  %v676_v2 = vld [vmem:[%s1250_s5] sm:$0xf]  ;;  %v1041_v8 = vld [vmem:[#allocation5] ss:$0 sm:$0xff]  ;;  %v1042_v25 = vld [vmem:[#allocation8] ss:$0 sm:$0xff] }
  0x2a   :  { %523 = vmatpush.bf16.msra.mxu2 %v988_v23  ;;  %678 = vperm.xlu1 %1039, %v676_v2   ;;  %v654_v23 = vlaneseq }
  0x2b   :  { %536 = vmatpush.bf16.msra.mxu3 %v996_v24 }
  0x2c   :  { %498 = vmatpush.bf16.msra.mxu0 %v971_v26  ;;  %v655_v24 = vand.u32 127, %v654_v23 }
  0x2d   :  { %511 = vmatpush.bf16.msra.mxu1 %v979_v27 }
  0x2e   :  { %524 = vmatpush.bf16.msra.mxu2 %v987_v28  ;;  %vm656_vm1 = vcmp.lt.s32.totalorder %v655_v24, 16 }
  0x2f   :  { %537 = vmatpush.bf16.msra.mxu3 %v995_v29 }
  0x30   :  { %499 = vmatpush.bf16.msra.mxu0 %v970_v30 }
  0x31   :  { %512 = vmatpush.bf16.msra.mxu1 %v978_v31 }
  0x32   :  { %525 = vmatpush.bf16.msra.mxu2 %v986_v34 }
  0x33   :  { %500 = vmatmul.bf16.vlgmr.msra.gmra.mxu0 %v192_v36  ;;  %538 = vmatpush.bf16.msra.mxu3 %v994_v35 }
  0x34   :  { %544 = vmatpush.bf16.msrb.mxu0 %v1009_v32  ;;  %513 = vmatmul.bf16.vlgmr.msra.gmra.mxu1 %v193_v37 }
  0x35   :  { %557 = vmatpush.bf16.msrb.mxu1 %v1017_v33  ;;  %526 = vmatmul.bf16.vlgmr.msra.gmra.mxu2 %v194_v40 }
  0x36   :  { %539 = vmatmul.bf16.vlgmr.msra.gmra.mxu3 %v195_v41  ;;  %640 = vmatpush.bf16.msrb.mxu2 %v1025_v56 }
  0x38   :  { %545 = vmatpush.bf16.msrb.mxu0 %v1008_v38 }
  0x39   :  { %558 = vmatpush.bf16.msrb.mxu1 %v1016_v39 }
  0x3a   :  { %641 = vmatpush.bf16.msrb.mxu2 %v1024_v57 }
  0x3c   :  { %546 = vmatpush.bf16.msrb.mxu0 %v1007_v42 }
  0x3d   :  { %559 = vmatpush.bf16.msrb.mxu1 %v1015_v43 }
  0x3e   :  { %642 = vmatpush.bf16.msrb.mxu2 %v1023_v58 }
  0x40   :  { %547 = vmatpush.bf16.msrb.mxu0 %v1006_v44  ;;  %v672_v44 = vshrl.u32 %v654_v23, 7 }
  0x41   :  { %560 = vmatpush.bf16.msrb.mxu1 %v1014_v45 }
  0x42   :  { %643 = vmatpush.bf16.msrb.mxu2 %v1022_v59  ;;  %vm673_vm3 = vcmp.lt.s32.totalorder %v672_v44, 2 }
  0x44   :  { %548 = vmatpush.bf16.msrb.mxu0 %v1005_v46 }
  0x45   :  { %561 = vmatpush.bf16.msrb.mxu1 %v1013_v47 }
  0x46   :  { %644 = vmatpush.bf16.msrb.mxu2 %v1021_v60 }
  0x48   :  { %549 = vmatpush.bf16.msrb.mxu0 %v1004_v48 }
  0x49   :  { %562 = vmatpush.bf16.msrb.mxu1 %v1012_v49 }
  0x4a   :  { %645 = vmatpush.bf16.msrb.mxu2 %v1020_v61 }
  0x4c   :  { %550 = vmatpush.bf16.msrb.mxu0 %v1003_v50 }
  0x4d   :  { %563 = vmatpush.bf16.msrb.mxu1 %v1011_v51  ;;  %v1170_v51 = vmov 0.0  }
  0x4e   :  { %646 = vmatpush.bf16.msrb.mxu2 %v1019_v62 }
  0x50   :  { %551 = vmatpush.bf16.msrb.mxu0 %v1002_v52  ;;  %v969_v52 = vsel %vm673_vm3, 1.0, %v1170_v51 }
  0x51   :  { %564 = vmatpush.bf16.msrb.mxu1 %v1010_v53 }
  0x52   :  { %647 = vmatpush.bf16.msrb.mxu2 %v1018_v1 }
  0x53   :  { %552 = vmatmul.bf16.vlgmr.msrb.gmra.mxu0 %v196_v54 }
  0x54   :  { %565 = vmatmul.bf16.vlgmr.msrb.gmra.mxu1 %v197_v55  ;;  %v706_v55 = vsub.f32 1.0, %v969_v52 }
  0x9c   :  { %v679_v26 = vpop.permute.xlu1 %678 }
  0x9d   :  { %vm680_vm0 = vcmp.eq.s32.totalorder %v655_v24, %v679_v26 }
  0xb0   :  { %v501_v63 = vpop.f32.mrf.mxu0 }
  0xb1   :  { %v514_v0 = vpop.f32.mrf.mxu1  ;;  %v502_v9 = vadd.f32 %v1041_v8, %v501_v63 }
  0xb3   :  { %v515_v12 = vadd.f32 %v514_v0, %v502_v9 }
  0xb8   :  { %v503_v4 = vpop.f32.mrf.mxu0  ;;  %v527_v6 = vpop.f32.mrf.mxu2 }
  0xb9   :  { %v516_v5 = vpop.f32.mrf.mxu1  ;;  %v540_v7 = vpop.f32.mrf.mxu3  ;;  %v528_v13 = vadd.f32 %v527_v6, %v515_v12 }
  0xbb   :  { %v541_v14 = vadd.f32 %v540_v7, %v528_v13 }
  0xc0   :  { %v529_v10 = vpop.f32.mrf.mxu2 }
  0xc1   :  { %v542_v11 = vpop.f32.mrf.mxu3 }
  0xd0   :  { %v553_v15 = vpop.f32.mrf.mxu0 }
  0xd1   :  { %v566_v16 = vpop.f32.mrf.mxu1  ;;  %v554_v17 = vadd.f32 %v553_v15, %v541_v14 }
  0xd3   :  { %v567_v18 = vadd.f32 %v566_v16, %v554_v17 }
  0xd5   :  { %v570_v19 = vmax.f32 %v567_v18, 0.0 }
  0xd7   :  { %v571_v20 = vpack.c.bf16 %v570_v19, %v570_v19 }
  0xd8   :  { %v555_v21 = vpop.f32.mrf.mxu0 }
  0xd9   :  { %v568_v22 = vpop.f32.mrf.mxu1  ;;  %648 = vmatmul.bf16.vlgmr.msrb.gmra.mxu2 %v571_v20 }
 0x15c   :  { %v649_v27 = vpop.f32.mrf.mxu2 }
 0x15d   :  { %v650_v28 = vadd.f32 %v1042_v25, %v649_v27 }
 0x15f   :  { %653 = vst [vmem:[%s1251_s6] sm:$0xf] %v650_v28  ;;  %v681_v29 = vsel %vm680_vm0, %v650_v28, 0.0  ;;  %v657_v30 = vsel %vm656_vm1, %v650_v28, -1e+30 }
 0x160   :  { %v682_v31 = vsel %vm658_vm2, %v681_v29, 0.0  ;;  %v659_v32 = vsel %vm658_vm2, %v657_v30, -inf }
 0x161   :  { %683 = vadd.xlane.f32.xlu1 %v682_v31  ;;  %660 = vmax.xlane.f32.xlu0 %v659_v32 }
 0x164   :  { %v651_v33 = vpop.f32.mrf.mxu2 }
 0x1d4   :  { %v661_v34 = vpop.xlane.xlu0 %660  ;;  %v684_v47 = vpop.xlane.xlu1 %683 }
 0x1d5   :  { %v662_v35 = vsub.f32 %v657_v30, %v661_v34 }
 0x1d7   :  { %v663_v36 = vmul.f32 1.442695, %v662_v35 }
 0x1d9   :  { %1043 = vpow2.f32 %v663_v36 }
 0x1df   :  { %v1044_v37 = vpop.eup %1043 }
 0x1e0   :  { %v665_v38 = vsel %vm658_vm2, %v1044_v37, 0.0 }
 0x1e1   :  { %666 = vadd.xlane.f32.xlu0 %v665_v38 }
 0x254   :  { %v667_v39 = vpop.xlane.xlu0 %666 }
 0x255   :  { %1045 = vlog2.f32 %v667_v39 }
 0x25b   :  { %v1046_v40 = vpop.eup %1045 }
 0x25c   :  { %v669_v41 = vmul.f32 0.6931472, %v1046_v40 }
 0x25e   :  { %v670_v42 = vadd.f32 %v669_v41, %v661_v34 }
 0x260   :  { %v699_v43 = vsub.f32 %v650_v28, %v670_v42  ;;  %v685_v50 = vsub.f32 %v670_v42, %v684_v47 }
 0x262   :  { %v700_v45 = vsub.f32 -2.7725887, %v699_v43  ;;  %v686_v53 = vmul.f32 %v969_v52, %v685_v50 }
 0x264   :  { %v701_v46 = vmul.f32 0.0625, %v700_v45  ;;  %v688_v54 = vsel %vm687_vm4, %v686_v53, 0.0 }
 0x266   :  { %v702_v48 = vsel %vm656_vm1, %v701_v46, 0.0 }
 0x267   :  { %v703_v49 = vsel %vm658_vm2, %v702_v48, 0.0 }
 0x268   :  { %704 = vadd.xlane.f32.xlu2 %v703_v49 }
 0x270   :  { %689 = vadd.xlane.f32.xlu2 %v688_v54 }
 0x2db   :  { %v705_v56 = vpop.xlane.xlu2 %704 }
 0x2dc   :  { %v707_v57 = vmul.f32 %v706_v55, %v705_v56 }
 0x2de   :  { %v708_v58 = vsel %vm687_vm4, %v707_v57, 0.0 }
 0x2df   :  { %709 = vadd.xlane.f32.xlu0 %v708_v58 }
 0x2e3   :  { %v690_v59 = vpop.xlane.xlu2 %689 }
 0x2e4   :  { %v691_v60 = vrot.slane %v690_v59, 4 }
 0x2e6   :  { %v692_v61 = vadd.f32 %v691_v60, %v690_v59 }
 0x2e8   :  { %v693_v62 = vrot.slane %v692_v61, 2 }
 0x2ea   :  { %v694_v63 = vadd.f32 %v693_v62, %v692_v61 }
 0x2ec   :  { %v695_v0 = vrot.slane %v694_v63, 1 }
 0x2ee   :  { %v696_v1 = vadd.f32 %v695_v0, %v694_v63 }
 0x2f0   :  { %1026 = vpush %v696_v1 }
 0x321   :  { %s1027_s6 = spop %1026 }
 0x322   :  { %s698_s30 = smul.f32 0.5, %s1027_s6 }
 0x352   :  { %v710_v2 = vpop.xlane.xlu0 %709 }
 0x353   :  { %v711_v3 = vrot.slane %v710_v2, 4 }
 0x355   :  { %v712_v4 = vadd.f32 %v711_v3, %v710_v2 }
 0x357   :  { %v713_v5 = vrot.slane %v712_v4, 2 }
 0x359   :  { %v714_v6 = vadd.f32 %v713_v5, %v712_v4 }
 0x35b   :  { %v715_v7 = vrot.slane %v714_v6, 1 }
 0x35d   :  { %v716_v8 = vadd.f32 %v715_v7, %v714_v6 }
 0x35f   :  { %1028 = vpush %v716_v8 }
 0x390   :  { %s1029_s25 = spop %1028 }
 0x391   :  { %s718_s26 = smul.f32 0.03125, %s1029_s25 }
 0x393   :  { %s719_s8 = smul.f32 0.0001, %s718_s26 }
 0x395   :  { %s720_s9 = sadd.f32 %s719_s8, %s698_s30 }
 0x397   :  { %722 = sst [smem:[#allocation10]] %s720_s9 }
 0x398   :  { %733 = dma.smem_to_hbm %s1171_s10, 16, %s731_s29, [#allocation4]  }
 0x399   :  { %1161 = dma.done.wait [#allocation4], 16  }
 0x39a   :  { %1162 = vsyncadd [#allocation4], 4294967280 }
 0x39b   :  { %740 = sfence }
 0x39c   :  { %741 = vsyncpa [#allocation3], 1 }
 0x39d   :  { %742 = vsyncpa [#allocation6], 1 }
 0x39e   :  { %743 = vsyncpa [#allocation9], 1 }
 0x39f   :  { %744 = vsyncpa [#allocation4], 1 }

// kernel: masker_intent_forward.2
= control target key start
LH: loop header
LB: loop body
LE: loop exit
PB: predicated region body
PF: predicated region fallthrough
CT: control target
= control target key end

     0   :  { %13 = vsyncpa [#allocation7], 0  ;;  %s5209_s0 = inlined_call_operand.hbm [shape: bf16[16,768], index: 0, kind: input, shape index: {}]   ;;  %s5210_s1 = inlined_call_operand.hbm [shape: bf16[768,768], index: 1, kind: input, shape index: {}]   ;;  %s5211_s2 = inlined_call_operand.hbm [shape: f32[1,768], index: 2, kind: input, shape index: {}]   ;;  %s5212_s3 = inlined_call_operand.hbm [shape: bf16[768,128], index: 3, kind: input, shape index: {}]   ;;  %s5213_s4 = inlined_call_operand.hbm [shape: f32[1,128], index: 4, kind: input, shape index: {}]   ;;  %s5214_s5 = inlined_call_operand.vmem [shape: s32[16,1], index: 5, kind: input, shape index: {}]   ;;  %s5215_s6 = inlined_call_operand.hbm [shape: bf16[16,128], index: 6, kind: output, shape index: {0}]   ;;  %s5216_s7 = inlined_call_operand.vmem [shape: f32[16,1], index: 7, kind: output, shape index: {1}]  }
   0x1   :  { %14 = vsyncpa [#allocation10], 0 }
   0x2   :  { %15 = vsyncpa [#allocation13], 0 }
   0x3   :  { %16 = vsyncpa [#allocation8], 0  ;;  %s34_s26 = sshll.u32 %s5210_s1, 4  ;;  %s4976_s27 = smov [#allocation9]   ;;  %s35_s26 = int_to_ptr.hbm [resolvable:$true] %s34_s26 }
   0x4   :  { %s36_s28 = sshll.u32 %s4976_s27, 4  ;;  %s58_s8 = sshll.u32 %s5212_s3, 4  ;;  %s37_s28 = int_to_ptr.vmem [resolvable:$true] %s36_s28  ;;  %s59_s8 = int_to_ptr.hbm [resolvable:$true] %s58_s8 }
   0x5   :  { %s4977_s9 = smov 384   ;;  %s4978_s10 = smov 24  }
   0x6   :  { %42 = dma.hbm_to_vmem [thread:$0]  %s35_s26, 36864, %s37_s28, [#allocation10], %s4977_s9, %s4977_s9, %s4978_s10  }
   0x7   :  { %s4979_s11 = smov [#allocation12]   ;;  %s4980_s13 = smov 64  }
   0x8   :  { %s60_s12 = sshll.u32 %s4979_s11, 4  ;;  %s4981_s14 = smov 4   ;;  %s61_s12 = int_to_ptr.vmem [resolvable:$true] %s60_s12 }
   0x9   :  { %66 = dma.hbm_to_vmem [thread:$0]  %s59_s8, 6144, %s61_s12, [#allocation13], %s4980_s13, %s4980_s13, %s4981_s14  }
   0xa   :  { %s21_s16 = sshll.u32 %s5209_s0, 4  ;;  %s4982_s17 = smov [#allocation6]   ;;  %s22_s16 = int_to_ptr.hbm [resolvable:$true] %s21_s16 }
   0xb   :  { %s23_s3 = sshll.u32 %s4982_s17, 4  ;;  %s48_s20 = sshll.u32 %s5211_s2, 4  ;;  %s24_s3 = int_to_ptr.vmem [resolvable:$true] %s23_s3  ;;  %s49_s20 = int_to_ptr.hbm [resolvable:$true] %s48_s20 }
   0xc   :  { %29 = dma.hbm_to_vmem [thread:$0]  %s22_s16, 768, %s24_s3, [#allocation7], %s4977_s9, %s4977_s9, %s4978_s10  }
   0xd   :  { %s4983_s21 = smov [#allocation11]   ;;  %s72_s25 = sshll.u32 %s5213_s4, 4  ;;  %s73_s25 = int_to_ptr.hbm [resolvable:$true] %s72_s25 }
   0xe   :  { %s50_s22 = sshll.u32 %s4983_s21, 4  ;;  %s4984_s0 = smov [#allocation14]   ;;  %s51_s22 = int_to_ptr.vmem [resolvable:$true] %s50_s22 }
   0xf   :  { %53 = dma.hbm_to_vmem [thread:$0]  %s49_s20, 96, %s51_s22, [#allocation10]  }
  0x10   :  { %s74_s26 = sshll.u32 %s4984_s0, 4  ;;  %s75_s26 = int_to_ptr.vmem [resolvable:$true] %s74_s26 }
  0x11   :  { %77 = dma.hbm_to_vmem [thread:$0]  %s73_s25, 16, %s75_s26, [#allocation13]  }
  0x12   :  { %4968 = dma.done.wait [#allocation7], 768  }
  0x13   :  { %4969 = vsyncadd [#allocation7], 4294966528 }
  0x14   :  { %4970 = dma.done.wait [#allocation10], 36960  }
  0x15   :  { %4971 = vsyncadd [#allocation10], 4294930336 }
  0x16   :  { %4972 = dma.done.wait [#allocation13], 6160  }
  0x17   :  { %4973 = vsyncadd [#allocation13], 4294961136  ;;  %v3243_v0 = vld [vmem:[#allocation9 + $0x150] sm:$0xf]  ;;  %v4492_v1 = vld [vmem:[#allocation9 + $0x164] sm:$0xf0] }
  0x18   :  { %v3435_v2 = vld [vmem:[#allocation9 + $0x2d0] sm:$0xf]  ;;  %v3244_v3 = vor.u32 %v4492_v1, %v3243_v0  ;;  %v4540_v4 = vld [vmem:[#allocation9 + $0x2e4] sm:$0xf0]  ;;  %v3219_v11 = vld [vmem:[#allocation9 + $0x120] sm:$0xf] }
  0x19   :  { %v3627_v5 = vld [vmem:[#allocation9 + $0x450] sm:$0xf]  ;;  %v4588_v6 = vld [vmem:[#allocation9 + $0x464] sm:$0xf0]  ;;  %v3436_v7 = vor.u32 %v4540_v4, %v3435_v2  ;;  %v4486_v13 = vld [vmem:[#allocation9 + $0x134] sm:$0xf0] }
  0x1a   :  { %v3628_v8 = vor.u32 %v4588_v6, %v3627_v5  ;;  %v3819_v9 = vld [vmem:[#allocation9 + $0x5d0] sm:$0xf]  ;;  %v4636_v10 = vld [vmem:[#allocation9 + $0x5e4] sm:$0xf0]  ;;  %1882 = vmatpush.bf16.msra.mxu0 %v3244_v3  ;;  %v3411_v14 = vld [vmem:[#allocation9 + $0x2a0] sm:$0xf]  ;;  %v3220_v16 = vor.u32 %v4486_v13, %v3219_v11 }
  0x1b   :  { %v3820_v12 = vor.u32 %v4636_v10, %v3819_v9  ;;  %v4534_v15 = vld [vmem:[#allocation9 + $0x2b4] sm:$0xf0]  ;;  %1896 = vmatpush.bf16.msra.mxu1 %v3436_v7  ;;  %v3603_v18 = vld [vmem:[#allocation9 + $0x420] sm:$0xf]  ;;  %v3195_v23 = vld [vmem:[#allocation9 + $0xf0] sm:$0xf] }
  0x1c   :  { %1910 = vmatpush.bf16.msra.mxu2 %v3628_v8  ;;  %v3412_v17 = vor.u32 %v4534_v15, %v3411_v14  ;;  %v4582_v19 = vld [vmem:[#allocation9 + $0x434] sm:$0xf0]  ;;  %v3795_v20 = vld [vmem:[#allocation9 + $0x5a0] sm:$0xf]  ;;  %v4480_v24 = vld [vmem:[#allocation9 + $0x104] sm:$0xf0] }
  0x1d   :  { %1924 = vmatpush.bf16.msra.mxu3 %v3820_v12  ;;  %v3604_v21 = vor.u32 %v4582_v19, %v3603_v18  ;;  %v4630_v22 = vld [vmem:[#allocation9 + $0x5b4] sm:$0xf0]  ;;  %v3387_v26 = vld [vmem:[#allocation9 + $0x270] sm:$0xf]  ;;  %v4528_v27 = vld [vmem:[#allocation9 + $0x284] sm:$0xf0]  ;;  %v3196_v29 = vor.u32 %v4480_v24, %v3195_v23 }
  0x1e   :  { %v3796_v25 = vor.u32 %v4630_v22, %v3795_v20  ;;  %v3579_v28 = vld [vmem:[#allocation9 + $0x3f0] sm:$0xf]  ;;  %1883 = vmatpush.bf16.msra.mxu0 %v3220_v16  ;;  %v4576_v30 = vld [vmem:[#allocation9 + $0x404] sm:$0xf0]  ;;  %v3388_v33 = vor.u32 %v4528_v27, %v3387_v26  ;;  %v3171_v35 = vld [vmem:[#allocation9 + $0xc0] sm:$0xf] }
  0x1f   :  { %v3771_v31 = vld [vmem:[#allocation9 + $0x570] sm:$0xf]  ;;  %v4624_v32 = vld [vmem:[#allocation9 + $0x584] sm:$0xf0]  ;;  %1897 = vmatpush.bf16.msra.mxu1 %v3412_v17  ;;  %v3580_v34 = vor.u32 %v4576_v30, %v3579_v28  ;;  %v4474_v36 = vld [vmem:[#allocation9 + $0xd4] sm:$0xf0] }
  0x20   :  { %1911 = vmatpush.bf16.msra.mxu2 %v3604_v21  ;;  %v3363_v37 = vld [vmem:[#allocation9 + $0x240] sm:$0xf]  ;;  %v3772_v38 = vor.u32 %v4624_v32, %v3771_v31  ;;  %v4522_v39 = vld [vmem:[#allocation9 + $0x254] sm:$0xf0]  ;;  %v3172_v44 = vor.u32 %v4474_v36, %v3171_v35  ;;  %v3147_v47 = vld [vmem:[#allocation9 + $0x90] sm:$0xf] }
  0x21   :  { %1925 = vmatpush.bf16.msra.mxu3 %v3796_v25  ;;  %v3555_v40 = vld [vmem:[#allocation9 + $0x3c0] sm:$0xf]  ;;  %v4570_v41 = vld [vmem:[#allocation9 + $0x3d4] sm:$0xf0]  ;;  %v3364_v45 = vor.u32 %v4522_v39, %v3363_v37  ;;  %v4468_v48 = vld [vmem:[#allocation9 + $0xa4] sm:$0xf0] }
  0x22   :  { %v3747_v42 = vld [vmem:[#allocation9 + $0x540] sm:$0xf]  ;;  %v4618_v43 = vld [vmem:[#allocation9 + $0x554] sm:$0xf0]  ;;  %1884 = vmatpush.bf16.msra.mxu0 %v3196_v29  ;;  %v3556_v46 = vor.u32 %v4570_v41, %v3555_v40  ;;  %v3339_v49 = vld [vmem:[#allocation9 + $0x210] sm:$0xf]  ;;  %v3148_v56 = vor.u32 %v4468_v48, %v3147_v47 }
  0x23   :  { %1898 = vmatpush.bf16.msra.mxu1 %v3388_v33  ;;  %v3748_v50 = vor.u32 %v4618_v43, %v3747_v42  ;;  %v4516_v51 = vld [vmem:[#allocation9 + $0x224] sm:$0xf0]  ;;  %v3531_v52 = vld [vmem:[#allocation9 + $0x390] sm:$0xf]  ;;  %v3123_v59 = vld [vmem:[#allocation9 + $0x60] sm:$0xf] }
  0x24   :  { %1912 = vmatpush.bf16.msra.mxu2 %v3580_v34  ;;  %v4564_v53 = vld [vmem:[#allocation9 + $0x3a4] sm:$0xf0]  ;;  %v3723_v54 = vld [vmem:[#allocation9 + $0x510] sm:$0xf]  ;;  %v3340_v57 = vor.u32 %v4516_v51, %v3339_v49  ;;  %v4462_v60 = vld [vmem:[#allocation9 + $0x74] sm:$0xf0] }
  0x25   :  { %1926 = vmatpush.bf16.msra.mxu3 %v3772_v38  ;;  %v4612_v55 = vld [vmem:[#allocation9 + $0x524] sm:$0xf0]  ;;  %v3532_v58 = vor.u32 %v4564_v53, %v3531_v52  ;;  %v3315_v61 = vld [vmem:[#allocation9 + $0x1e0] sm:$0xf]  ;;  %v4510_v63 = vld [vmem:[#allocation9 + $0x1f4] sm:$0xf0]  ;;  %v3124_v4 = vor.u32 %v4462_v60, %v3123_v59 }
  0x26   :  { %1885 = vmatpush.bf16.msra.mxu0 %v3172_v44  ;;  %v3724_v62 = vor.u32 %v4612_v55, %v3723_v54  ;;  %v3507_v0 = vld [vmem:[#allocation9 + $0x360] sm:$0xf]  ;;  %v4558_v1 = vld [vmem:[#allocation9 + $0x374] sm:$0xf0]  ;;  %v3316_v5 = vor.u32 %v4510_v63, %v3315_v61  ;;  %v3099_v7 = vld [vmem:[#allocation9 + $0x30] sm:$0xf] }
  0x27   :  { %1899 = vmatpush.bf16.msra.mxu1 %v3364_v45  ;;  %v3699_v2 = vld [vmem:[#allocation9 + $0x4e0] sm:$0xf]  ;;  %v4606_v3 = vld [vmem:[#allocation9 + $0x4f4] sm:$0xf0]  ;;  %v3508_v6 = vor.u32 %v4558_v1, %v3507_v0  ;;  %v4456_v8 = vld [vmem:[#allocation9 + $0x44] sm:$0xf0] }
  0x28   :  { %1913 = vmatpush.bf16.msra.mxu2 %v3556_v46  ;;  %v3291_v9 = vld [vmem:[#allocation9 + $0x1b0] sm:$0xf]  ;;  %v3700_v10 = vor.u32 %v4606_v3, %v3699_v2  ;;  %v4504_v11 = vld [vmem:[#allocation9 + $0x1c4] sm:$0xf0]  ;;  %v3100_v16 = vor.u32 %v4456_v8, %v3099_v7  ;;  %v3075_v17 = vld [vmem:[#allocation9] sm:$0xf] }
  0x29   :  { %1927 = vmatpush.bf16.msra.mxu3 %v3748_v50  ;;  %v3483_v12 = vld [vmem:[#allocation9 + $0x330] sm:$0xf]  ;;  %v4552_v13 = vld [vmem:[#allocation9 + $0x344] sm:$0xf0]  ;;  %v4450_v18 = vld [vmem:[#allocation9 + $0x14] sm:$0xf0]  ;;  %v3292_v19 = vor.u32 %v4504_v11, %v3291_v9 }
  0x2a   :  { %1886 = vmatpush.bf16.msra.mxu0 %v3148_v56  ;;  %v3675_v14 = vld [vmem:[#allocation9 + $0x4b0] sm:$0xf]  ;;  %v4600_v15 = vld [vmem:[#allocation9 + $0x4c4] sm:$0xf0]  ;;  %v3484_v20 = vor.u32 %v4552_v13, %v3483_v12  ;;  %v3267_v21 = vld [vmem:[#allocation9 + $0x180] sm:$0xf]  ;;  %v3076_v31 = vor.u32 %v4450_v18, %v3075_v17 }
  0x2b   :  { %1900 = vmatpush.bf16.msra.mxu1 %v3340_v57  ;;  %v4498_v22 = vld [vmem:[#allocation9 + $0x194] sm:$0xf0]  ;;  %v3459_v23 = vld [vmem:[#allocation9 + $0x300] sm:$0xf]  ;;  %v3676_v24 = vor.u32 %v4600_v15, %v3675_v14  ;;  %v4011_v28 = vld [vmem:[#allocation9 + $0x750] sm:$0xf] }
  0x2c   :  { %1914 = vmatpush.bf16.msra.mxu2 %v3532_v58  ;;  %v4546_v25 = vld [vmem:[#allocation9 + $0x314] sm:$0xf0]  ;;  %v3651_v26 = vld [vmem:[#allocation9 + $0x480] sm:$0xf]  ;;  %v4684_v29 = vld [vmem:[#allocation9 + $0x764] sm:$0xf0]  ;;  %v3268_v35 = vor.u32 %v4498_v22, %v3267_v21 }
  0x2d   :  { %1928 = vmatpush.bf16.msra.mxu3 %v3724_v62  ;;  %v4594_v27 = vld [vmem:[#allocation9 + $0x494] sm:$0xf0]  ;;  %v4203_v30 = vld [vmem:[#allocation9 + $0x8d0] sm:$0xf]  ;;  %v4732_v32 = vld [vmem:[#allocation9 + $0x8e4] sm:$0xf0]  ;;  %v3460_v36 = vor.u32 %v4546_v25, %v3459_v23  ;;  %v4012_v40 = vor.u32 %v4684_v29, %v4011_v28 }
  0x2e   :  { %1887 = vmatpush.bf16.msra.mxu0 %v3124_v4  ;;  %v4489_v33 = vld [vmem:[#allocation9 + $0x154] sm:$0xf]  ;;  %v3245_v34 = vld [vmem:[#allocation9 + $0x168] sm:$0xf0]  ;;  %v3652_v39 = vor.u32 %v4594_v27, %v3651_v26  ;;  %v3987_v41 = vld [vmem:[#allocation9 + $0x720] sm:$0xf]  ;;  %v4204_v42 = vor.u32 %v4732_v32, %v4203_v30 }
  0x2f   :  { %1901 = vmatpush.bf16.msra.mxu1 %v3316_v5  ;;  %v4537_v37 = vld [vmem:[#allocation9 + $0x2d4] sm:$0xf]  ;;  %v3437_v38 = vld [vmem:[#allocation9 + $0x2e8] sm:$0xf0]  ;;  %v3248_v43 = vor.u32 %v4489_v33, %v3245_v34  ;;  %v4678_v44 = vld [vmem:[#allocation9 + $0x734] sm:$0xf0] }
  0x30   :  { %1915 = vmatpush.bf16.msra.mxu2 %v3508_v6  ;;  %v4179_v45 = vld [vmem:[#allocation9 + $0x8a0] sm:$0xf]  ;;  %v4726_v46 = vld [vmem:[#allocation9 + $0x8b4] sm:$0xf0]  ;;  %v3440_v47 = vor.u32 %v4537_v37, %v3437_v38  ;;  %v4483_v48 = vld [vmem:[#allocation9 + $0x124] sm:$0xf]  ;;  %v3988_v54 = vor.u32 %v4678_v44, %v3987_v41 }
  0x31   :  { %1929 = vmatpush.bf16.msra.mxu3 %v3700_v10  ;;  %v3221_v49 = vld [vmem:[#allocation9 + $0x138] sm:$0xf0]  ;;  %v4531_v50 = vld [vmem:[#allocation9 + $0x2a4] sm:$0xf]  ;;  %v3051_v52 = vld [vmem:[#allocation6] sm:$0xf]  ;;  %v4180_v58 = vor.u32 %v4726_v46, %v4179_v45 }
  0x32   :  { %1888 = vmatpush.bf16.msra.mxu0 %v3100_v16  ;;  %v3413_v51 = vld [vmem:[#allocation9 + $0x2b8] sm:$0xf0]  ;;  %v4444_v53 = vld [vmem:[#allocation6 + $0x14] sm:$0xf0]  ;;  %v3963_v55 = vld [vmem:[#allocation9 + $0x6f0] sm:$0xf]  ;;  %v3224_v59 = vor.u32 %v4483_v48, %v3221_v49 }
  0x33   :  { %1902 = vmatpush.bf16.msra.mxu1 %v3292_v19  ;;  %v4672_v56 = vld [vmem:[#allocation9 + $0x704] sm:$0xf0]  ;;  %v5047_v57 = vor.u32 %v4444_v53, %v3051_v52  ;;  %v4155_v60 = vld [vmem:[#allocation9 + $0x870] sm:$0xf]  ;;  %v4477_v62 = vld [vmem:[#allocation9 + $0xf4] sm:$0xf]  ;;  %v3416_v63 = vor.u32 %v4531_v50, %v3413_v51 }
  0x34   :  { %1916 = vmatpush.bf16.msra.mxu2 %v3484_v20  ;;  %v4720_v61 = vld [vmem:[#allocation9 + $0x884] sm:$0xf0]  ;;  %v3197_v0 = vld [vmem:[#allocation9 + $0x108] sm:$0xf0]  ;;  %v4441_v1 = vld [vmem:[#allocation6 + $0x4] sm:$0xf]  ;;  %v3964_v7 = vor.u32 %v4672_v56, %v3963_v55 }
  0x35   :  { %1930 = vmatpush.bf16.msra.mxu3 %v3676_v24  ;;  %v3053_v2 = vld [vmem:[#allocation6 + $0x18] sm:$0xf0]  ;;  %v4525_v3 = vld [vmem:[#allocation9 + $0x274] sm:$0xf]  ;;  %v3939_v5 = vld [vmem:[#allocation9 + $0x6c0] sm:$0xf]  ;;  %v4156_v11 = vor.u32 %v4720_v61, %v4155_v60  ;;  %v3200_v12 = vor.u32 %v4477_v62, %v3197_v0 }
  0x36   :  { %1889 = vmatpush.bf16.msra.mxu0 %v3076_v31  ;;  %v3389_v4 = vld [vmem:[#allocation9 + $0x288] sm:$0xf0]  ;;  %v5050_v6 = vor.u32 %v4441_v1, %v3053_v2  ;;  %v4666_v8 = vld [vmem:[#allocation9 + $0x6d4] sm:$0xf0]  ;;  %v4131_v9 = vld [vmem:[#allocation9 + $0x840] sm:$0xf] }
  0x37   :  { %1903 = vmatpush.bf16.msra.mxu1 %v3268_v35  ;;  %v4714_v10 = vld [vmem:[#allocation9 + $0x854] sm:$0xf0]  ;;  %v4471_v13 = vld [vmem:[#allocation9 + $0xc4] sm:$0xf]  ;;  %v3173_v14 = vld [vmem:[#allocation9 + $0xd8] sm:$0xf0]  ;;  %v3392_v16 = vor.u32 %v4525_v3, %v3389_v4  ;;  %v3940_v24 = vor.u32 %v4666_v8, %v3939_v5 }
  0x38   :  { %1917 = vmatpush.bf16.msra.mxu2 %v3460_v36  ;;  %v3059_v15 = vld [vmem:[#allocation6 + $0x8] sm:$0xf]  ;;  %v4445_v17 = vld [vmem:[#allocation6 + $0x1c] sm:$0xf0]  ;;  %v4442_v18 = vld [vmem:[#allocation6 + $0xc] sm:$0xf]  ;;  %v4132_v25 = vor.u32 %v4714_v10, %v4131_v9  ;;  %v3176_v26 = vor.u32 %v4471_v13, %v3173_v14 }
  0x39   :  { %1931 = vmatpush.bf16.msra.mxu3 %v3652_v39  ;;  %1890 = vmatmul.bf16.vlgmr.msra.gmra.mxu0 %v5047_v57  ;;  %v3061_v19 = vld [vmem:[#allocation6 + $0x20] sm:$0xf0]  ;;  %v4519_v20 = vld [vmem:[#allocation9 + $0x244] sm:$0xf]  ;;  %v3365_v21 = vld [vmem:[#allocation9 + $0x258] sm:$0xf0]  ;;  %v5053_v22 = vor.u32 %v4445_v17, %v3059_v15 }
  0x3a   :  { %1938 = vmatpush.bf16.msrb.mxu0 %v4012_v40  ;;  %1904 = vmatmul.bf16.vlgmr.msra.gmra.mxu1 %v5050_v6  ;;  %v5055_v23 = vor.u32 %v4442_v18, %v3061_v19  ;;  %v3915_v27 = vld [vmem:[#allocation9 + $0x690] sm:$0xf]  ;;  %v4660_v28 = vld [vmem:[#allocation9 + $0x6a4] sm:$0xf0]  ;;  %v3368_v30 = vor.u32 %v4519_v20, %v3365_v21  ;;  %v4465_v32 = vld [vmem:[#allocation9 + $0x94] sm:$0xf] }
  0x3b   :  { %1952 = vmatpush.bf16.msrb.mxu1 %v4204_v42  ;;  %v4107_v29 = vld [vmem:[#allocation9 + $0x810] sm:$0xf]  ;;  %v4708_v31 = vld [vmem:[#allocation9 + $0x824] sm:$0xf0]  ;;  %v3149_v33 = vld [vmem:[#allocation9 + $0xa8] sm:$0xf0]  ;;  %1918 = vmatmul.bf16.vlgmr.msra.gmra.mxu2 %v5053_v22  ;;  %v3916_v36 = vor.u32 %v4660_v28, %v3915_v27 }
  0x3c   :  { %1966 = vmatpush.bf16.msrb.mxu2 %v3248_v43  ;;  %v4513_v34 = vld [vmem:[#allocation9 + $0x214] sm:$0xf]  ;;  %v3341_v35 = vld [vmem:[#allocation9 + $0x228] sm:$0xf0]  ;;  %1932 = vmatmul.bf16.vlgmr.msra.gmra.mxu3 %v5055_v23  ;;  %v4108_v37 = vor.u32 %v4708_v31, %v4107_v29  ;;  %v3152_v38 = vor.u32 %v4465_v32, %v3149_v33  ;;  %v3891_v39 = vld [vmem:[#allocation9 + $0x660] sm:$0xf] }
  0x3d   :  { %1980 = vmatpush.bf16.msrb.mxu3 %v3440_v47  ;;  %v4654_v40 = vld [vmem:[#allocation9 + $0x674] sm:$0xf0]  ;;  %v4083_v41 = vld [vmem:[#allocation9 + $0x7e0] sm:$0xf]  ;;  %v3344_v42 = vor.u32 %v4513_v34, %v3341_v35  ;;  %v4459_v44 = vld [vmem:[#allocation9 + $0x64] sm:$0xf] }
  0x3e   :  { %1939 = vmatpush.bf16.msrb.mxu0 %v3988_v54  ;;  %v4702_v43 = vld [vmem:[#allocation9 + $0x7f4] sm:$0xf0]  ;;  %v3125_v45 = vld [vmem:[#allocation9 + $0x78] sm:$0xf0]  ;;  %v4507_v46 = vld [vmem:[#allocation9 + $0x1e4] sm:$0xf]  ;;  %v3892_v48 = vor.u32 %v4654_v40, %v3891_v39 }
  0x3f   :  { %1953 = vmatpush.bf16.msrb.mxu1 %v4180_v58  ;;  %v3317_v47 = vld [vmem:[#allocation9 + $0x1f8] sm:$0xf0]  ;;  %v4084_v49 = vor.u32 %v4702_v43, %v4083_v41  ;;  %v3128_v50 = vor.u32 %v4459_v44, %v3125_v45  ;;  %v3867_v51 = vld [vmem:[#allocation9 + $0x630] sm:$0xf]  ;;  %v4648_v52 = vld [vmem:[#allocation9 + $0x644] sm:$0xf0] }
  0x40   :  { %1967 = vmatpush.bf16.msrb.mxu2 %v3224_v59  ;;  %v4059_v53 = vld [vmem:[#allocation9 + $0x7b0] sm:$0xf]  ;;  %v3320_v54 = vor.u32 %v4507_v46, %v3317_v47  ;;  %v4696_v55 = vld [vmem:[#allocation9 + $0x7c4] sm:$0xf0]  ;;  %v4453_v56 = vld [vmem:[#allocation9 + $0x34] sm:$0xf]  ;;  %v3868_v61 = vor.u32 %v4648_v52, %v3867_v51 }
  0x41   :  { %1981 = vmatpush.bf16.msrb.mxu3 %v3416_v63  ;;  %v3101_v58 = vld [vmem:[#allocation9 + $0x48] sm:$0xf0]  ;;  %v4501_v59 = vld [vmem:[#allocation9 + $0x1b4] sm:$0xf]  ;;  %v3843_v62 = vld [vmem:[#allocation9 + $0x600] sm:$0xf]  ;;  %v4060_v1 = vor.u32 %v4696_v55, %v4059_v53 }
  0x42   :  { %1940 = vmatpush.bf16.msrb.mxu0 %v3964_v7  ;;  %v3293_v60 = vld [vmem:[#allocation9 + $0x1c8] sm:$0xf0]  ;;  %v4642_v63 = vld [vmem:[#allocation9 + $0x614] sm:$0xf0]  ;;  %v4035_v0 = vld [vmem:[#allocation9 + $0x780] sm:$0xf]  ;;  %v3104_v2 = vor.u32 %v4453_v56, %v3101_v58 }
  0x43   :  { %1954 = vmatpush.bf16.msrb.mxu1 %v4156_v11  ;;  %v4690_v3 = vld [vmem:[#allocation9 + $0x794] sm:$0xf0]  ;;  %v4447_v4 = vld [vmem:[#allocation9 + $0x4] sm:$0xf]  ;;  %v3077_v5 = vld [vmem:[#allocation9 + $0x18] sm:$0xf0]  ;;  %v3296_v7 = vor.u32 %v4501_v59, %v3293_v60  ;;  %v3844_v14 = vor.u32 %v4642_v63, %v3843_v62 }
  0x44   :  { %1968 = vmatpush.bf16.msrb.mxu2 %v3200_v12  ;;  %v4495_v8 = vld [vmem:[#allocation9 + $0x184] sm:$0xf]  ;;  %v3269_v9 = vld [vmem:[#allocation9 + $0x198] sm:$0xf0]  ;;  %v4585_v10 = vld [vmem:[#allocation9 + $0x454] sm:$0xf]  ;;  %v4036_v18 = vor.u32 %v4690_v3, %v4035_v0  ;;  %v3080_v19 = vor.u32 %v4447_v4, %v3077_v5 }
  0x45   :  { %1982 = vmatpush.bf16.msrb.mxu3 %v3392_v16  ;;  %v3629_v11 = vld [vmem:[#allocation9 + $0x468] sm:$0xf0]  ;;  %v4633_v12 = vld [vmem:[#allocation9 + $0x5d4] sm:$0xf]  ;;  %v3067_v21 = vld [vmem:[#allocation6 + $0x10] sm:$0xf] }
  0x46   :  { %1941 = vmatpush.bf16.msrb.mxu0 %v3940_v24  ;;  %v3821_v13 = vld [vmem:[#allocation9 + $0x5e8] sm:$0xf0]  ;;  %v4681_v15 = vld [vmem:[#allocation9 + $0x754] sm:$0xf]  ;;  %v4446_v24 = vld [vmem:[#allocation6 + $0x24] sm:$0xf0] }
  0x47   :  { %1955 = vmatpush.bf16.msrb.mxu1 %v4132_v25  ;;  %v4013_v16 = vld [vmem:[#allocation9 + $0x768] sm:$0xf0]  ;;  %v4729_v17 = vld [vmem:[#allocation9 + $0x8d4] sm:$0xf]  ;;  %v3272_v25 = vor.u32 %v4495_v8, %v3269_v9  ;;  %v4443_v27 = vld [vmem:[#allocation6 + $0x14] sm:$0xf]  ;;  %v3824_v29 = vor.u32 %v4633_v12, %v3821_v13  ;;  %v5059_v35 = vor.u32 %v4446_v24, %v3067_v21 }
  0x48   :  { %1969 = vmatpush.bf16.msrb.mxu2 %v3176_v26  ;;  %v4205_v20 = vld [vmem:[#allocation9 + $0x8e8] sm:$0xf0]  ;;  %v3632_v26 = vor.u32 %v4585_v10, %v3629_v11  ;;  %v3069_v28 = vld [vmem:[#allocation6 + $0x28] sm:$0xf0]  ;;  %v4579_v31 = vld [vmem:[#allocation9 + $0x424] sm:$0xf] }
  0x49   :  { %1983 = vmatpush.bf16.msrb.mxu3 %v3368_v30  ;;  %v4016_v30 = vor.u32 %v4681_v15, %v4013_v16  ;;  %v3605_v32 = vld [vmem:[#allocation9 + $0x438] sm:$0xf0]  ;;  %v4627_v33 = vld [vmem:[#allocation9 + $0x5a4] sm:$0xf]  ;;  %v4208_v34 = vor.u32 %v4729_v17, %v4205_v20  ;;  %v5061_v39 = vor.u32 %v4443_v27, %v3069_v28  ;;  %v4573_v45 = vld [vmem:[#allocation9 + $0x3f4] sm:$0xf] }
  0x4a   :  { %1942 = vmatpush.bf16.msrb.mxu0 %v3916_v36  ;;  %v3797_v36 = vld [vmem:[#allocation9 + $0x5b8] sm:$0xf0]  ;;  %v4723_v40 = vld [vmem:[#allocation9 + $0x8a4] sm:$0xf]  ;;  %v3581_v46 = vld [vmem:[#allocation9 + $0x408] sm:$0xf0] }
  0x4b   :  { %1956 = vmatpush.bf16.msrb.mxu1 %v4108_v37  ;;  %v4675_v37 = vld [vmem:[#allocation9 + $0x724] sm:$0xf]  ;;  %v4181_v41 = vld [vmem:[#allocation9 + $0x8b8] sm:$0xf0]  ;;  %v3800_v43 = vor.u32 %v4627_v33, %v3797_v36  ;;  %v4621_v47 = vld [vmem:[#allocation9 + $0x574] sm:$0xf] }
  0x4c   :  { %1970 = vmatpush.bf16.msrb.mxu2 %v3152_v38  ;;  %v3989_v38 = vld [vmem:[#allocation9 + $0x738] sm:$0xf0]  ;;  %v3965_v51 = vld [vmem:[#allocation9 + $0x708] sm:$0xf0]  ;;  %v4717_v52 = vld [vmem:[#allocation9 + $0x874] sm:$0xf] }
  0x4d   :  { %1984 = vmatpush.bf16.msrb.mxu3 %v3344_v42  ;;  %v3608_v42 = vor.u32 %v4579_v31, %v3605_v32  ;;  %v3992_v44 = vor.u32 %v4675_v37, %v3989_v38  ;;  %v4157_v53 = vld [vmem:[#allocation9 + $0x888] sm:$0xf0]  ;;  %v4567_v58 = vld [vmem:[#allocation9 + $0x3c4] sm:$0xf]  ;;  %v3557_v59 = vld [vmem:[#allocation9 + $0x3d8] sm:$0xf0] }
  0x4e   :  { %1943 = vmatpush.bf16.msrb.mxu0 %v3892_v48  ;;  %v4184_v48 = vor.u32 %v4723_v40, %v4181_v41  ;;  %v4615_v60 = vld [vmem:[#allocation9 + $0x544] sm:$0xf]  ;;  %v3749_v62 = vld [vmem:[#allocation9 + $0x558] sm:$0xf0]  ;;  %v3560_v3 = vor.u32 %v4567_v58, %v3557_v59  ;;  %v3533_v8 = vld [vmem:[#allocation9 + $0x3a8] sm:$0xf0] }
  0x4f   :  { %1957 = vmatpush.bf16.msrb.mxu1 %v4084_v49  ;;  %v3773_v49 = vld [vmem:[#allocation9 + $0x588] sm:$0xf0]  ;;  %v4663_v63 = vld [vmem:[#allocation9 + $0x6c4] sm:$0xf]  ;;  %v3941_v0 = vld [vmem:[#allocation9 + $0x6d8] sm:$0xf0]  ;;  %v3752_v4 = vor.u32 %v4615_v60, %v3749_v62 }
  0x50   :  { %1971 = vmatpush.bf16.msrb.mxu2 %v3128_v50  ;;  %v4669_v50 = vld [vmem:[#allocation9 + $0x6f4] sm:$0xf]  ;;  %v3776_v55 = vor.u32 %v4621_v47, %v3773_v49  ;;  %v3944_v5 = vor.u32 %v4663_v63, %v3941_v0  ;;  %v3725_v11 = vld [vmem:[#allocation9 + $0x528] sm:$0xf0]  ;;  %v3509_v20 = vld [vmem:[#allocation9 + $0x378] sm:$0xf0] }
  0x51   :  { %1985 = vmatpush.bf16.msrb.mxu3 %v3320_v54  ;;  %v3584_v54 = vor.u32 %v4573_v45, %v3581_v46  ;;  %v3968_v56 = vor.u32 %v4669_v50, %v3965_v51  ;;  %v4609_v9 = vld [vmem:[#allocation9 + $0x514] sm:$0xf]  ;;  %v3917_v13 = vld [vmem:[#allocation9 + $0x6a8] sm:$0xf0]  ;;  %v4603_v21 = vld [vmem:[#allocation9 + $0x4e4] sm:$0xf] }
  0x52   :  { %1944 = vmatpush.bf16.msrb.mxu0 %v3868_v61  ;;  %v4160_v61 = vor.u32 %v4717_v52, %v4157_v53  ;;  %v4657_v12 = vld [vmem:[#allocation9 + $0x694] sm:$0xf]  ;;  %v4109_v15 = vld [vmem:[#allocation9 + $0x828] sm:$0xf0]  ;;  %v3728_v17 = vor.u32 %v4609_v9, %v3725_v11  ;;  %v3893_v27 = vld [vmem:[#allocation9 + $0x678] sm:$0xf0] }
  0x53   :  { %1958 = vmatpush.bf16.msrb.mxu1 %v4060_v1  ;;  %v4711_v1 = vld [vmem:[#allocation9 + $0x844] sm:$0xf]  ;;  %v4549_v33 = vld [vmem:[#allocation9 + $0x334] sm:$0xf]  ;;  %v3677_v38 = vld [vmem:[#allocation9 + $0x4c8] sm:$0xf0] }
  0x54   :  { %1972 = vmatpush.bf16.msrb.mxu2 %v3104_v2  ;;  %v4133_v2 = vld [vmem:[#allocation9 + $0x858] sm:$0xf0]  ;;  %v4699_v28 = vld [vmem:[#allocation9 + $0x7e4] sm:$0xf]  ;;  %v4597_v36 = vld [vmem:[#allocation9 + $0x4b4] sm:$0xf] }
  0x55   :  { %1986 = vmatpush.bf16.msrb.mxu3 %v3296_v7  ;;  %v4561_v7 = vld [vmem:[#allocation9 + $0x394] sm:$0xf]  ;;  %v4136_v10 = vor.u32 %v4711_v1, %v4133_v2  ;;  %v3869_v41 = vld [vmem:[#allocation9 + $0x648] sm:$0xf0]  ;;  %v4543_v45 = vld [vmem:[#allocation9 + $0x304] sm:$0xf] }
  0x56   :  { %1945 = vmatpush.bf16.msrb.mxu0 %v3844_v14  ;;  %v4705_v14 = vld [vmem:[#allocation9 + $0x814] sm:$0xf]  ;;  %v3536_v16 = vor.u32 %v4561_v7, %v3533_v8  ;;  %v3461_v46 = vld [vmem:[#allocation9 + $0x318] sm:$0xf0]  ;;  %v4591_v47 = vld [vmem:[#allocation9 + $0x484] sm:$0xf] }
  0x57   :  { %1959 = vmatpush.bf16.msrb.mxu1 %v4036_v18  ;;  %v3920_v18 = vor.u32 %v4657_v12, %v3917_v13  ;;  %v4112_v24 = vor.u32 %v4705_v14, %v4109_v15  ;;  %v4645_v40 = vld [vmem:[#allocation9 + $0x634] sm:$0xf]  ;;  %v3653_v50 = vld [vmem:[#allocation9 + $0x498] sm:$0xf0]  ;;  %v4639_v51 = vld [vmem:[#allocation9 + $0x604] sm:$0xf]  ;;  %v3464_v60 = vor.u32 %v4543_v45, %v3461_v46 }
  0x58   :  { %1973 = vmatpush.bf16.msrb.mxu2 %v3080_v19  ;;  %v4555_v19 = vld [vmem:[#allocation9 + $0x364] sm:$0xf]  ;;  %v3872_v49 = vor.u32 %v4645_v40, %v3869_v41  ;;  %v3845_v52 = vld [vmem:[#allocation9 + $0x618] sm:$0xf0]  ;;  %v4493_v58 = vld [vmem:[#allocation9 + $0x16c] sm:$0xf0]  ;;  %v3656_v0 = vor.u32 %v4591_v47, %v3653_v50 }
  0x59   :  { %1987 = vmatpush.bf16.msrb.mxu3 %v3272_v25  ;;  %1946 = vmatmul.bf16.vlgmr.msrb.gmra.mxu0 %v5059_v35  ;;  %v3701_v25 = vld [vmem:[#allocation9 + $0x4f8] sm:$0xf0]  ;;  %v3443_v59 = vld [vmem:[#allocation9 + $0x2d8] sm:$0xf]  ;;  %v4589_v63 = vld [vmem:[#allocation9 + $0x46c] sm:$0xf0]  ;;  %v3848_v1 = vor.u32 %v4639_v51, %v3845_v52 }
  0x5a   :  { %1994 = vmatpush.bf16.msra.mxu0 %v3632_v26  ;;  %1960 = vmatmul.bf16.vlgmr.msrb.gmra.mxu1 %v5061_v39  ;;  %v4651_v26 = vld [vmem:[#allocation9 + $0x664] sm:$0xf]  ;;  %v3704_v31 = vor.u32 %v4603_v21, %v3701_v25  ;;  %v3635_v62 = vld [vmem:[#allocation9 + $0x458] sm:$0xf]  ;;  %v3227_v9 = vld [vmem:[#allocation9 + $0x128] sm:$0xf] }
  0x5b   :  { %2008 = vmatpush.bf16.msra.mxu1 %v3824_v29  ;;  %1974 = vmatmul.bf16.vlgmr.msrb.gmra.mxu2 %v5047_v57  ;;  %v4085_v29 = vld [vmem:[#allocation9 + $0x7f8] sm:$0xf0]  ;;  %v3896_v32 = vor.u32 %v4651_v26, %v3893_v27  ;;  %v3827_v2 = vld [vmem:[#allocation9 + $0x5d8] sm:$0xf]  ;;  %v3636_v8 = vor.u32 %v4589_v63, %v3635_v62  ;;  %v3419_v11 = vld [vmem:[#allocation9 + $0x2a8] sm:$0xf] }
  0x5c   :  { %2022 = vmatpush.bf16.msra.mxu2 %v4016_v30  ;;  %1988 = vmatmul.bf16.vlgmr.msrb.gmra.mxu3 %v5050_v6  ;;  %v3512_v30 = vor.u32 %v4555_v19, %v3509_v20  ;;  %v4088_v37 = vor.u32 %v4699_v28, %v4085_v29  ;;  %v4535_v13 = vld [vmem:[#allocation9 + $0x2bc] sm:$0xf0]  ;;  %v3611_v14 = vld [vmem:[#allocation9 + $0x428] sm:$0xf]  ;;  %v3203_v21 = vld [vmem:[#allocation9 + $0xf8] sm:$0xf] }
  0x5d   :  { %2036 = vmatpush.bf16.msra.mxu3 %v4208_v34  ;;  %v3485_v34 = vld [vmem:[#allocation9 + $0x348] sm:$0xf0]  ;;  %v4583_v15 = vld [vmem:[#allocation9 + $0x43c] sm:$0xf0]  ;;  %v3420_v19 = vor.u32 %v4535_v13, %v3419_v11  ;;  %v3395_v25 = vld [vmem:[#allocation9 + $0x278] sm:$0xf] }
  0x5e   :  { %1995 = vmatpush.bf16.msra.mxu0 %v3608_v42  ;;  %v4693_v42 = vld [vmem:[#allocation9 + $0x7b4] sm:$0xf]  ;;  %v3612_v20 = vor.u32 %v4583_v15, %v3611_v14  ;;  %v4529_v27 = vld [vmem:[#allocation9 + $0x28c] sm:$0xf0]  ;;  %v3587_v28 = vld [vmem:[#allocation9 + $0x3f8] sm:$0xf] }
  0x5f   :  { %2009 = vmatpush.bf16.msra.mxu1 %v3800_v43  ;;  %v4061_v43 = vld [vmem:[#allocation9 + $0x7c8] sm:$0xf0]  ;;  %v4577_v29 = vld [vmem:[#allocation9 + $0x40c] sm:$0xf0]  ;;  %v4523_v41 = vld [vmem:[#allocation9 + $0x25c] sm:$0xf0] }
  0x60   :  { %2023 = vmatpush.bf16.msra.mxu2 %v3992_v44  ;;  %v3488_v44 = vor.u32 %v4549_v33, %v3485_v34  ;;  %v4064_v53 = vor.u32 %v4693_v42, %v4061_v43  ;;  %v3396_v33 = vor.u32 %v4529_v27, %v3395_v25  ;;  %v3588_v34 = vor.u32 %v4577_v29, %v3587_v28  ;;  %v3563_v42 = vld [vmem:[#allocation9 + $0x3c8] sm:$0xf]  ;;  %v4571_v43 = vld [vmem:[#allocation9 + $0x3dc] sm:$0xf0]  ;;  %v4469_v50 = vld [vmem:[#allocation9 + $0xac] sm:$0xf0] }
  0x61   :  { %2037 = vmatpush.bf16.msra.mxu3 %v4184_v48  ;;  %v3680_v48 = vor.u32 %v4597_v36, %v3677_v38  ;;  %v3179_v36 = vld [vmem:[#allocation9 + $0xc8] sm:$0xf]  ;;  %v4619_v45 = vld [vmem:[#allocation9 + $0x55c] sm:$0xf0]  ;;  %v3347_v51 = vld [vmem:[#allocation9 + $0x218] sm:$0xf] }
  0x62   :  { %1996 = vmatpush.bf16.msra.mxu0 %v3584_v54  ;;  %v4687_v54 = vld [vmem:[#allocation9 + $0x784] sm:$0xf]  ;;  %v3371_v38 = vld [vmem:[#allocation9 + $0x248] sm:$0xf]  ;;  %v4463_v63 = vld [vmem:[#allocation9 + $0x7c] sm:$0xf0] }
  0x63   :  { %2010 = vmatpush.bf16.msra.mxu1 %v3776_v55  ;;  %v4037_v55 = vld [vmem:[#allocation9 + $0x798] sm:$0xf0]  ;;  %v3372_v47 = vor.u32 %v4523_v41, %v3371_v38  ;;  %v3131_v62 = vld [vmem:[#allocation9 + $0x68] sm:$0xf]  ;;  %v3107_v11 = vld [vmem:[#allocation9 + $0x38] sm:$0xf] }
  0x64   :  { %2024 = vmatpush.bf16.msra.mxu2 %v3968_v56  ;;  %v3251_v56 = vld [vmem:[#allocation9 + $0x158] sm:$0xf]  ;;  %v4505_v15 = vld [vmem:[#allocation9 + $0x1cc] sm:$0xf0]  ;;  %v3275_v27 = vld [vmem:[#allocation9 + $0x188] sm:$0xf] }
  0x65   :  { %2038 = vmatpush.bf16.msra.mxu3 %v4160_v61  ;;  %v4541_v61 = vld [vmem:[#allocation9 + $0x2ec] sm:$0xf0]  ;;  %v3299_v13 = vld [vmem:[#allocation9 + $0x1b8] sm:$0xf]  ;;  %v4499_v28 = vld [vmem:[#allocation9 + $0x19c] sm:$0xf0] }
  0x66   :  { %1997 = vmatpush.bf16.msra.mxu0 %v3560_v3  ;;  %v4637_v3 = vld [vmem:[#allocation9 + $0x5ec] sm:$0xf0]  ;;  %v3444_v7 = vor.u32 %v4541_v61, %v3443_v59  ;;  %v3300_v25 = vor.u32 %v4505_v15, %v3299_v13  ;;  %v3467_v29 = vld [vmem:[#allocation9 + $0x308] sm:$0xf]  ;;  %v4490_v41 = vld [vmem:[#allocation9 + $0x15c] sm:$0xf] }
  0x67   :  { %2011 = vmatpush.bf16.msra.mxu1 %v3752_v4  ;;  %v4040_v4 = vor.u32 %v4687_v54, %v4037_v55  ;;  %v3828_v12 = vor.u32 %v4637_v3, %v3827_v2  ;;  %v3539_v54 = vld [vmem:[#allocation9 + $0x398] sm:$0xf]  ;;  %v4565_v55 = vld [vmem:[#allocation9 + $0x3ac] sm:$0xf0]  ;;  %v4511_v2 = vld [vmem:[#allocation9 + $0x1fc] sm:$0xf0] }
  0x68   :  { %2025 = vmatpush.bf16.msra.mxu2 %v3944_v5  ;;  %v3252_v5 = vor.u32 %v4493_v58, %v3251_v56  ;;  %v3731_v56 = vld [vmem:[#allocation9 + $0x518] sm:$0xf]  ;;  %v4613_v58 = vld [vmem:[#allocation9 + $0x52c] sm:$0xf0]  ;;  %v3540_v61 = vor.u32 %v4565_v55, %v3539_v54  ;;  %v3515_v3 = vld [vmem:[#allocation9 + $0x368] sm:$0xf] }
  0x69   :  { %2039 = vmatpush.bf16.msra.mxu3 %v4136_v10  ;;  %v4487_v10 = vld [vmem:[#allocation9 + $0x13c] sm:$0xf0]  ;;  %v3947_v13 = vld [vmem:[#allocation9 + $0x6c8] sm:$0xf]  ;;  %vm2410_vm0 = vcmask 7168   ;;  %s3030_s9 = sshll.u32 %s5215_s6, 4  ;;  %s3031_s9 = int_to_ptr.hbm [resolvable:$true] %s3030_s9 }
  0x6a   :  { %1998 = vmatpush.bf16.msra.mxu0 %v3536_v16  ;;  %v3803_v16 = vld [vmem:[#allocation9 + $0x5a8] sm:$0xf]  ;;  %v4727_v55 = vld [vmem:[#allocation9 + $0x8bc] sm:$0xf0] }
  0x6b   :  { %2012 = vmatpush.bf16.msra.mxu1 %v3728_v17  ;;  %v4631_v17 = vld [vmem:[#allocation9 + $0x5bc] sm:$0xf0]  ;;  %v4139_v15 = vld [vmem:[#allocation9 + $0x848] sm:$0xf] }
  0x6c   :  { %2026 = vmatpush.bf16.msra.mxu2 %v3920_v18  ;;  %v3228_v18 = vor.u32 %v4487_v10, %v3227_v9  ;;  %v3804_v26 = vor.u32 %v4631_v17, %v3803_v16  ;;  %v3491_v16 = vld [vmem:[#allocation9 + $0x338] sm:$0xf]  ;;  %v4553_v17 = vld [vmem:[#allocation9 + $0x34c] sm:$0xf0] }
  0x6d   :  { %2040 = vmatpush.bf16.msra.mxu3 %v4112_v24  ;;  %v4481_v24 = vld [vmem:[#allocation9 + $0x10c] sm:$0xf0] }
  0x6e   :  { %1999 = vmatpush.bf16.msra.mxu0 %v3512_v30  ;;  %v3779_v30 = vld [vmem:[#allocation9 + $0x578] sm:$0xf] }
  0x6f   :  { %2013 = vmatpush.bf16.msra.mxu1 %v3704_v31  ;;  %v4625_v31 = vld [vmem:[#allocation9 + $0x58c] sm:$0xf0] }
  0x70   :  { %2027 = vmatpush.bf16.msra.mxu2 %v3896_v32  ;;  %v3204_v32 = vor.u32 %v4481_v24, %v3203_v21  ;;  %v3780_v40 = vor.u32 %v4625_v31, %v3779_v30  ;;  %v3083_v21 = vld [vmem:[#allocation9 + $0x8] sm:$0xf]  ;;  %v4451_v24 = vld [vmem:[#allocation9 + $0x1c] sm:$0xf0] }
  0x71   :  { %2041 = vmatpush.bf16.msra.mxu3 %v4088_v37  ;;  %v4475_v37 = vld [vmem:[#allocation9 + $0xdc] sm:$0xf0]  ;;  %v3084_v38 = vor.u32 %v4451_v24, %v3083_v21  ;;  %v3373_v21 = vld [vmem:[#allocation9 + $0x260] sm:$0xf0] }
  0x72   :  { %2000 = vmatpush.bf16.msra.mxu0 %v3488_v44  ;;  %v3755_v44 = vld [vmem:[#allocation9 + $0x548] sm:$0xf]  ;;  %v3180_v46 = vor.u32 %v4475_v37, %v3179_v36  ;;  %v4547_v31 = vld [vmem:[#allocation9 + $0x31c] sm:$0xf0]  ;;  %v4685_v36 = vld [vmem:[#allocation9 + $0x76c] sm:$0xf0] }
  0x73   :  { %2014 = vmatpush.bf16.msra.mxu1 %v3680_v48  ;;  %v3564_v48 = vor.u32 %v4571_v43, %v3563_v42  ;;  %v3756_v52 = vor.u32 %v4619_v45, %v3755_v44  ;;  %v4211_v37 = vld [vmem:[#allocation9 + $0x8d8] sm:$0xf]  ;;  %v3253_v42 = vld [vmem:[#allocation9 + $0x170] sm:$0xf0]  ;;  %v3276_v43 = vor.u32 %v4499_v28, %v3275_v27  ;;  %v3468_v44 = vor.u32 %v4547_v31, %v3467_v29  ;;  %v4538_v45 = vld [vmem:[#allocation9 + $0x2dc] sm:$0xf] }
  0x74   :  { %2028 = vmatpush.bf16.msra.mxu2 %v3872_v49  ;;  %v3155_v49 = vld [vmem:[#allocation9 + $0x98] sm:$0xf]  ;;  %v4661_v28 = vld [vmem:[#allocation9 + $0x6ac] sm:$0xf0] }
  0x75   :  { %2042 = vmatpush.bf16.msra.mxu3 %v4064_v53  ;;  %v4517_v53 = vld [vmem:[#allocation9 + $0x22c] sm:$0xf0]  ;;  %v3156_v59 = vor.u32 %v4469_v50, %v3155_v49  ;;  %v3256_v50 = vor.u32 %v4490_v41, %v3253_v42  ;;  %v3923_v27 = vld [vmem:[#allocation9 + $0x698] sm:$0xf]  ;;  %v3899_v41 = vld [vmem:[#allocation9 + $0x668] sm:$0xf] }
  0x76   :  { %2001 = vmatpush.bf16.msra.mxu0 %v3464_v60  ;;  %v3348_v60 = vor.u32 %v4517_v53, %v3347_v51  ;;  %v3995_v51 = vld [vmem:[#allocation9 + $0x728] sm:$0xf]  ;;  %v4115_v29 = vld [vmem:[#allocation9 + $0x818] sm:$0xf]  ;;  %v4709_v31 = vld [vmem:[#allocation9 + $0x82c] sm:$0xf0] }
  0x77   :  { %2015 = vmatpush.bf16.msra.mxu1 %v3656_v0  ;;  %v3323_v0 = vld [vmem:[#allocation9 + $0x1e8] sm:$0xf]  ;;  %v4655_v42 = vld [vmem:[#allocation9 + $0x67c] sm:$0xf0] }
  0x78   :  { %2029 = vmatpush.bf16.msra.mxu2 %v3848_v1  ;;  %v3732_v1 = vor.u32 %v4613_v58, %v3731_v56  ;;  %v3324_v9 = vor.u32 %v4511_v2, %v3323_v0  ;;  %v4187_v53 = vld [vmem:[#allocation9 + $0x8a8] sm:$0xf]  ;;  %v4484_v56 = vld [vmem:[#allocation9 + $0x12c] sm:$0xf]  ;;  %v3229_v58 = vld [vmem:[#allocation9 + $0x140] sm:$0xf0] }
  0x79   :  { %2043 = vmatpush.bf16.msra.mxu3 %v4040_v4  ;;  %2002 = vmatmul.bf16.vlgmr.msra.gmra.mxu0 %v5053_v22  ;;  %v4559_v4 = vld [vmem:[#allocation9 + $0x37c] sm:$0xf0]  ;;  %v3971_v0 = vld [vmem:[#allocation9 + $0x6f8] sm:$0xf] }
  0x7a   :  { %2050 = vmatpush.bf16.msrb.mxu0 %v3252_v5  ;;  %2016 = vmatmul.bf16.vlgmr.msra.gmra.mxu1 %v5055_v23  ;;  %v3707_v5 = vld [vmem:[#allocation9 + $0x4e8] sm:$0xf]  ;;  %v3516_v10 = vor.u32 %v4559_v4, %v3515_v3  ;;  %v4163_v2 = vld [vmem:[#allocation9 + $0x878] sm:$0xf]  ;;  %v4721_v4 = vld [vmem:[#allocation9 + $0x88c] sm:$0xf0] }
  0x7b   :  { %2064 = vmatpush.bf16.msrb.mxu1 %v3444_v7  ;;  %2030 = vmatmul.bf16.vlgmr.msra.gmra.mxu2 %v5059_v35  ;;  %v4607_v7 = vld [vmem:[#allocation9 + $0x4fc] sm:$0xf0] }
  0x7c   :  { %2078 = vmatpush.bf16.msrb.mxu2 %v3636_v8  ;;  %2044 = vmatmul.bf16.vlgmr.msra.gmra.mxu3 %v5061_v39  ;;  %v3132_v8 = vor.u32 %v4463_v63, %v3131_v62  ;;  %v3708_v14 = vor.u32 %v4607_v7, %v3707_v5  ;;  %v4188_v62 = vor.u32 %v4727_v55, %v4187_v53  ;;  %v4478_v5 = vld [vmem:[#allocation9 + $0xfc] sm:$0xf]  ;;  %v3205_v7 = vld [vmem:[#allocation9 + $0x110] sm:$0xf0]  ;;  %v3875_v53 = vld [vmem:[#allocation9 + $0x638] sm:$0xf] }
  0x7d   :  { %2092 = vmatpush.bf16.msrb.mxu3 %v3828_v12  ;;  %v4457_v12 = vld [vmem:[#allocation9 + $0x4c] sm:$0xf0]  ;;  %v3232_v63 = vor.u32 %v4484_v56, %v3229_v58  ;;  %v4067_v55 = vld [vmem:[#allocation9 + $0x7b8] sm:$0xf] }
  0x7e   :  { %2051 = vmatpush.bf16.msrb.mxu0 %v3228_v18  ;;  %v3683_v18 = vld [vmem:[#allocation9 + $0x4b8] sm:$0xf]  ;;  %v4697_v58 = vld [vmem:[#allocation9 + $0x7cc] sm:$0xf0] }
  0x7f   :  { %2065 = vmatpush.bf16.msrb.mxu1 %v3420_v19  ;;  %v4601_v19 = vld [vmem:[#allocation9 + $0x4cc] sm:$0xf0] }
  0x80   :  { %2079 = vmatpush.bf16.msrb.mxu2 %v3612_v20  ;;  %v3108_v20 = vor.u32 %v4457_v12, %v3107_v11  ;;  %v3684_v30 = vor.u32 %v4601_v19, %v3683_v18  ;;  %v4164_v11 = vor.u32 %v4721_v4, %v4163_v2  ;;  %v3208_v12 = vor.u32 %v4478_v5, %v3205_v7  ;;  %v4472_v18 = vld [vmem:[#allocation9 + $0xcc] sm:$0xf]  ;;  %v3181_v19 = vld [vmem:[#allocation9 + $0xe0] sm:$0xf0]  ;;  %v4043_v4 = vld [vmem:[#allocation9 + $0x788] sm:$0xf] }
  0x81   :  { %2093 = vmatpush.bf16.msrb.mxu3 %v3804_v26  ;;  %v3492_v26 = vor.u32 %v4553_v17, %v3491_v16  ;;  %v4715_v17 = vld [vmem:[#allocation9 + $0x85c] sm:$0xf0]  ;;  %v4068_v2 = vor.u32 %v4697_v58, %v4067_v55  ;;  %v4448_v7 = vld [vmem:[#allocation9 + $0xc] sm:$0xf] }
  0x82   :  { %2052 = vmatpush.bf16.msrb.mxu0 %v3204_v32  ;;  %v3659_v32 = vld [vmem:[#allocation9 + $0x488] sm:$0xf]  ;;  %v4691_v5 = vld [vmem:[#allocation9 + $0x79c] sm:$0xf0]  ;;  %v4568_v55 = vld [vmem:[#allocation9 + $0x3cc] sm:$0xf] }
  0x83   :  { %2066 = vmatpush.bf16.msrb.mxu1 %v3396_v33  ;;  %v4595_v33 = vld [vmem:[#allocation9 + $0x49c] sm:$0xf0]  ;;  %v4616_v58 = vld [vmem:[#allocation9 + $0x54c] sm:$0xf] }
  0x84   :  { %2080 = vmatpush.bf16.msrb.mxu2 %v3588_v34  ;;  %v4019_v34 = vld [vmem:[#allocation9 + $0x758] sm:$0xf] }
  0x85   :  { %2094 = vmatpush.bf16.msrb.mxu3 %v3780_v40  ;;  %v4733_v40 = vld [vmem:[#allocation9 + $0x8ec] sm:$0xf0] }
  0x86   :  { %2053 = vmatpush.bf16.msrb.mxu0 %v3180_v46  ;;  %v3445_v46 = vld [vmem:[#allocation9 + $0x2f0] sm:$0xf0]  ;;  %v4212_v49 = vor.u32 %v4733_v40, %v4211_v37  ;;  %v3924_v37 = vor.u32 %v4661_v28, %v3923_v27 }
  0x87   :  { %2067 = vmatpush.bf16.msrb.mxu1 %v3372_v47  ;;  %v3660_v47 = vor.u32 %v4595_v33, %v3659_v32  ;;  %v3448_v54 = vor.u32 %v4538_v45, %v3445_v46  ;;  %v4466_v32 = vld [vmem:[#allocation9 + $0x9c] sm:$0xf]  ;;  %v3157_v33 = vld [vmem:[#allocation9 + $0xb0] sm:$0xf0]  ;;  %v4703_v45 = vld [vmem:[#allocation9 + $0x7fc] sm:$0xf0] }
  0x88   :  { %2081 = vmatpush.bf16.msrb.mxu2 %v3564_v48  ;;  %v4020_v48 = vor.u32 %v4685_v36, %v4019_v34  ;;  %v4514_v34 = vld [vmem:[#allocation9 + $0x21c] sm:$0xf]  ;;  %v3349_v36 = vld [vmem:[#allocation9 + $0x230] sm:$0xf0]  ;;  %v3160_v40 = vor.u32 %v4466_v32, %v3157_v33  ;;  %v4460_v46 = vld [vmem:[#allocation9 + $0x6c] sm:$0xf] }
  0x89   :  { %2095 = vmatpush.bf16.msrb.mxu3 %v3756_v52  ;;  %v4679_v52 = vld [vmem:[#allocation9 + $0x73c] sm:$0xf0]  ;;  %v3805_v33 = vld [vmem:[#allocation9 + $0x5c0] sm:$0xf0] }
  0x8a   :  { %2054 = vmatpush.bf16.msrb.mxu0 %v3156_v59  ;;  %v4532_v59 = vld [vmem:[#allocation9 + $0x2ac] sm:$0xf] }
  0x8b   :  { %2068 = vmatpush.bf16.msrb.mxu1 %v3348_v60  ;;  %v3421_v60 = vld [vmem:[#allocation9 + $0x2c0] sm:$0xf0] }
  0x8c   :  { %2082 = vmatpush.bf16.msrb.mxu2 %v3540_v61  ;;  %v3996_v61 = vor.u32 %v4679_v52, %v3995_v51  ;;  %v3424_v3 = vor.u32 %v4532_v59, %v3421_v60  ;;  %v4454_v59 = vld [vmem:[#allocation9 + $0x3c] sm:$0xf]  ;;  %v3109_v60 = vld [vmem:[#allocation9 + $0x50] sm:$0xf0] }
  0x8d   :  { %2096 = vmatpush.bf16.msrb.mxu3 %v3732_v1  ;;  %v4673_v1 = vld [vmem:[#allocation9 + $0x70c] sm:$0xf0] }
  0x8e   :  { %2055 = vmatpush.bf16.msrb.mxu0 %v3132_v8  ;;  %v4526_v8 = vld [vmem:[#allocation9 + $0x27c] sm:$0xf] }
  0x8f   :  { %2069 = vmatpush.bf16.msrb.mxu1 %v3324_v9  ;;  %v3397_v9 = vld [vmem:[#allocation9 + $0x290] sm:$0xf0] }
  0x90   :  { %2083 = vmatpush.bf16.msrb.mxu2 %v3516_v10  ;;  %v3972_v10 = vor.u32 %v4673_v1, %v3971_v0  ;;  %v3400_v16 = vor.u32 %v4526_v8, %v3397_v9  ;;  %v3851_v0 = vld [vmem:[#allocation9 + $0x608] sm:$0xf]  ;;  %v4643_v1 = vld [vmem:[#allocation9 + $0x61c] sm:$0xf0]  ;;  %v3085_v9 = vld [vmem:[#allocation9 + $0x20] sm:$0xf0] }
  0x91   :  { %2097 = vmatpush.bf16.msrb.mxu3 %v3708_v14  ;;  %v4667_v14 = vld [vmem:[#allocation9 + $0x6dc] sm:$0xf0] }
  0x92   :  { %2056 = vmatpush.bf16.msrb.mxu0 %v3108_v20  ;;  %v4520_v20 = vld [vmem:[#allocation9 + $0x24c] sm:$0xf]  ;;  %v3948_v24 = vor.u32 %v4667_v14, %v3947_v13  ;;  %v3637_v13 = vld [vmem:[#allocation9 + $0x470] sm:$0xf0]  ;;  %v4634_v14 = vld [vmem:[#allocation9 + $0x5dc] sm:$0xf] }
  0x93   :  { %2070 = vmatpush.bf16.msrb.mxu1 %v3300_v25  ;;  %v4140_v25 = vor.u32 %v4715_v17, %v4139_v15  ;;  %v3852_v15 = vor.u32 %v4643_v1, %v3851_v0  ;;  %v4682_v17 = vld [vmem:[#allocation9 + $0x75c] sm:$0xf]  ;;  %v4141_v0 = vld [vmem:[#allocation9 + $0x860] sm:$0xf0] }
  0x94   :  { %2084 = vmatpush.bf16.msrb.mxu2 %v3492_v26  ;;  %v3184_v26 = vor.u32 %v4472_v18, %v3181_v19  ;;  %v4021_v18 = vld [vmem:[#allocation9 + $0x770] sm:$0xf0]  ;;  %v4044_v19 = vor.u32 %v4691_v5, %v4043_v4  ;;  %v4562_v4 = vld [vmem:[#allocation9 + $0x39c] sm:$0xf] }
  0x95   :  { %2098 = vmatpush.bf16.msrb.mxu3 %v3684_v30  ;;  %v3376_v30 = vor.u32 %v4520_v20, %v3373_v21  ;;  %v3088_v20 = vor.u32 %v4448_v7, %v3085_v9  ;;  %v4730_v21 = vld [vmem:[#allocation9 + $0x8dc] sm:$0xf]  ;;  %v4024_v28 = vor.u32 %v4682_v17, %v4021_v18  ;;  %v3541_v5 = vld [vmem:[#allocation9 + $0x3b0] sm:$0xf0]  ;;  %v4556_v17 = vld [vmem:[#allocation9 + $0x36c] sm:$0xf] }
  0x96   :  { %2057 = vmatpush.bf16.msrb.mxu0 %v3084_v38  ;;  %v4116_v38 = vor.u32 %v4709_v31, %v4115_v29  ;;  %v4580_v29 = vld [vmem:[#allocation9 + $0x42c] sm:$0xf]  ;;  %v4610_v7 = vld [vmem:[#allocation9 + $0x51c] sm:$0xf]  ;;  %v3733_v9 = vld [vmem:[#allocation9 + $0x530] sm:$0xf0] }
  0x97   :  { %2071 = vmatpush.bf16.msrb.mxu1 %v3276_v43  ;;  %v4091_v43 = vld [vmem:[#allocation9 + $0x7e8] sm:$0xf]  ;;  %v4628_v31 = vld [vmem:[#allocation9 + $0x5ac] sm:$0xf]  ;;  %v3517_v18 = vld [vmem:[#allocation9 + $0x380] sm:$0xf0] }
  0x98   :  { %2085 = vmatpush.bf16.msrb.mxu2 %v3468_v44  ;;  %v3352_v44 = vor.u32 %v4514_v34, %v3349_v36  ;;  %v4092_v51 = vor.u32 %v4703_v45, %v4091_v43  ;;  %v4676_v34 = vld [vmem:[#allocation9 + $0x72c] sm:$0xf]  ;;  %v3997_v36 = vld [vmem:[#allocation9 + $0x740] sm:$0xf0]  ;;  %v4574_v43 = vld [vmem:[#allocation9 + $0x3fc] sm:$0xf] }
  0x99   :  { %2099 = vmatpush.bf16.msrb.mxu3 %v3660_v47  ;;  %2058 = vmatmul.bf16.vlgmr.msrb.gmra.mxu0 %v5047_v57  ;;  %v3133_v47 = vld [vmem:[#allocation9 + $0x80] sm:$0xf0]  ;;  %v4622_v45 = vld [vmem:[#allocation9 + $0x57c] sm:$0xf] }
  0x9a   :  { %2106 = vmatpush.bf16.msra.mxu0 %v4020_v48  ;;  %2072 = vmatmul.bf16.vlgmr.msrb.gmra.mxu1 %v5050_v6  ;;  %v4508_v48 = vld [vmem:[#allocation9 + $0x1ec] sm:$0xf]  ;;  %v3136_v52 = vor.u32 %v4460_v46, %v3133_v47  ;;  %v3781_v47 = vld [vmem:[#allocation9 + $0x590] sm:$0xf0] }
  0x9b   :  { %2120 = vmatpush.bf16.msra.mxu1 %v4212_v49  ;;  %2086 = vmatmul.bf16.vlgmr.msrb.gmra.mxu2 %v5053_v22  ;;  %v3325_v49 = vld [vmem:[#allocation9 + $0x200] sm:$0xf0] }
  0x9c   :  { %2134 = vmatpush.bf16.msra.mxu2 %v3256_v50  ;;  %2100 = vmatmul.bf16.vlgmr.msrb.gmra.mxu3 %v5055_v23  ;;  %v3900_v50 = vor.u32 %v4655_v42, %v3899_v41  ;;  %v3328_v56 = vor.u32 %v4508_v48, %v3325_v49  ;;  %v3808_v41 = vor.u32 %v4628_v31, %v3805_v33  ;;  %v4670_v48 = vld [vmem:[#allocation9 + $0x6fc] sm:$0xf]  ;;  %v3973_v49 = vld [vmem:[#allocation9 + $0x710] sm:$0xf0] }
  0x9d   :  { %2148 = vmatpush.bf16.msra.mxu3 %v3448_v54  ;;  %v4649_v54 = vld [vmem:[#allocation9 + $0x64c] sm:$0xf0]  ;;  %v4000_v42 = vor.u32 %v4676_v34, %v3997_v36  ;;  %v4550_v31 = vld [vmem:[#allocation9 + $0x33c] sm:$0xf]  ;;  %v3685_v36 = vld [vmem:[#allocation9 + $0x4d0] sm:$0xf0] }
  0x9e   :  { %2107 = vmatpush.bf16.msra.mxu0 %v3996_v61  ;;  %v4502_v61 = vld [vmem:[#allocation9 + $0x1bc] sm:$0xf] }
  0x9f   :  { %2121 = vmatpush.bf16.msra.mxu1 %v4188_v62  ;;  %v3301_v62 = vld [vmem:[#allocation9 + $0x1d0] sm:$0xf0]  ;;  %v4598_v33 = vld [vmem:[#allocation9 + $0x4bc] sm:$0xf] }
  0xa0   :  { %2135 = vmatpush.bf16.msra.mxu2 %v3232_v63  ;;  %v3876_v63 = vor.u32 %v4649_v54, %v3875_v53  ;;  %v3304_v8 = vor.u32 %v4502_v61, %v3301_v62  ;;  %v3784_v53 = vor.u32 %v4622_v45, %v3781_v47  ;;  %v3976_v54 = vor.u32 %v4670_v48, %v3973_v49  ;;  %v4664_v61 = vld [vmem:[#allocation9 + $0x6cc] sm:$0xf]  ;;  %v3949_v62 = vld [vmem:[#allocation9 + $0x6e0] sm:$0xf0] }
  0xa1   :  { %2149 = vmatpush.bf16.msra.mxu3 %v3424_v3  ;;  %v3112_v3 = vor.u32 %v4454_v59, %v3109_v60  ;;  %v3757_v60 = vld [vmem:[#allocation9 + $0x560] sm:$0xf0]  ;;  %v3688_v45 = vor.u32 %v4598_v33, %v3685_v36  ;;  %v4592_v47 = vld [vmem:[#allocation9 + $0x48c] sm:$0xf]  ;;  %v3187_v36 = vld [vmem:[#allocation9 + $0xd0] sm:$0xf] }
  0xa2   :  { %2108 = vmatpush.bf16.msra.mxu0 %v3972_v10  ;;  %v4496_v10 = vld [vmem:[#allocation9 + $0x18c] sm:$0xf]  ;;  %v3661_v48 = vld [vmem:[#allocation9 + $0x4a0] sm:$0xf0] }
  0xa3   :  { %2122 = vmatpush.bf16.msra.mxu1 %v4164_v11  ;;  %v3277_v11 = vld [vmem:[#allocation9 + $0x1a0] sm:$0xf0]  ;;  %v4640_v49 = vld [vmem:[#allocation9 + $0x60c] sm:$0xf] }
  0xa4   :  { %2136 = vmatpush.bf16.msra.mxu2 %v3208_v12  ;;  %v4586_v12 = vld [vmem:[#allocation9 + $0x45c] sm:$0xf] }
  0xa5   :  { %2150 = vmatpush.bf16.msra.mxu3 %v3400_v16  ;;  %v3829_v16 = vld [vmem:[#allocation9 + $0x5f0] sm:$0xf0] }
  0xa6   :  { %2109 = vmatpush.bf16.msra.mxu0 %v3948_v24  ;;  %v4213_v24 = vld [vmem:[#allocation9 + $0x8f0] sm:$0xf0]  ;;  %v3832_v27 = vor.u32 %v4634_v14, %v3829_v16  ;;  %v3544_v14 = vor.u32 %v4562_v4, %v3541_v5 }
  0xa7   :  { %2123 = vmatpush.bf16.msra.mxu1 %v4140_v25  ;;  %v3280_v25 = vor.u32 %v4496_v10, %v3277_v11  ;;  %v4216_v32 = vor.u32 %v4730_v21, %v4213_v24  ;;  %v4658_v10 = vld [vmem:[#allocation9 + $0x69c] sm:$0xf]  ;;  %v3925_v11 = vld [vmem:[#allocation9 + $0x6b0] sm:$0xf0]  ;;  %v3709_v21 = vld [vmem:[#allocation9 + $0x500] sm:$0xf0] }
  0xa8   :  { %2137 = vmatpush.bf16.msra.mxu2 %v3184_v26  ;;  %v3640_v26 = vor.u32 %v4586_v12, %v3637_v13  ;;  %v4706_v12 = vld [vmem:[#allocation9 + $0x81c] sm:$0xf]  ;;  %v4117_v13 = vld [vmem:[#allocation9 + $0x830] sm:$0xf0]  ;;  %v3928_v16 = vor.u32 %v4658_v10, %v3925_v11  ;;  %v4652_v24 = vld [vmem:[#allocation9 + $0x66c] sm:$0xf] }
  0xa9   :  { %2151 = vmatpush.bf16.msra.mxu3 %v3376_v30  ;;  %v3613_v30 = vld [vmem:[#allocation9 + $0x440] sm:$0xf0]  ;;  %v4536_v11 = vld [vmem:[#allocation9 + $0x2c4] sm:$0xf0] }
  0xaa   :  { %2110 = vmatpush.bf16.msra.mxu0 %v3924_v37  ;;  %v4724_v37 = vld [vmem:[#allocation9 + $0x8ac] sm:$0xf] }
  0xab   :  { %2124 = vmatpush.bf16.msra.mxu1 %v4116_v38  ;;  %v4189_v38 = vld [vmem:[#allocation9 + $0x8c0] sm:$0xf0] }
  0xac   :  { %2138 = vmatpush.bf16.msra.mxu2 %v3160_v40  ;;  %v3616_v40 = vor.u32 %v4580_v29, %v3613_v30  ;;  %v4192_v46 = vor.u32 %v4724_v37, %v4189_v38  ;;  %v4646_v37 = vld [vmem:[#allocation9 + $0x63c] sm:$0xf]  ;;  %v3877_v38 = vld [vmem:[#allocation9 + $0x650] sm:$0xf0] }
  0xad   :  { %2152 = vmatpush.bf16.msra.mxu3 %v3352_v44  ;;  %v3589_v44 = vld [vmem:[#allocation9 + $0x410] sm:$0xf0] }
  0xae   :  { %2111 = vmatpush.bf16.msra.mxu0 %v3900_v50  ;;  %v4718_v50 = vld [vmem:[#allocation9 + $0x87c] sm:$0xf] }
  0xaf   :  { %2125 = vmatpush.bf16.msra.mxu1 %v4092_v51  ;;  %v4165_v51 = vld [vmem:[#allocation9 + $0x890] sm:$0xf0] }
  0xb0   :  { %2139 = vmatpush.bf16.msra.mxu2 %v3136_v52  ;;  %v3592_v52 = vor.u32 %v4574_v43, %v3589_v44  ;;  %v4168_v59 = vor.u32 %v4718_v50, %v4165_v51  ;;  %v4544_v43 = vld [vmem:[#allocation9 + $0x30c] sm:$0xf]  ;;  %v3469_v44 = vld [vmem:[#allocation9 + $0x320] sm:$0xf0] }
  0xb1   :  { %2153 = vmatpush.bf16.msra.mxu3 %v3328_v56  ;;  %v3565_v56 = vld [vmem:[#allocation9 + $0x3e0] sm:$0xf0] }
  0xb2   :  { %2112 = vmatpush.bf16.msra.mxu0 %v3876_v63  ;;  %v4712_v63 = vld [vmem:[#allocation9 + $0x84c] sm:$0xf]  ;;  %v3568_v1 = vor.u32 %v4568_v55, %v3565_v56  ;;  %v3853_v51 = vld [vmem:[#allocation9 + $0x620] sm:$0xf0]  ;;  %v4494_v55 = vld [vmem:[#allocation9 + $0x174] sm:$0xf0] }
  0xb3   :  { %2126 = vmatpush.bf16.msra.mxu1 %v4068_v2  ;;  %v3760_v2 = vor.u32 %v4616_v58, %v3757_v60  ;;  %v3451_v56 = vld [vmem:[#allocation9 + $0x2e0] sm:$0xf]  ;;  %v3472_v58 = vor.u32 %v4544_v43, %v3469_v44  ;;  %v3571_v43 = vld [vmem:[#allocation9 + $0x3d0] sm:$0xf]  ;;  %v4572_v44 = vld [vmem:[#allocation9 + $0x3e4] sm:$0xf0] }
  0xb4   :  { %2140 = vmatpush.bf16.msra.mxu2 %v3112_v3  ;;  %v3952_v3 = vor.u32 %v4664_v61, %v3949_v62  ;;  %v3643_v60 = vld [vmem:[#allocation9 + $0x460] sm:$0xf]  ;;  %v4590_v61 = vld [vmem:[#allocation9 + $0x474] sm:$0xf0]  ;;  %v3664_v62 = vor.u32 %v4592_v47, %v3661_v48  ;;  %v4620_v47 = vld [vmem:[#allocation9 + $0x564] sm:$0xf0] }
  0xb5   :  { %2154 = vmatpush.bf16.msra.mxu3 %v3304_v8  ;;  %v4144_v8 = vor.u32 %v4712_v63, %v4141_v0  ;;  %v3856_v63 = vor.u32 %v4640_v49, %v3853_v51  ;;  %v3835_v0 = vld [vmem:[#allocation9 + $0x5e0] sm:$0xf]  ;;  %v3644_v5 = vor.u32 %v4590_v61, %v3643_v60  ;;  %v3572_v51 = vor.u32 %v4572_v44, %v3571_v43  ;;  %v4566_v60 = vld [vmem:[#allocation9 + $0x3b4] sm:$0xf0]  ;;  %v4500_v43 = vld [vmem:[#allocation9 + $0x1a4] sm:$0xf0] }
  0xb6   :  { %2113 = vmatpush.bf16.msra.mxu0 %v3852_v15  ;;  %v3736_v15 = vor.u32 %v4610_v7, %v3733_v9  ;;  %v3235_v7 = vld [vmem:[#allocation9 + $0x130] sm:$0xf]  ;;  %v3739_v61 = vld [vmem:[#allocation9 + $0x520] sm:$0xf] }
  0xb7   :  { %2127 = vmatpush.bf16.msra.mxu1 %v4044_v19  ;;  %v4604_v19 = vld [vmem:[#allocation9 + $0x4ec] sm:$0xf]  ;;  %v3427_v9 = vld [vmem:[#allocation9 + $0x2b0] sm:$0xf] }
  0xb8   :  { %2141 = vmatpush.bf16.msra.mxu2 %v3088_v20  ;;  %v4120_v20 = vor.u32 %v4706_v12, %v4117_v13  ;;  %v3712_v29 = vor.u32 %v4604_v19, %v3709_v21  ;;  %v3619_v12 = vld [vmem:[#allocation9 + $0x430] sm:$0xf]  ;;  %v4584_v13 = vld [vmem:[#allocation9 + $0x444] sm:$0xf0]  ;;  %v3428_v19 = vor.u32 %v4536_v11, %v3427_v9  ;;  %v3211_v21 = vld [vmem:[#allocation9 + $0x100] sm:$0xf] }
  0xb9   :  { %2155 = vmatpush.bf16.msra.mxu3 %v3280_v25  ;;  %2114 = vmatmul.bf16.vlgmr.msra.gmra.mxu0 %v5059_v35  ;;  %v3901_v25 = vld [vmem:[#allocation9 + $0x680] sm:$0xf0]  ;;  %v4560_v9 = vld [vmem:[#allocation9 + $0x384] sm:$0xf0]  ;;  %v3475_v44 = vld [vmem:[#allocation9 + $0x310] sm:$0xf] }
  0xba   :  { %2162 = vmatpush.bf16.msrb.mxu0 %v3640_v26  ;;  %2128 = vmatmul.bf16.vlgmr.msra.gmra.mxu1 %v5061_v39  ;;  %v4700_v26 = vld [vmem:[#allocation9 + $0x7ec] sm:$0xf]  ;;  %v3904_v30 = vor.u32 %v4652_v24, %v3901_v25  ;;  %v4482_v24 = vld [vmem:[#allocation9 + $0x114] sm:$0xf0]  ;;  %v3403_v25 = vld [vmem:[#allocation9 + $0x280] sm:$0xf] }
  0xbb   :  { %2176 = vmatpush.bf16.msrb.mxu1 %v3832_v27  ;;  %2142 = vmatmul.bf16.vlgmr.msra.gmra.mxu2 %v5047_v57  ;;  %v4093_v27 = vld [vmem:[#allocation9 + $0x800] sm:$0xf0]  ;;  %v4608_v11 = vld [vmem:[#allocation9 + $0x504] sm:$0xf0] }
  0xbc   :  { %2190 = vmatpush.bf16.msrb.mxu2 %v4024_v28  ;;  %2156 = vmatmul.bf16.vlgmr.msra.gmra.mxu3 %v5050_v6  ;;  %v3520_v28 = vor.u32 %v4556_v17, %v3517_v18  ;;  %v4096_v34 = vor.u32 %v4700_v26, %v4093_v27  ;;  %v5081_v17 = vpop.f32.mrf.mxu1  ;;  %v4530_v27 = vld [vmem:[#allocation9 + $0x294] sm:$0xf0] }
  0xbd   :  { %2204 = vmatpush.bf16.msrb.mxu3 %v4216_v32  ;;  %v3493_v32 = vld [vmem:[#allocation9 + $0x350] sm:$0xf0]  ;;  %v3404_v33 = vor.u32 %v4530_v27, %v3403_v25  ;;  %v3499_v27 = vld [vmem:[#allocation9 + $0x340] sm:$0xf] }
  0xbe   :  { %2163 = vmatpush.bf16.msrb.mxu0 %v3616_v40  ;;  %v4694_v40 = vld [vmem:[#allocation9 + $0x7bc] sm:$0xf] }
  0xbf   :  { %2177 = vmatpush.bf16.msrb.mxu1 %v3808_v41  ;;  %v4069_v41 = vld [vmem:[#allocation9 + $0x7d0] sm:$0xf0] }
  0xc0   :  { %2191 = vmatpush.bf16.msrb.mxu2 %v4000_v42  ;;  %v3496_v42 = vor.u32 %v4550_v31, %v3493_v32  ;;  %v4072_v50 = vor.u32 %v4694_v40, %v4069_v41  ;;  %v4626_v31 = vld [vmem:[#allocation9 + $0x594] sm:$0xf0]  ;;  %v3212_v32 = vor.u32 %v4482_v24, %v3211_v21  ;;  %v5087_v40 = vpop.f32.mrf.mxu2  ;;  %v3307_v24 = vld [vmem:[#allocation9 + $0x1c0] sm:$0xf] }
  0xc1   :  { %2205 = vmatpush.bf16.msrb.mxu3 %v4192_v46  ;;  %v3880_v46 = vor.u32 %v4646_v37, %v3877_v38  ;;  %v4476_v37 = vld [vmem:[#allocation9 + $0xe4] sm:$0xf0]  ;;  %v3379_v38 = vld [vmem:[#allocation9 + $0x250] sm:$0xf]  ;;  %v4458_v21 = vld [vmem:[#allocation9 + $0x54] sm:$0xf0] }
  0xc2   :  { %2164 = vmatpush.bf16.msrb.mxu0 %v3592_v52  ;;  %v4688_v52 = vld [vmem:[#allocation9 + $0x78c] sm:$0xf]  ;;  %v3188_v48 = vor.u32 %v4476_v37, %v3187_v36  ;;  %v3091_v36 = vld [vmem:[#allocation9 + $0x10] sm:$0xf]  ;;  %v4452_v37 = vld [vmem:[#allocation9 + $0x24] sm:$0xf0] }
  0xc3   :  { %2178 = vmatpush.bf16.msrb.mxu1 %v3784_v53  ;;  %v4045_v53 = vld [vmem:[#allocation9 + $0x7a0] sm:$0xf0] }
  0xc4   :  { %2192 = vmatpush.bf16.msrb.mxu2 %v3976_v54  ;;  %v3259_v54 = vld [vmem:[#allocation9 + $0x160] sm:$0xf] }
  0xc5   :  { %2206 = vmatpush.bf16.msrb.mxu3 %v4168_v59  ;;  %v4542_v59 = vld [vmem:[#allocation9 + $0x2f4] sm:$0xf0] }
  0xc6   :  { %2165 = vmatpush.bf16.msrb.mxu0 %v3568_v1  ;;  %v4638_v1 = vld [vmem:[#allocation9 + $0x5f4] sm:$0xf0]  ;;  %v3452_v4 = vor.u32 %v4542_v59, %v3451_v56  ;;  %v3547_v59 = vld [vmem:[#allocation9 + $0x3a0] sm:$0xf] }
  0xc7   :  { %2179 = vmatpush.bf16.msrb.mxu1 %v3760_v2  ;;  %v4048_v2 = vor.u32 %v4688_v52, %v4045_v53  ;;  %v3836_v10 = vor.u32 %v4638_v1, %v3835_v0  ;;  %v3163_v52 = vld [vmem:[#allocation9 + $0xa0] sm:$0xf]  ;;  %v4470_v53 = vld [vmem:[#allocation9 + $0xb4] sm:$0xf0]  ;;  %v3548_v1 = vor.u32 %v4566_v60, %v3547_v59  ;;  %v3261_v59 = vld [vmem:[#allocation9 + $0x178] sm:$0xf0] }
  0xc8   :  { %2193 = vmatpush.bf16.msrb.mxu2 %v3952_v3  ;;  %v3260_v3 = vor.u32 %v4494_v55, %v3259_v54  ;;  %v3355_v54 = vld [vmem:[#allocation9 + $0x220] sm:$0xf]  ;;  %v5093_v55 = vpop.f32.mrf.mxu1 }
  0xc9   :  { %2207 = vmatpush.bf16.msrb.mxu3 %v4144_v8  ;;  %v4488_v8 = vld [vmem:[#allocation9 + $0x144] sm:$0xf0] }
  0xca   :  { %2166 = vmatpush.bf16.msrb.mxu0 %v3544_v14  ;;  %v5079_v14 = vpop.f32.mrf.mxu0  ;;  %v3236_v18 = vor.u32 %v4488_v8, %v3235_v7  ;;  %v4512_v7 = vld [vmem:[#allocation9 + $0x204] sm:$0xf0]  ;;  %v3523_v8 = vld [vmem:[#allocation9 + $0x370] sm:$0xf] }
  0xcb   :  { %2180 = vmatpush.bf16.msrb.mxu1 %v3736_v15  ;;  %v3811_v15 = vld [vmem:[#allocation9 + $0x5b0] sm:$0xf] }
  0xcc   :  { %2194 = vmatpush.bf16.msrb.mxu2 %v3928_v16  ;;  %v4632_v16 = vld [vmem:[#allocation9 + $0x5c4] sm:$0xf0] }
  0xcd   :  { %2208 = vmatpush.bf16.msrb.mxu3 %v4120_v20  ;;  %v3620_v20 = vor.u32 %v4584_v13, %v3619_v12  ;;  %v3812_v26 = vor.u32 %v4632_v16, %v3811_v15  ;;  %v5095_v12 = vld [vmem:[#allocation11] sm:$0x3f]  ;;  %v5097_v13 = vpop.f32.mrf.mxu2 }
  0xce   :  { %2167 = vmatpush.bf16.msrb.mxu0 %v3520_v28  ;;  %v3595_v28 = vld [vmem:[#allocation9 + $0x400] sm:$0xf] }
  0xcf   :  { %2181 = vmatpush.bf16.msrb.mxu1 %v3712_v29  ;;  %v4578_v29 = vld [vmem:[#allocation9 + $0x414] sm:$0xf0] }
  0xd0   :  { %2195 = vmatpush.bf16.msrb.mxu2 %v3904_v30  ;;  %v3787_v30 = vld [vmem:[#allocation9 + $0x580] sm:$0xf] }
  0xd1   :  { %2209 = vmatpush.bf16.msrb.mxu3 %v4096_v34  ;;  %v3596_v34 = vor.u32 %v4578_v29, %v3595_v28  ;;  %v3788_v41 = vor.u32 %v4626_v31, %v3787_v30  ;;  %v4554_v28 = vld [vmem:[#allocation9 + $0x354] sm:$0xf0]  ;;  %v3691_v30 = vld [vmem:[#allocation9 + $0x4c0] sm:$0xf] }
  0xd2   :  { %2168 = vmatpush.bf16.msrb.mxu0 %v3496_v42  ;;  %v4524_v42 = vld [vmem:[#allocation9 + $0x264] sm:$0xf0]  ;;  %v5091_v49 = vpop.f32.mrf.mxu0  ;;  %v4602_v31 = vld [vmem:[#allocation9 + $0x4d4] sm:$0xf0] }
  0xd3   :  { %2182 = vmatpush.bf16.msrb.mxu1 %v3688_v45  ;;  %v5089_v45 = vpop.f32.mrf.mxu3 }
  0xd4   :  { %2196 = vmatpush.bf16.msrb.mxu2 %v3880_v46  ;;  %v3763_v46 = vld [vmem:[#allocation9 + $0x550] sm:$0xf] }
  0xd5   :  { %2210 = vmatpush.bf16.msrb.mxu3 %v4072_v50  ;;  %v3380_v50 = vor.u32 %v4524_v42, %v3379_v38  ;;  %v3764_v56 = vor.u32 %v4620_v47, %v3763_v46  ;;  %v3283_v42 = vld [vmem:[#allocation9 + $0x190] sm:$0xf]  ;;  %v3692_v46 = vor.u32 %v4602_v31, %v3691_v30  ;;  %v4548_v47 = vld [vmem:[#allocation9 + $0x324] sm:$0xf0] }
  0xd6   :  { %2169 = vmatpush.bf16.msrb.mxu0 %v3472_v58  ;;  %v4518_v58 = vld [vmem:[#allocation9 + $0x234] sm:$0xf0] }
  0xd7   :  { %2183 = vmatpush.bf16.msrb.mxu1 %v3664_v62  ;;  %v4614_v62 = vld [vmem:[#allocation9 + $0x534] sm:$0xf0]  ;;  %v3356_v0 = vor.u32 %v4518_v58, %v3355_v54  ;;  %v3092_v54 = vor.u32 %v4452_v37, %v3091_v36  ;;  %v4491_v58 = vld [vmem:[#allocation9 + $0x164] sm:$0xf]  ;;  %v4171_v36 = vld [vmem:[#allocation9 + $0x880] sm:$0xf] }
  0xd8   :  { %2197 = vmatpush.bf16.msrb.mxu2 %v3856_v63  ;;  %v3164_v63 = vor.u32 %v4470_v53, %v3163_v52  ;;  %v4686_v52 = vld [vmem:[#allocation9 + $0x774] sm:$0xf0]  ;;  %v4219_v53 = vld [vmem:[#allocation9 + $0x8e0] sm:$0xf] }
  0xd9   :  { %2211 = vmatpush.bf16.msrb.mxu3 %v4048_v2  ;;  %2170 = vmatmul.bf16.vlgmr.msrb.gmra.mxu0 %v5053_v22  ;;  %v3139_v2 = vld [vmem:[#allocation9 + $0x70] sm:$0xf] }
  0xda   :  { %2218 = vmatpush.bf16.msra.mxu0 %v3260_v3  ;;  %2184 = vmatmul.bf16.vlgmr.msrb.gmra.mxu1 %v5055_v23  ;;  %v4464_v3 = vld [vmem:[#allocation9 + $0x84] sm:$0xf0]  ;;  %v5101_v29 = vpop.f32.mrf.mxu0 }
  0xdb   :  { %2232 = vmatpush.bf16.msra.mxu1 %v3452_v4  ;;  %2198 = vmatmul.bf16.vlgmr.msrb.gmra.mxu2 %v5059_v35  ;;  %v3331_v4 = vld [vmem:[#allocation9 + $0x1f0] sm:$0xf]  ;;  %v3140_v15 = vor.u32 %v4464_v3, %v3139_v2  ;;  %v5099_v16 = vpop.f32.mrf.mxu3 }
  0xdc   :  { %2246 = vmatpush.bf16.msra.mxu2 %v3644_v5  ;;  %2212 = vmatmul.bf16.vlgmr.msrb.gmra.mxu3 %v5061_v39  ;;  %v3740_v5 = vor.u32 %v4614_v62, %v3739_v61  ;;  %v3284_v62 = vor.u32 %v4500_v43, %v3283_v42  ;;  %v3213_v42 = vld [vmem:[#allocation9 + $0x118] sm:$0xf0] }
  0xdd   :  { %2260 = vmatpush.bf16.msra.mxu3 %v3836_v10  ;;  %v3715_v10 = vld [vmem:[#allocation9 + $0x4f0] sm:$0xf] }
  0xde   :  { %2219 = vmatpush.bf16.msra.mxu0 %v3236_v18  ;;  %v3332_v18 = vor.u32 %v4512_v7, %v3331_v4  ;;  %v3716_v25 = vor.u32 %v4608_v11, %v3715_v10  ;;  %v1975_v60 = vpop.f32.mrf.mxu2  ;;  %v4680_v10 = vld [vmem:[#allocation9 + $0x744] sm:$0xf0]  ;;  %v4195_v11 = vld [vmem:[#allocation9 + $0x8b0] sm:$0xf] }
  0xdf   :  { %2233 = vmatpush.bf16.msra.mxu1 %v3428_v19  ;;  %v3524_v19 = vor.u32 %v4560_v9, %v3523_v8  ;;  %v3264_v8 = vor.u32 %v4491_v58, %v3261_v59  ;;  %v4003_v9 = vld [vmem:[#allocation9 + $0x730] sm:$0xf]  ;;  %v4716_v58 = vld [vmem:[#allocation9 + $0x864] sm:$0xf0]  ;;  %v4473_v59 = vld [vmem:[#allocation9 + $0xd4] sm:$0xf] }
  0xe0   :  { %2247 = vmatpush.bf16.msra.mxu2 %v3620_v20  ;;  %v3115_v20 = vld [vmem:[#allocation9 + $0x40] sm:$0xf] }
  0xe1   :  { %2261 = vmatpush.bf16.msra.mxu3 %v3812_v26  ;;  %v4506_v26 = vld [vmem:[#allocation9 + $0x1d4] sm:$0xf0] }
  0xe2   :  { %2220 = vmatpush.bf16.msra.mxu0 %v3212_v32  ;;  %v400_v32 = vperm.slane %v5095_v12, 0  ;;  %v3308_v38 = vor.u32 %v4506_v26, %v3307_v24  ;;  %v4533_v24 = vld [vmem:[#allocation9 + $0x2b4] sm:$0xf] }
  0xe3   :  { %2234 = vmatpush.bf16.msra.mxu1 %v3404_v33  ;;  %v5104_v33 = vpop.f32.mrf.mxu1  ;;  %v1989_v2 = vpop.f32.mrf.mxu3 }
  0xe4   :  { %2248 = vmatpush.bf16.msra.mxu2 %v3596_v34  ;;  %v3116_v34 = vor.u32 %v4458_v21, %v3115_v20  ;;  %v1892_v61 = vadd.f32 %v5079_v14, %v400_v32  ;;  %v4728_v14 = vld [vmem:[#allocation9 + $0x8c4] sm:$0xf0]  ;;  %v5111_v21 = vpop.f32.mrf.mxu0  ;;  %v1894_v43 = vadd.f32 %v5091_v49, %v400_v32  ;;  %v3955_v49 = vld [vmem:[#allocation9 + $0x6d0] sm:$0xf] }
  0xe5   :  { %2262 = vmatpush.bf16.msra.mxu3 %v3788_v41  ;;  %v3500_v41 = vor.u32 %v4554_v28, %v3499_v27  ;;  %v4004_v28 = vor.u32 %v4680_v10, %v4003_v9  ;;  %v4196_v30 = vor.u32 %v4728_v14, %v4195_v11  ;;  %v4668_v32 = vld [vmem:[#allocation9 + $0x6e4] sm:$0xf0]  ;;  %v3931_v10 = vld [vmem:[#allocation9 + $0x6a0] sm:$0xf]  ;;  %v4662_v11 = vld [vmem:[#allocation9 + $0x6b4] sm:$0xf0] }
  0xe6   :  { %2221 = vmatpush.bf16.msra.mxu0 %v3188_v48  ;;  %v3667_v48 = vld [vmem:[#allocation9 + $0x490] sm:$0xf]  ;;  %v1906_v20 = vadd.f32 %v5081_v17, %v1892_v61  ;;  %v4674_v17 = vld [vmem:[#allocation9 + $0x714] sm:$0xf0]  ;;  %v1908_v61 = vadd.f32 %v5093_v55, %v1894_v43  ;;  %v4467_v14 = vld [vmem:[#allocation9 + $0xa4] sm:$0xf] }
  0xe7   :  { %2235 = vmatpush.bf16.msra.mxu1 %v3380_v50  ;;  %v4596_v50 = vld [vmem:[#allocation9 + $0x4a4] sm:$0xf0] }
  0xe8   :  { %2249 = vmatpush.bf16.msra.mxu2 %v3572_v51  ;;  %v4027_v51 = vld [vmem:[#allocation9 + $0x760] sm:$0xf]  ;;  %v3668_v3 = vor.u32 %v4596_v50, %v3667_v48 }
  0xe9   :  { %2263 = vmatpush.bf16.msra.mxu3 %v3764_v56  ;;  %v4734_v56 = vld [vmem:[#allocation9 + $0x8f4] sm:$0xf0]  ;;  %v4028_v4 = vor.u32 %v4686_v52, %v4027_v51  ;;  %v1977_v51 = vpop.f32.mrf.mxu2 }
  0xea   :  { %2222 = vmatpush.bf16.msra.mxu0 %v3164_v63  ;;  %v3476_v63 = vor.u32 %v4548_v47, %v3475_v44  ;;  %v4220_v7 = vor.u32 %v4734_v56, %v4219_v53  ;;  %v1920_v44 = vadd.f32 %v5087_v40, %v1906_v20  ;;  %v3405_v47 = vld [vmem:[#allocation9 + $0x298] sm:$0xf0]  ;;  %v4147_v40 = vld [vmem:[#allocation9 + $0x850] sm:$0xf]  ;;  %v1922_v20 = vadd.f32 %v5097_v13, %v1908_v61 }
  0xeb   :  { %2236 = vmatpush.bf16.msra.mxu1 %v3356_v0  ;;  %v4539_v0 = vld [vmem:[#allocation9 + $0x2e4] sm:$0xf]  ;;  %v5113_v26 = vpop.f32.mrf.mxu1 }
  0xec   :  { %2250 = vmatpush.bf16.msra.mxu2 %v3548_v1  ;;  %v3453_v1 = vld [vmem:[#allocation9 + $0x2f8] sm:$0xf0]  ;;  %v1936_v43 = vadd.f32 %v5099_v16, %v1922_v20  ;;  %v4587_v20 = vld [vmem:[#allocation9 + $0x464] sm:$0xf] }
  0xed   :  { %2264 = vmatpush.bf16.msra.mxu3 %v3740_v5  ;;  %v401_v5 = vperm.slane %v5095_v12, 1 }
  0xee   :  { %2223 = vmatpush.bf16.msra.mxu0 %v3140_v15  ;;  %v3456_v15 = vor.u32 %v4539_v0, %v3453_v1  ;;  %v4521_v0 = vld [vmem:[#allocation9 + $0x254] sm:$0xf]  ;;  %v3381_v1 = vld [vmem:[#allocation9 + $0x268] sm:$0xf0] }
  0xef   :  { %2237 = vmatpush.bf16.msra.mxu1 %v3332_v18  ;;  %v4485_v18 = vld [vmem:[#allocation9 + $0x134] sm:$0xf]  ;;  %v1976_v27 = vadd.f32 %v1975_v60, %v401_v5  ;;  %v3189_v60 = vld [vmem:[#allocation9 + $0xe8] sm:$0xf0]  ;;  %v3384_v55 = vor.u32 %v4521_v0, %v3381_v1  ;;  %v4503_v0 = vld [vmem:[#allocation9 + $0x1c4] sm:$0xf] }
  0xf0   :  { %2251 = vmatpush.bf16.msra.mxu2 %v3524_v19  ;;  %v3237_v19 = vld [vmem:[#allocation9 + $0x148] sm:$0xf0]  ;;  %v3192_v9 = vor.u32 %v4473_v59, %v3189_v60  ;;  %v4455_v59 = vld [vmem:[#allocation9 + $0x44] sm:$0xf]  ;;  %v3117_v60 = vld [vmem:[#allocation9 + $0x58] sm:$0xf0] }
  0xf1   :  { %2265 = vmatpush.bf16.msra.mxu3 %v3716_v25  ;;  %v3429_v25 = vld [vmem:[#allocation9 + $0x2c8] sm:$0xf0]  ;;  %v3240_v31 = vor.u32 %v4485_v18, %v3237_v19  ;;  %v1990_v48 = vadd.f32 %v1989_v2, %v1976_v27  ;;  %v3165_v18 = vld [vmem:[#allocation9 + $0xb8] sm:$0xf0] }
  0xf2   :  { %2224 = vmatpush.bf16.msra.mxu0 %v3116_v34  ;;  %v3979_v34 = vld [vmem:[#allocation9 + $0x700] sm:$0xf]  ;;  %v3432_v37 = vor.u32 %v4533_v24, %v3429_v25  ;;  %v4515_v25 = vld [vmem:[#allocation9 + $0x224] sm:$0xf]  ;;  %v3357_v27 = vld [vmem:[#allocation9 + $0x238] sm:$0xf0] }
  0xf3   :  { %2238 = vmatpush.bf16.msra.mxu1 %v3308_v38  ;;  %v4722_v38 = vld [vmem:[#allocation9 + $0x894] sm:$0xf0]  ;;  %v3980_v50 = vor.u32 %v4674_v17, %v3979_v34  ;;  %v3168_v34 = vor.u32 %v4467_v14, %v3165_v18  ;;  %v4656_v17 = vld [vmem:[#allocation9 + $0x684] sm:$0xf0]  ;;  %v3309_v1 = vld [vmem:[#allocation9 + $0x1d8] sm:$0xf0] }
  0xf4   :  { %2252 = vmatpush.bf16.msra.mxu2 %v3500_v41  ;;  %v4479_v41 = vld [vmem:[#allocation9 + $0x104] sm:$0xf]  ;;  %v4172_v52 = vor.u32 %v4722_v38, %v4171_v36  ;;  %v4099_v36 = vld [vmem:[#allocation9 + $0x7f0] sm:$0xf]  ;;  %v3360_v38 = vor.u32 %v4515_v25, %v3357_v27  ;;  %v3312_v14 = vor.u32 %v4503_v0, %v3309_v1  ;;  %v4497_v18 = vld [vmem:[#allocation9 + $0x194] sm:$0xf] }
  0xf5   :  { %2266 = vmatpush.bf16.msra.mxu3 %v3692_v46  ;;  %v4527_v46 = vld [vmem:[#allocation9 + $0x284] sm:$0xf]  ;;  %v3216_v53 = vor.u32 %v4479_v41, %v3213_v42  ;;  %v3141_v42 = vld [vmem:[#allocation9 + $0x88] sm:$0xf0]  ;;  %v3981_v0 = vld [vmem:[#allocation9 + $0x718] sm:$0xf0] }
  0xf6   :  { %2225 = vmatpush.bf16.msra.mxu0 %v3092_v54  ;;  %v1991_v54 = vpop.f32.mrf.mxu3  ;;  %v3408_v56 = vor.u32 %v4527_v46, %v3405_v47  ;;  %v4719_v1 = vld [vmem:[#allocation9 + $0x884] sm:$0xf] }
  0xf7   :  { %2239 = vmatpush.bf16.msra.mxu1 %v3284_v62  ;;  %v1934_v62 = vadd.f32 %v5089_v45, %v1920_v44  ;;  %v4710_v45 = vld [vmem:[#allocation9 + $0x834] sm:$0xf0] }
  0xf8   :  { %2253 = vmatpush.bf16.msra.mxu2 %v3476_v63  ;;  %v2003_v63 = vpop.f32.mrf.mxu0 }
  0xf9   :  { %2267 = vmatpush.bf16.msra.mxu3 %v3668_v3  ;;  %2226 = vmatmul.bf16.vlgmr.msra.gmra.mxu0 %v5047_v57  ;;  %v2004_v2 = vadd.f32 %v2003_v63, %v1990_v48  ;;  %v3956_v3 = vor.u32 %v4668_v32, %v3955_v49  ;;  %v1948_v19 = vadd.f32 %v5101_v29, %v1934_v62  ;;  %v4461_v29 = vld [vmem:[#allocation9 + $0x74] sm:$0xf] }
  0xfa   :  { %2274 = vmatpush.bf16.msrb.mxu0 %v4028_v4  ;;  %2240 = vmatmul.bf16.vlgmr.msra.gmra.mxu1 %v5050_v6  ;;  %v2017_v4 = vpop.f32.mrf.mxu1  ;;  %v4509_v48 = vld [vmem:[#allocation9 + $0x1f4] sm:$0xf]  ;;  %v3144_v32 = vor.u32 %v4461_v29, %v3141_v42  ;;  %v1950_v62 = vadd.f32 %v5111_v21, %v1936_v43  ;;  %v4221_v29 = vld [vmem:[#allocation9 + $0x8f8] sm:$0xf0] }
  0xfb   :  { %2288 = vmatpush.bf16.msrb.mxu1 %v4220_v7  ;;  %2254 = vmatmul.bf16.vlgmr.msra.gmra.mxu2 %v5053_v22  ;;  %v1978_v7 = vadd.f32 %v1977_v51, %v401_v5  ;;  %v2018_v24 = vadd.f32 %v2017_v4, %v2004_v2  ;;  %v3907_v5 = vld [vmem:[#allocation9 + $0x670] sm:$0xf]  ;;  %v1962_v13 = vadd.f32 %v5104_v33, %v1948_v19  ;;  %v3285_v19 = vld [vmem:[#allocation9 + $0x1a8] sm:$0xf0] }
  0xfc   :  { %2302 = vmatpush.bf16.msrb.mxu2 %v3264_v8  ;;  %2268 = vmatmul.bf16.vlgmr.msra.gmra.mxu3 %v5055_v23  ;;  %v4148_v8 = vor.u32 %v4716_v58, %v4147_v40  ;;  %v3908_v51 = vor.u32 %v4656_v17, %v3907_v5  ;;  %v4650_v40 = vld [vmem:[#allocation9 + $0x654] sm:$0xf0]  ;;  %v3859_v4 = vld [vmem:[#allocation9 + $0x610] sm:$0xf]  ;;  %v4635_v5 = vld [vmem:[#allocation9 + $0x5e4] sm:$0xf]  ;;  %v3288_v42 = vor.u32 %v4497_v18, %v3285_v19 }
  0xfd   :  { %2316 = vmatpush.bf16.msrb.mxu3 %v3456_v15  ;;  %v4123_v15 = vld [vmem:[#allocation9 + $0x820] sm:$0xf]  ;;  %v4698_v58 = vld [vmem:[#allocation9 + $0x7d4] sm:$0xf0]  ;;  %v2386_v61 = vmax.f32 %v1962_v13, 0.0 }
  0xfe   :  { %2275 = vmatpush.bf16.msrb.mxu0 %v4004_v28  ;;  %v3932_v28 = vor.u32 %v4662_v11, %v3931_v10  ;;  %v2031_v41 = vpop.f32.mrf.mxu2  ;;  %v3120_v11 = vor.u32 %v4455_v59, %v3117_v60  ;;  %v4029_v17 = vld [vmem:[#allocation9 + $0x778] sm:$0xf0]  ;;  %v4581_v13 = vld [vmem:[#allocation9 + $0x434] sm:$0xf]  ;;  %v4623_v60 = vld [vmem:[#allocation9 + $0x584] sm:$0xf] }
  0xff   :  { %2289 = vmatpush.bf16.msrb.mxu1 %v4196_v30  ;;  %v1992_v30 = vadd.f32 %v1991_v54, %v1978_v7  ;;  %v2032_v44 = vadd.f32 %v2031_v41, %v2018_v24  ;;  %v2045_v47 = vpop.f32.mrf.mxu3  ;;  %v4644_v7 = vld [vmem:[#allocation9 + $0x624] sm:$0xf0]  ;;  %v1964_v24 = vadd.f32 %v5113_v26, %v1950_v62  ;;  %v4731_v41 = vld [vmem:[#allocation9 + $0x8e4] sm:$0xf]  ;;  %v3597_v59 = vld [vmem:[#allocation9 + $0x418] sm:$0xf0] }
 0x100   :  { %2303 = vmatpush.bf16.msrb.mxu2 %v3240_v31  ;;  %v4124_v31 = vor.u32 %v4710_v45, %v4123_v15  ;;  %v2005_v46 = vpop.f32.mrf.mxu0  ;;  %v4692_v15 = vld [vmem:[#allocation9 + $0x7a4] sm:$0xf0]  ;;  %v3093_v45 = vld [vmem:[#allocation9 + $0x28] sm:$0xf0]  ;;  %v3789_v62 = vld [vmem:[#allocation9 + $0x598] sm:$0xf0] }
 0x101   :  { %2317 = vmatpush.bf16.msrb.mxu3 %v3432_v37  ;;  %v4704_v37 = vld [vmem:[#allocation9 + $0x804] sm:$0xf0]  ;;  %v2006_v54 = vadd.f32 %v2005_v46, %v1992_v30  ;;  %v2046_v49 = vadd.f32 %v2045_v47, %v2032_v44  ;;  %v3860_v30 = vor.u32 %v4644_v7, %v3859_v4  ;;  %v2392_v43 = vmax.f32 %v1964_v24, 0.0  ;;  %v4563_v19 = vld [vmem:[#allocation9 + $0x3a4] sm:$0xf] }
 0x102   :  { %2276 = vmatpush.bf16.msrb.mxu0 %v3980_v50  ;;  %v3333_v50 = vld [vmem:[#allocation9 + $0x208] sm:$0xf0]  ;;  %v2019_v16 = vpop.f32.mrf.mxu1  ;;  %v3792_v4 = vor.u32 %v4623_v60, %v3789_v62  ;;  %v4611_v24 = vld [vmem:[#allocation9 + $0x524] sm:$0xf] }
 0x103   :  { %2290 = vmatpush.bf16.msrb.mxu1 %v4172_v52  ;;  %v4100_v52 = vor.u32 %v4704_v37, %v4099_v36  ;;  %v3336_v33 = vor.u32 %v4509_v48, %v3333_v50  ;;  %v2387_v63 = vmax.f32 %v2046_v49, 0.0  ;;  %v2020_v10 = vadd.f32 %v2019_v16, %v2006_v54  ;;  %v3621_v48 = vld [vmem:[#allocation9 + $0x448] sm:$0xf0]  ;;  %v4629_v50 = vld [vmem:[#allocation9 + $0x5b4] sm:$0xf] }
 0x104   :  { %2304 = vmatpush.bf16.msrb.mxu2 %v3216_v53  ;;  %v3883_v53 = vld [vmem:[#allocation9 + $0x640] sm:$0xf]  ;;  %v4005_v54 = vld [vmem:[#allocation9 + $0x748] sm:$0xf0] }
 0x105   :  { %2318 = vmatpush.bf16.msrb.mxu3 %v3408_v56  ;;  %v4075_v56 = vld [vmem:[#allocation9 + $0x7c0] sm:$0xf]  ;;  %v3884_v2 = vor.u32 %v4650_v40, %v3883_v53  ;;  %v4677_v53 = vld [vmem:[#allocation9 + $0x734] sm:$0xf]  ;;  %v4197_v40 = vld [vmem:[#allocation9 + $0x8c8] sm:$0xf0] }
 0x106   :  { %2277 = vmatpush.bf16.msrb.mxu0 %v3956_v3  ;;  %v4076_v3 = vor.u32 %v4698_v58, %v4075_v56  ;;  %v2033_v21 = vpop.f32.mrf.mxu2  ;;  %v3624_v56 = vor.u32 %v4581_v13, %v3621_v48  ;;  %v4575_v58 = vld [vmem:[#allocation9 + $0x404] sm:$0xf]  ;;  %v4008_v16 = vor.u32 %v4677_v53, %v4005_v54  ;;  %v3909_v13 = vld [vmem:[#allocation9 + $0x688] sm:$0xf0]  ;;  %v3693_v54 = vld [vmem:[#allocation9 + $0x4d8] sm:$0xf0] }
 0x107   :  { %2291 = vmatpush.bf16.msrb.mxu1 %v4148_v8  ;;  %v4051_v8 = vld [vmem:[#allocation9 + $0x790] sm:$0xf]  ;;  %v2034_v25 = vadd.f32 %v2033_v21, %v2020_v10  ;;  %v2047_v27 = vpop.f32.mrf.mxu3  ;;  %v4617_v10 = vld [vmem:[#allocation9 + $0x554] sm:$0xf]  ;;  %v3477_v60 = vld [vmem:[#allocation9 + $0x328] sm:$0xf0] }
 0x108   :  { %2305 = vmatpush.bf16.msrb.mxu2 %v3192_v9  ;;  %v2398_v9 = vpack.c.bf16 %v2387_v63, %v2386_v61  ;;  %v4052_v37 = vor.u32 %v4692_v15, %v4051_v8  ;;  %v4671_v63 = vld [vmem:[#allocation9 + $0x704] sm:$0xf]  ;;  %v4569_v8 = vld [vmem:[#allocation9 + $0x3d4] sm:$0xf]  ;;  %v3765_v15 = vld [vmem:[#allocation9 + $0x568] sm:$0xf0] }
 0x109   :  { %2319 = vmatpush.bf16.msrb.mxu3 %v3384_v55  ;;  %v4449_v55 = vld [vmem:[#allocation9 + $0x14] sm:$0xf]  ;;  %v2048_v36 = vadd.f32 %v2047_v27, %v2034_v25  ;;  %v3984_v7 = vor.u32 %v4671_v63, %v3981_v0  ;;  %v3768_v18 = vor.u32 %v4617_v10, %v3765_v15  ;;  %v3741_v27 = vld [vmem:[#allocation9 + $0x538] sm:$0xf0]  ;;  %v3669_v63 = vld [vmem:[#allocation9 + $0x4a8] sm:$0xf0] }
 0x10a   :  { %2278 = vmatpush.bf16.msrb.mxu0 %v3932_v28  ;;  %2404 = vst [vmem:[#allocation2] sm:$0xff] %v2398_v9  ;;  %v3645_v28 = vld [vmem:[#allocation9 + $0x478] sm:$0xf0]  ;;  %v3573_v9 = vld [vmem:[#allocation9 + $0x3e8] sm:$0xf0] }
 0x10b   :  { %2292 = vmatpush.bf16.msrb.mxu1 %v4124_v31  ;;  %v3837_v31 = vld [vmem:[#allocation9 + $0x5f8] sm:$0xf0]  ;;  %v3648_v26 = vor.u32 %v4587_v20, %v3645_v28  ;;  %v2393_v44 = vmax.f32 %v2048_v36, 0.0  ;;  %v3576_v21 = vor.u32 %v4569_v8, %v3573_v9  ;;  %v4659_v28 = vld [vmem:[#allocation9 + $0x6a4] sm:$0xf] }
 0x10c   :  { %2306 = vmatpush.bf16.msrb.mxu2 %v3168_v34  ;;  %v4683_v34 = vld [vmem:[#allocation9 + $0x764] sm:$0xf]  ;;  %v3840_v46 = vor.u32 %v4635_v5, %v3837_v31  ;;  %v3549_v20 = vld [vmem:[#allocation9 + $0x3b8] sm:$0xf0]  ;;  %v4641_v0 = vld [vmem:[#allocation9 + $0x614] sm:$0xf] }
 0x10d   :  { %2320 = vmatpush.bf16.msrb.mxu3 %v3360_v38  ;;  %v3096_v38 = vor.u32 %v4449_v55, %v3093_v45  ;;  %v4032_v47 = vor.u32 %v4683_v34, %v4029_v17  ;;  %v2401_v49 = vpack.c.bf16 %v2393_v44, %v2392_v43  ;;  %v4665_v55 = vld [vmem:[#allocation9 + $0x6d4] sm:$0xf]  ;;  %v3957_v45 = vld [vmem:[#allocation9 + $0x6e8] sm:$0xf0]  ;;  %v3933_v5 = vld [vmem:[#allocation9 + $0x6b8] sm:$0xf0]  ;;  %v3552_v34 = vor.u32 %v4563_v19, %v3549_v20 }
 0x10e   :  { %2279 = vmatpush.bf16.msrb.mxu0 %v3908_v51  ;;  %v4224_v51 = vor.u32 %v4731_v41, %v4221_v29  ;;  %v4125_v31 = vld [vmem:[#allocation9 + $0x838] sm:$0xf0]  ;;  %v3744_v17 = vor.u32 %v4611_v24, %v3741_v27  ;;  %v3936_v36 = vor.u32 %v4659_v28, %v3933_v5  ;;  %v4605_v41 = vld [vmem:[#allocation9 + $0x4f4] sm:$0xf]  ;;  %v4101_v44 = vld [vmem:[#allocation9 + $0x808] sm:$0xf0] }
 0x10f   :  { %2293 = vmatpush.bf16.msrb.mxu1 %v4100_v52  ;;  %v3813_v52 = vld [vmem:[#allocation9 + $0x5c8] sm:$0xf0]  ;;  %2407 = vst [vmem:[#allocation2 + $0x18] sm:$0xff] %v2401_v49  ;;  %v4701_v43 = vld [vmem:[#allocation9 + $0x7f4] sm:$0xf]  ;;  %v4748_v10 = vld [vmem:[#allocation12 + $0x38] sm:$0xff] }
 0x110   :  { %2307 = vmatpush.bf16.msrb.mxu2 %v3144_v32  ;;  %v4725_v32 = vld [vmem:[#allocation9 + $0x8b4] sm:$0xf]  ;;  %v4104_v53 = vor.u32 %v4701_v43, %v4101_v44  ;;  %v4647_v49 = vld [vmem:[#allocation9 + $0x644] sm:$0xf] }
 0x111   :  { %2321 = vmatpush.bf16.msrb.mxu3 %v3336_v33  ;;  %v3816_v33 = vor.u32 %v4629_v50, %v3813_v52  ;;  %v4200_v61 = vor.u32 %v4725_v32, %v4197_v40  ;;  %v4551_v50 = vld [vmem:[#allocation9 + $0x344] sm:$0xf]  ;;  %v3885_v32 = vld [vmem:[#allocation9 + $0x658] sm:$0xf0] }
 0x112   :  { %2280 = vmatpush.bf16.msrb.mxu0 %v3884_v2  ;;  %v4173_v2 = vld [vmem:[#allocation9 + $0x898] sm:$0xf0]  ;;  %v4599_v52 = vld [vmem:[#allocation9 + $0x4c4] sm:$0xf] }
 0x113   :  { %2294 = vmatpush.bf16.msrb.mxu1 %v4076_v3  ;;  %v3600_v3 = vor.u32 %v4575_v58, %v3597_v59  ;;  %v4695_v40 = vld [vmem:[#allocation9 + $0x7c4] sm:$0xf]  ;;  %v4545_v59 = vld [vmem:[#allocation9 + $0x314] sm:$0xf] }
 0x114   :  { %2308 = vmatpush.bf16.msrb.mxu2 %v3120_v11  ;;  %v4176_v11 = vor.u32 %v4719_v1, %v4173_v2  ;;  %v3861_v1 = vld [vmem:[#allocation9 + $0x628] sm:$0xf0]  ;;  %v4689_v2 = vld [vmem:[#allocation9 + $0x794] sm:$0xf]  ;;  %v4764_v20 = vld [vmem:[#allocation12 + $0xb8] sm:$0xff] }
 0x115   :  { %2322 = vmatpush.bf16.msrb.mxu3 %v3312_v14  ;;  %v4713_v14 = vld [vmem:[#allocation9 + $0x854] sm:$0xf]  ;;  %v3864_v8 = vor.u32 %v4641_v0, %v3861_v1  ;;  %v4745_v19 = vld [vmem:[#allocation12 + $0x20] sm:$0xff]  ;;  %v4772_v24 = vld [vmem:[#allocation12 + $0xf8] sm:$0xff] }
 0x116   :  { %2281 = vmatpush.bf16.msrb.mxu0 %v3860_v30  ;;  %v4707_v30 = vld [vmem:[#allocation9 + $0x824] sm:$0xf]  ;;  %v2059_v15 = vpop.f32.mrf.mxu0  ;;  %v4763_v27 = vld [vmem:[#allocation12 + $0xb0] sm:$0xff] }
 0x117   :  { %2295 = vmatpush.bf16.msrb.mxu1 %v4052_v37  ;;  %v4557_v37 = vld [vmem:[#allocation9 + $0x374] sm:$0xf]  ;;  %v4128_v29 = vor.u32 %v4707_v30, %v4125_v31  ;;  %v4741_v43 = vld [vmem:[#allocation12] sm:$0xff] }
 0x118   :  { %2309 = vmatpush.bf16.msrb.mxu2 %v3096_v38  ;;  %v3525_v38 = vld [vmem:[#allocation9 + $0x388] sm:$0xf0]  ;;  %v4771_v28 = vld [vmem:[#allocation12 + $0xf0] sm:$0xff] }
 0x119   :  { %2323 = vmatpush.bf16.msrb.mxu3 %v3288_v42  ;;  %2282 = vmatmul.bf16.vlgmr.msrb.gmra.mxu0 %v5059_v35  ;;  %v3717_v42 = vld [vmem:[#allocation9 + $0x508] sm:$0xf0]  ;;  %v4743_v30 = vld [vmem:[#allocation12 + $0x10] sm:$0xff] }
 0x11a   :  { %2330 = vmatpush.bf16.msra.mxu0 %v3648_v26  ;;  %2296 = vmatmul.bf16.vlgmr.msrb.gmra.mxu1 %v5061_v39  ;;  %v4653_v26 = vld [vmem:[#allocation9 + $0x674] sm:$0xf] }
 0x11b   :  { %2344 = vmatpush.bf16.msra.mxu1 %v3840_v46  ;;  %2310 = vmatmul.bf16.vlgmr.msrb.gmra.mxu2 %v5047_v57  ;;  %v4149_v57 = vld [vmem:[#allocation9 + $0x868] sm:$0xf0]  ;;  %v3528_v46 = vor.u32 %v4557_v37, %v3525_v38  ;;  %v3912_v48 = vor.u32 %v4653_v26, %v3909_v13 }
 0x11c   :  { %2358 = vmatpush.bf16.msra.mxu2 %v4032_v47  ;;  %2324 = vmatmul.bf16.vlgmr.msrb.gmra.mxu3 %v5050_v6  ;;  %v3960_v6 = vor.u32 %v4665_v55, %v3957_v45  ;;  %v4152_v25 = vor.u32 %v4713_v14, %v4149_v57  ;;  %v3720_v47 = vor.u32 %v4605_v41, %v3717_v42  ;;  %v5139_v55 = vpop.f32.mrf.mxu1  ;;  %v4747_v45 = vld [vmem:[#allocation12 + $0x30] sm:$0xff]  ;;  %v4746_v57 = vld [vmem:[#allocation12 + $0x28] sm:$0xff]  ;;  %v4761_v26 = vld [vmem:[#allocation12 + $0xa0] sm:$0xff] }
 0x11d   :  { %2372 = vmatpush.bf16.msra.mxu3 %v4224_v51  ;;  %v3501_v51 = vld [vmem:[#allocation9 + $0x358] sm:$0xf0]  ;;  %v4742_v41 = vld [vmem:[#allocation12 + $0x8] sm:$0xff]  ;;  %v4769_v13 = vld [vmem:[#allocation12 + $0xe0] sm:$0xff] }
 0x11e   :  { %2331 = vmatpush.bf16.msra.mxu0 %v3624_v56  ;;  %v4077_v56 = vld [vmem:[#allocation9 + $0x7d8] sm:$0xf0]  ;;  %v3504_v58 = vor.u32 %v4551_v50, %v3501_v51  ;;  %v4750_v42 = vld [vmem:[#allocation12 + $0x48] sm:$0xff] }
 0x11f   :  { %2345 = vmatpush.bf16.msra.mxu1 %v3816_v33  ;;  %v3696_v33 = vor.u32 %v4599_v52, %v3693_v54  ;;  %v4080_v62 = vor.u32 %v4695_v40, %v4077_v56  ;;  %v4755_v14 = vld [vmem:[#allocation12 + $0x70] sm:$0xff]  ;;  %v4760_v50 = vld [vmem:[#allocation12 + $0x98] sm:$0xff]  ;;  %v403_v52 = vperm.slane %v5095_v12, 3  ;;  %v4229_v54 = vld [vmem:[#allocation2 + $0x18] sm:$0xf0] }
 0x120   :  { %2359 = vmatpush.bf16.msra.mxu2 %v4008_v16  ;;  %v3888_v16 = vor.u32 %v4647_v49, %v3885_v32  ;;  %v4768_v51 = vld [vmem:[#allocation12 + $0xd8] sm:$0xff]  ;;  %v4227_v49 = vld [vmem:[#allocation2] sm:$0xf] }
 0x121   :  { %2373 = vmatpush.bf16.msra.mxu3 %v4200_v61  ;;  %v4593_v61 = vld [vmem:[#allocation9 + $0x494] sm:$0xf] }
 0x122   :  { %2332 = vmatpush.bf16.msra.mxu0 %v3600_v3  ;;  %v4053_v3 = vld [vmem:[#allocation9 + $0x7a8] sm:$0xf0] }
 0x123   :  { %2346 = vmatpush.bf16.msra.mxu1 %v3792_v4  ;;  %v3480_v4 = vor.u32 %v4545_v59, %v3477_v60  ;;  %v4056_v9 = vor.u32 %v4689_v2, %v4053_v3 }
 0x124   :  { %2360 = vmatpush.bf16.msra.mxu2 %v3984_v7  ;;  %v3672_v7 = vor.u32 %v4593_v61, %v3669_v63 }
 0x125   :  { %2374 = vmatpush.bf16.msra.mxu3 %v4176_v11  ;;  %v4756_v11 = vld [vmem:[#allocation12 + $0x78] sm:$0xff] }
 0x126   :  { %2333 = vmatpush.bf16.msra.mxu0 %v3576_v21  ;;  %v4754_v21 = vld [vmem:[#allocation12 + $0x68] sm:$0xff] }
 0x127   :  { %2347 = vmatpush.bf16.msra.mxu1 %v3768_v18  ;;  %v5145_v18 = vpop.f32.mrf.mxu2 }
 0x128   :  { %2361 = vmatpush.bf16.msra.mxu2 %v3960_v6  ;;  %v5147_v6 = vpop.f32.mrf.mxu3 }
 0x129   :  { %2375 = vmatpush.bf16.msra.mxu3 %v4152_v25  ;;  %v5151_v25 = vpop.f32.mrf.mxu1 }
 0x12a   :  { %2334 = vmatpush.bf16.msra.mxu0 %v3552_v34  ;;  %v4751_v34 = vld [vmem:[#allocation12 + $0x50] sm:$0xff] }
 0x12b   :  { %2348 = vmatpush.bf16.msra.mxu1 %v3744_v17  ;;  %v4762_v17 = vld [vmem:[#allocation12 + $0xa8] sm:$0xff] }
 0x12c   :  { %2362 = vmatpush.bf16.msra.mxu2 %v3936_v36  ;;  %v4770_v36 = vld [vmem:[#allocation12 + $0xe8] sm:$0xff] }
 0x12d   :  { %2376 = vmatpush.bf16.msra.mxu3 %v4128_v29  ;;  %v402_v29 = vperm.slane %v5095_v12, 2  ;;  %v4758_v12 = vld [vmem:[#allocation12 + $0x88] sm:$0xff] }
 0x12e   :  { %2335 = vmatpush.bf16.msra.mxu0 %v3528_v46 }
 0x12f   :  { %2349 = vmatpush.bf16.msra.mxu1 %v3720_v47  ;;  %v5153_v5 = vpop.f32.mrf.mxu2  ;;  %v2060_v46 = vadd.f32 %v2059_v15, %v402_v29  ;;  %v4749_v47 = vld [vmem:[#allocation12 + $0x40] sm:$0xff] }
 0x130   :  { %2363 = vmatpush.bf16.msra.mxu2 %v3912_v48  ;;  %v5155_v31 = vpop.f32.mrf.mxu3 }
 0x131   :  { %2377 = vmatpush.bf16.msra.mxu3 %v4104_v53  ;;  %v4738_v53 = vld [vmem:[#allocation2 + $0x14] sm:$0xf0]  ;;  %v2074_v32 = vadd.f32 %v5139_v55, %v2060_v46 }
 0x132   :  { %2336 = vmatpush.bf16.msra.mxu0 %v3504_v58  ;;  %v4228_v56 = vor.u32 %v4738_v53, %v4227_v49  ;;  %v4735_v58 = vld [vmem:[#allocation2 + $0x4] sm:$0xf]  ;;  %v4788_v53 = vld [vmem:[#allocation12 + $0x178] sm:$0xff] }
 0x133   :  { %2350 = vmatpush.bf16.msra.mxu1 %v3696_v33  ;;  %v4759_v33 = vld [vmem:[#allocation12 + $0x90] sm:$0xff]  ;;  %v4232_v61 = vor.u32 %v4735_v58, %v4229_v54  ;;  %v2088_v0 = vadd.f32 %v5145_v18, %v2074_v32  ;;  %v4786_v58 = vld [vmem:[#allocation12 + $0x168] sm:$0xff] }
 0x134   :  { %2364 = vmatpush.bf16.msra.mxu2 %v3888_v16  ;;  %v4767_v16 = vld [vmem:[#allocation12 + $0xd0] sm:$0xff] }
 0x135   :  { %2378 = vmatpush.bf16.msra.mxu3 %v4080_v62  ;;  %v4766_v62 = vld [vmem:[#allocation12 + $0xc8] sm:$0xff]  ;;  %v4779_v49 = vld [vmem:[#allocation12 + $0x130] sm:$0xff] }
 0x136   :  { %2337 = vmatpush.bf16.msra.mxu0 %v3480_v4  ;;  %v4757_v4 = vld [vmem:[#allocation12 + $0x80] sm:$0xff]  ;;  %v4787_v32 = vld [vmem:[#allocation12 + $0x170] sm:$0xff] }
 0x137   :  { %2351 = vmatpush.bf16.msra.mxu1 %v3672_v7  ;;  %v5157_v38 = vpop.f32.mrf.mxu1  ;;  %v4765_v7 = vld [vmem:[#allocation12 + $0xc0] sm:$0xff] }
 0x138   :  { %2365 = vmatpush.bf16.msra.mxu2 %v3864_v8 }
 0x139   :  { %2379 = vmatpush.bf16.msra.mxu3 %v4056_v9  ;;  %2338 = vmatmul.bf16.vlgmr.msra.gmra.mxu0 %v5053_v22  ;;  %v5149_v22 = vpop.f32.mrf.mxu0  ;;  %v2102_v9 = vadd.f32 %v5147_v6, %v2088_v0  ;;  %v4776_v0 = vld [vmem:[#allocation12 + $0x118] sm:$0xff] }
 0x13a   :  { %2841 = vmatpush.bf16.msrb.mxu0 %v4748_v10  ;;  %2352 = vmatmul.bf16.vlgmr.msra.gmra.mxu1 %v5055_v23  ;;  %v4753_v23 = vld [vmem:[#allocation12 + $0x60] sm:$0xff]  ;;  %v2062_v63 = vadd.f32 %v5149_v22, %v402_v29 }
 0x13b   :  { %2855 = vmatpush.bf16.msrb.mxu1 %v4756_v11  ;;  %2366 = vmatmul.bf16.vlgmr.msra.gmra.mxu2 %v5059_v35  ;;  %v4744_v35 = vld [vmem:[#allocation12 + $0x18] sm:$0xff] }
 0x13c   :  { %2380 = vmatmul.bf16.vlgmr.msra.gmra.mxu3 %v5061_v39  ;;  %2869 = vmatpush.bf16.msrb.mxu2 %v4764_v20  ;;  %v4752_v39 = vld [vmem:[#allocation12 + $0x58] sm:$0xff]  ;;  %v2076_v8 = vadd.f32 %v5151_v25, %v2062_v63 }
 0x13d   :  { %2883 = vmatpush.bf16.msrb.mxu3 %v4772_v24 }
 0x13e   :  { %2842 = vmatpush.bf16.msrb.mxu0 %v4747_v45  ;;  %v2143_v44 = vpop.f32.mrf.mxu2 }
 0x13f   :  { %2856 = vmatpush.bf16.msrb.mxu1 %v4755_v14  ;;  %v2157_v48 = vpop.f32.mrf.mxu3  ;;  %v2131_v59 = vpop.f32.mrf.mxu1  ;;  %v2144_v60 = vadd.f32 %v2143_v44, %v403_v52  ;;  %v2090_v14 = vadd.f32 %v5153_v5, %v2076_v8  ;;  %v4783_v8 = vld [vmem:[#allocation12 + $0x150] sm:$0xff] }
 0x140   :  { %2870 = vmatpush.bf16.msrb.mxu2 %v4763_v27 }
 0x141   :  { %2884 = vmatpush.bf16.msrb.mxu3 %v4771_v28  ;;  %v2115_v37 = vpop.f32.mrf.mxu0  ;;  %v2158_v1 = vadd.f32 %v2157_v48, %v2144_v60  ;;  %v2104_v20 = vadd.f32 %v5155_v31, %v2090_v14  ;;  %v4777_v60 = vld [vmem:[#allocation12 + $0x120] sm:$0xff] }
 0x142   :  { %2843 = vmatpush.bf16.msrb.mxu0 %v4746_v57  ;;  %v2116_v45 = vadd.f32 %v2115_v37, %v2102_v9 }
 0x143   :  { %2857 = vmatpush.bf16.msrb.mxu1 %v4754_v21 }
 0x144   :  { %2871 = vmatpush.bf16.msrb.mxu2 %v4762_v17 }
 0x145   :  { %2885 = vmatpush.bf16.msrb.mxu3 %v4770_v36 }
 0x146   :  { %2844 = vmatpush.bf16.msrb.mxu0 %v4745_v19  ;;  %v2145_v2 = vpop.f32.mrf.mxu2  ;;  %v2130_v19 = vadd.f32 %v5157_v38, %v2116_v45 }
 0x147   :  { %2858 = vmatpush.bf16.msrb.mxu1 %v4753_v23  ;;  %v2159_v3 = vpop.f32.mrf.mxu3  ;;  %v2146_v55 = vadd.f32 %v2145_v2, %v403_v52  ;;  %v4780_v52 = vld [vmem:[#allocation12 + $0x138] sm:$0xff] }
 0x148   :  { %2872 = vmatpush.bf16.msrb.mxu2 %v4761_v26 }
 0x149   :  { %2886 = vmatpush.bf16.msrb.mxu3 %v4769_v13  ;;  %v2117_v40 = vpop.f32.mrf.mxu0  ;;  %v2160_v21 = vadd.f32 %v2159_v3, %v2146_v55  ;;  %v4782_v55 = vld [vmem:[#allocation12 + $0x148] sm:$0xff] }
 0x14a   :  { %2845 = vmatpush.bf16.msrb.mxu0 %v4744_v35  ;;  %v2118_v27 = vadd.f32 %v2117_v40, %v2104_v20 }
 0x14b   :  { %2859 = vmatpush.bf16.msrb.mxu1 %v4752_v39  ;;  %v2388_v39 = vmax.f32 %v2130_v19, 0.0  ;;  %v4781_v19 = vld [vmem:[#allocation12 + $0x140] sm:$0xff] }
 0x14c   :  { %2873 = vmatpush.bf16.msrb.mxu2 %v4760_v50  ;;  %v2132_v5 = vadd.f32 %v2131_v59, %v2118_v27 }
 0x14d   :  { %2887 = vmatpush.bf16.msrb.mxu3 %v4768_v51 }
 0x14e   :  { %2846 = vmatpush.bf16.msrb.mxu0 %v4743_v30  ;;  %v2394_v38 = vmax.f32 %v2132_v5, 0.0 }
 0x14f   :  { %2860 = vmatpush.bf16.msrb.mxu1 %v4751_v34 }
 0x150   :  { %2874 = vmatpush.bf16.msrb.mxu2 %v4759_v33 }
 0x151   :  { %2888 = vmatpush.bf16.msrb.mxu3 %v4767_v16 }
 0x152   :  { %2847 = vmatpush.bf16.msrb.mxu0 %v4742_v41 }
 0x153   :  { %2861 = vmatpush.bf16.msrb.mxu1 %v4750_v42 }
 0x154   :  { %2875 = vmatpush.bf16.msrb.mxu2 %v4758_v12  ;;  %v4823_v12 = vld [vmem:[#allocation11] sm:$0x3f] }
 0x155   :  { %2889 = vmatpush.bf16.msrb.mxu3 %v4766_v62  ;;  %v404_v62 = vperm.slane %v4823_v12, 4 }
 0x156   :  { %2848 = vmatpush.bf16.msrb.mxu0 %v4741_v43  ;;  %v2171_v10 = vpop.f32.mrf.mxu0 }
 0x157   :  { %2862 = vmatpush.bf16.msrb.mxu1 %v4749_v47  ;;  %v2172_v11 = vadd.f32 %v2171_v10, %v2158_v1  ;;  %v2185_v15 = vpop.f32.mrf.mxu1  ;;  %v4784_v1 = vld [vmem:[#allocation12 + $0x158] sm:$0xff] }
 0x158   :  { %2876 = vmatpush.bf16.msrb.mxu2 %v4757_v4 }
 0x159   :  { %2849 = vmatmul.bf16.vlgmr.msrb.gmra.mxu0 %v4228_v56  ;;  %2890 = vmatpush.bf16.msrb.mxu3 %v4765_v7  ;;  %v2186_v57 = vadd.f32 %v2185_v15, %v2172_v11  ;;  %v4778_v56 = vld [vmem:[#allocation12 + $0x128] sm:$0xff]  ;;  %v4775_v7 = vld [vmem:[#allocation12 + $0x110] sm:$0xff]  ;;  %v405_v11 = vperm.slane %v4823_v12, 5 }
 0x15a   :  { %2863 = vmatmul.bf16.vlgmr.msrb.gmra.mxu1 %v4232_v61  ;;  %2897 = vmatpush.bf16.msra.mxu0 %v4780_v52  ;;  %v4785_v61 = vld [vmem:[#allocation12 + $0x160] sm:$0xff]  ;;  %v4774_v15 = vld [vmem:[#allocation12 + $0x108] sm:$0xff]  ;;  %v5178_v12 = vld [vmem:[%s5214_s5 + $0x8] sm:$0xff] }
 0x15b   :  { %2911 = vmatpush.bf16.msra.mxu1 %v4788_v53  ;;  %vm3005_vm4 = vcmp.ne.s32.totalorder %v5178_v12, 4294967295 }
 0x15e   :  { %v2199_v18 = vpop.f32.mrf.mxu2  ;;  %v2173_v22 = vpop.f32.mrf.mxu0  ;;  %2898 = vmatpush.bf16.msra.mxu0 %v4779_v49 }
 0x15f   :  { %v2200_v24 = vadd.f32 %v2199_v18, %v2186_v57  ;;  %v2213_v23 = vpop.f32.mrf.mxu3  ;;  %v2174_v6 = vadd.f32 %v2173_v22, %v2160_v21  ;;  %v2187_v35 = vpop.f32.mrf.mxu1  ;;  %2912 = vmatpush.bf16.msra.mxu1 %v4787_v32  ;;  %v4773_v18 = vld [vmem:[#allocation12 + $0x100] sm:$0xff] }
 0x161   :  { %v2214_v25 = vadd.f32 %v2213_v23, %v2200_v24  ;;  %v2188_v34 = vadd.f32 %v2187_v35, %v2174_v6 }
 0x162   :  { %2899 = vmatpush.bf16.msra.mxu0 %v4778_v56 }
 0x163   :  { %v2389_v28 = vmax.f32 %v2214_v25, 0.0  ;;  %2913 = vmatpush.bf16.msra.mxu1 %v4786_v58 }
 0x165   :  { %v2399_v30 = vpack.c.bf16 %v2389_v28, %v2388_v39 }
 0x166   :  { %v2201_v17 = vpop.f32.mrf.mxu2  ;;  %2900 = vmatpush.bf16.msra.mxu0 %v4777_v60 }
 0x167   :  { %2405 = vst [vmem:[#allocation2 + $0x8] sm:$0xff] %v2399_v30  ;;  %v2202_v36 = vadd.f32 %v2201_v17, %v2188_v34  ;;  %v2215_v37 = vpop.f32.mrf.mxu3  ;;  %2914 = vmatpush.bf16.msra.mxu1 %v4785_v61 }
 0x169   :  { %v2216_v41 = vadd.f32 %v2215_v37, %v2202_v36 }
 0x16a   :  { %2901 = vmatpush.bf16.msra.mxu0 %v4776_v0  ;;  %v4986_v0 = vmov -1e+30  }
 0x16b   :  { %v2395_v29 = vmax.f32 %v2216_v41, 0.0  ;;  %2915 = vmatpush.bf16.msra.mxu1 %v4784_v1  ;;  %2411 = vst.msk [vmem:[#allocation3] sm:$0xff] %vm2410_vm0, %v4986_v0  ;;  %v4810_v1 = vld [vmem:[#allocation14] ss:$0 sm:$0xff] }
 0x16c   :  { %2412 = vst.msk [vmem:[#allocation3 + $0x8] sm:$0xff] %vm2410_vm0, %v4986_v0 }
 0x16d   :  { %v2402_v31 = vpack.c.bf16 %v2395_v29, %v2394_v38 }
 0x16e   :  { %v4235_v42 = vld [vmem:[#allocation2 + $0x8] sm:$0xf]  ;;  %v4736_v13 = vld [vmem:[#allocation2 + $0xc] sm:$0xf]  ;;  %2902 = vmatpush.bf16.msra.mxu0 %v4775_v7 }
 0x16f   :  { %2408 = vst [vmem:[#allocation2 + $0x20] sm:$0xff] %v2402_v31  ;;  %2916 = vmatpush.bf16.msra.mxu1 %v4783_v8  ;;  %v5172_v31 = vld [vmem:[%s5214_s5] sm:$0xff]  ;;  %s4988_s5 = smov [#allocation15]  }
 0x170   :  { %s3028_s29 = sshll.u32 %s4988_s5, 4  ;;  %vm3004_vm3 = vcmp.ne.s32.totalorder %v5172_v31, 4294967295  ;;  %s3029_s29 = int_to_ptr.vmem [resolvable:$true] %s3028_s29 }
 0x172   :  { %2903 = vmatpush.bf16.msra.mxu0 %v4774_v15 }
 0x173   :  { %2917 = vmatpush.bf16.msra.mxu1 %v4782_v55 }
 0x176   :  { %v4739_v26 = vld [vmem:[#allocation2 + $0x1c] sm:$0xf0]  ;;  %v4237_v43 = vld [vmem:[#allocation2 + $0x20] sm:$0xf0]  ;;  %v2227_v47 = vpop.f32.mrf.mxu0  ;;  %2904 = vmatpush.bf16.msra.mxu0 %v4773_v18 }
 0x177   :  { %v4236_v44 = vor.u32 %v4739_v26, %v4235_v42  ;;  %v4240_v46 = vor.u32 %v4736_v13, %v4237_v43  ;;  %v2241_v48 = vpop.f32.mrf.mxu1  ;;  %v2228_v2 = vadd.f32 %v2227_v47, %v404_v62  ;;  %2918 = vmatpush.bf16.msra.mxu1 %v4781_v19  ;;  %v4985_v13 = vmov 0  }
 0x178   :  { %4808 = vset.pattern.permute.xlu2 %v4985_v13  ;;  %4807 = vset.pattern.permute.xlu1 %v4985_v13 }
 0x179   :  { %2877 = vmatmul.bf16.vlgmr.msrb.gmra.mxu2 %v4236_v44  ;;  %2891 = vmatmul.bf16.vlgmr.msrb.gmra.mxu3 %v4240_v46  ;;  %v2242_v9 = vadd.f32 %v2241_v48, %v2228_v2 }
 0x17a   :  { %2984 = vperm.xlu2 %4808, %v5172_v31   ;;  %4809 = vset.pattern.permute.xlu0 %v4985_v13 }
 0x17e   :  { %v2255_v50 = vpop.f32.mrf.mxu2  ;;  %v2229_v54 = vpop.f32.mrf.mxu0 }
 0x17f   :  { %v2269_v51 = vpop.f32.mrf.mxu3  ;;  %v2243_v40 = vpop.f32.mrf.mxu1  ;;  %v2230_v14 = vadd.f32 %v2229_v54, %v404_v62  ;;  %v2256_v57 = vadd.f32 %v2255_v50, %v2242_v9  ;;  %v2931_v9 = vlaneseq }
 0x181   :  { %v2244_v24 = vadd.f32 %v2243_v40, %v2230_v14  ;;  %v2270_v22 = vadd.f32 %v2269_v51, %v2256_v57  ;;  %v2932_v55 = vand.u32 127, %v2931_v9 }
 0x182   :  { %2987 = vperm.xlu2 %4808, %v5178_v12  }
 0x186   :  { %v2257_v33 = vpop.f32.mrf.mxu2 }
 0x187   :  { %v2271_v16 = vpop.f32.mrf.mxu3  ;;  %v2258_v28 = vadd.f32 %v2257_v33, %v2244_v24 }
 0x189   :  { %v2272_v36 = vadd.f32 %v2271_v16, %v2258_v28 }
 0x196   :  { %v2283_v59 = vpop.f32.mrf.mxu0 }
 0x197   :  { %v2297_v63 = vpop.f32.mrf.mxu1  ;;  %v2284_v27 = vadd.f32 %v2283_v59, %v2270_v22 }
 0x199   :  { %v2298_v5 = vadd.f32 %v2297_v63, %v2284_v27 }
 0x19b   :  { %v2390_v43 = vmax.f32 %v2298_v5, 0.0  ;;  %v2940_v5 = vld [vmem:[#allocation3] sm:$0xff] }
 0x19e   :  { %v2311_v3 = vpop.f32.mrf.mxu2  ;;  %v2285_v10 = vpop.f32.mrf.mxu0 }
 0x19f   :  { %v2325_v4 = vpop.f32.mrf.mxu3  ;;  %v2299_v45 = vpop.f32.mrf.mxu1  ;;  %v2312_v21 = vadd.f32 %v2311_v3, %v405_v11  ;;  %v2286_v44 = vadd.f32 %v2285_v10, %v2272_v36 }
 0x1a1   :  { %v2326_v23 = vadd.f32 %v2325_v4, %v2312_v21  ;;  %v2300_v52 = vadd.f32 %v2299_v45, %v2286_v44 }
 0x1a3   :  { %v2396_v32 = vmax.f32 %v2300_v52, 0.0 }
 0x1a6   :  { %v2313_v20 = vpop.f32.mrf.mxu2 }
 0x1a7   :  { %v2327_v6 = vpop.f32.mrf.mxu3  ;;  %v2314_v30 = vadd.f32 %v2313_v20, %v405_v11 }
 0x1a9   :  { %v2328_v37 = vadd.f32 %v2327_v6, %v2314_v30 }
 0x1b6   :  { %v2339_v25 = vpop.f32.mrf.mxu0 }
 0x1b7   :  { %v2340_v35 = vadd.f32 %v2339_v25, %v2326_v23  ;;  %v2353_v39 = vpop.f32.mrf.mxu1 }
 0x1b9   :  { %v2354_v34 = vadd.f32 %v2353_v39, %v2340_v35 }
 0x1be   :  { %v2367_v17 = vpop.f32.mrf.mxu2  ;;  %v2341_v29 = vpop.f32.mrf.mxu0 }
 0x1bf   :  { %v2368_v41 = vadd.f32 %v2367_v17, %v2354_v34  ;;  %v2381_v38 = vpop.f32.mrf.mxu3  ;;  %v2342_v26 = vadd.f32 %v2341_v29, %v2328_v37  ;;  %v2355_v47 = vpop.f32.mrf.mxu1  ;;  %v4987_v34 = vmov 0.0  }
 0x1c0   :  { %2415 = vst.msk [vmem:[#allocation5] sm:$0xff] %vm2410_vm0, %v4987_v34 }
 0x1c1   :  { %v2382_v42 = vadd.f32 %v2381_v38, %v2368_v41  ;;  %v2356_v50 = vadd.f32 %v2355_v47, %v2342_v26  ;;  %2413 = vst.msk [vmem:[#allocation4] sm:$0xff] %vm2410_vm0, %v4987_v34  ;;  %v2941_v26 = vld [vmem:[#allocation3 + $0x8] sm:$0xff] }
 0x1c2   :  { %2414 = vst.msk [vmem:[#allocation4 + $0x8] sm:$0xff] %vm2410_vm0, %v4987_v34 }
 0x1c3   :  { %v2391_v46 = vmax.f32 %v2382_v42, 0.0  ;;  %2416 = vst.msk [vmem:[#allocation5 + $0x8] sm:$0xff] %vm2410_vm0, %v4987_v34 }
 0x1c5   :  { %v2400_v48 = vpack.c.bf16 %v2391_v46, %v2390_v43 }
 0x1c6   :  { %v2369_v51 = vpop.f32.mrf.mxu2 }
 0x1c7   :  { %2406 = vst [vmem:[#allocation2 + $0x10] sm:$0xff] %v2400_v48  ;;  %v2370_v53 = vadd.f32 %v2369_v51, %v2356_v50  ;;  %v2383_v54 = vpop.f32.mrf.mxu3  ;;  %v2981_v36 = vld [vmem:[#allocation5] sm:$0xff] }
 0x1c9   :  { %v2384_v49 = vadd.f32 %v2383_v54, %v2370_v53 }
 0x1cb   :  { %v2397_v40 = vmax.f32 %v2384_v49, 0.0 }
 0x1cd   :  { %v2403_v56 = vpack.c.bf16 %v2397_v40, %v2396_v32 }
 0x1ce   :  { %v4243_v58 = vld [vmem:[#allocation2 + $0x10] sm:$0xf]  ;;  %v4737_v16 = vld [vmem:[#allocation2 + $0x14] sm:$0xf] }
 0x1cf   :  { %2409 = vst [vmem:[#allocation2 + $0x28] sm:$0xff] %v2403_v56 }
 0x1d4   :  { %v2985_v57 = vpop.permute.xlu2 %2984 }
 0x1d5   :  { %vm2989_vm1 = vcmp.eq.s32.totalorder %v2932_v55, %v2985_v57 }
 0x1d6   :  { %v4740_v33 = vld [vmem:[#allocation2 + $0x24] sm:$0xf0]  ;;  %v4245_v59 = vld [vmem:[#allocation2 + $0x28] sm:$0xf0]  ;;  %v2850_v62 = vpop.f32.mrf.mxu0 }
 0x1d7   :  { %v4244_v60 = vor.u32 %v4740_v33, %v4243_v58  ;;  %v4248_v61 = vor.u32 %v4737_v16, %v4245_v59  ;;  %v2864_v63 = vpop.f32.mrf.mxu1  ;;  %v2851_v2 = vadd.f32 %v4810_v1, %v2850_v62  ;;  %v2944_v58 = vld [vmem:[#allocation4] sm:$0xff]  ;;  %v2982_v62 = vld [vmem:[#allocation5 + $0x8] sm:$0xff] }
 0x1d9   :  { %2905 = vmatmul.bf16.vlgmr.msra.gmra.mxu0 %v4244_v60  ;;  %2919 = vmatmul.bf16.vlgmr.msra.gmra.mxu1 %v4248_v61  ;;  %v2865_v8 = vadd.f32 %v2864_v63, %v2851_v2  ;;  %v2945_v61 = vld [vmem:[#allocation4 + $0x8] sm:$0xff] }
 0x1dc   :  { %v2988_v17 = vpop.permute.xlu2 %2987 }
 0x1dd   :  { %vm2990_vm2 = vcmp.eq.s32.totalorder %v2932_v55, %v2988_v17 }
 0x1de   :  { %v2852_v4 = vpop.f32.mrf.mxu0 }
 0x1df   :  { %v2866_v7 = vpop.f32.mrf.mxu1  ;;  %v2853_v15 = vadd.f32 %v4810_v1, %v2852_v4 }
 0x1e1   :  { %v2867_v19 = vadd.f32 %v2866_v7, %v2853_v15 }
 0x1fc   :  { %v2878_v3 = vpop.f32.mrf.mxu2  ;;  %v2892_v11 = vpop.f32.mrf.mxu3 }
 0x1fd   :  { %v2879_v10 = vadd.f32 %v2878_v3, %v2865_v8 }
 0x1ff   :  { %v2893_v45 = vadd.f32 %v2892_v11, %v2879_v10 }
 0x204   :  { %v2880_v14 = vpop.f32.mrf.mxu2  ;;  %v2894_v6 = vpop.f32.mrf.mxu3 }
 0x205   :  { %v2881_v24 = vadd.f32 %v2880_v14, %v2867_v19 }
 0x207   :  { %v2895_v25 = vadd.f32 %v2894_v6, %v2881_v24 }
 0x256   :  { %v2906_v21 = vpop.f32.mrf.mxu0  ;;  %v2920_v18 = vpop.f32.mrf.mxu1 }
 0x257   :  { %v2907_v20 = vadd.f32 %v2906_v21, %v2893_v45 }
 0x259   :  { %v2921_v22 = vadd.f32 %v2920_v18, %v2907_v20 }
 0x25b   :  { %2936 = vmax.xlane.f32.xlu0 %v2921_v22  ;;  %v2991_v23 = vsel %vm2989_vm1, %v2921_v22, 0.0 }
 0x25c   :  { %2993 = vadd.xlane.f32.xlu2 %v2991_v23 }
 0x25e   :  { %v2908_v35 = vpop.f32.mrf.mxu0  ;;  %v2922_v27 = vpop.f32.mrf.mxu1 }
 0x25f   :  { %v2909_v39 = vadd.f32 %v2908_v35, %v2895_v25 }
 0x261   :  { %v2923_v28 = vadd.f32 %v2922_v27, %v2909_v39 }
 0x263   :  { %2938 = vmax.xlane.f32.xlu0 %v2923_v28  ;;  %v4792_v30 = vpack.c.bf16 %v2923_v28, %v2921_v22  ;;  %v2992_v49 = vsel %vm2990_vm2, %v2923_v28, 0.0 }
 0x265   :  { %4793 = vst [vmem:[#allocation15] sm:$0xff] %v4792_v30  }
 0x266   :  { %3036 = dma.vmem_to_hbm [thread:$0]  %s3029_s29, 128, %s3031_s9, [#allocation8], %s4980_s13, %s4980_s13, %s4981_s14  }
 0x2ce   :  { %v2937_v37 = vpop.xlane.xlu0 %2936 }
 0x2cf   :  { %v2942_v41 = vmax.f32 %v2940_v5, %v2937_v37  ;;  %v2994_v38 = vpop.xlane.xlu2 %2993 }
 0x2d0   :  { %v2997_v29 = vadd.f32 %v2994_v38, %v2981_v36 }
 0x2d1   :  { %v2946_v42 = vsub.f32 %v2940_v5, %v2942_v41  ;;  %2979 = vst.msk [vmem:[#allocation3] sm:$0xff] %vm2410_vm0, %v2942_v41  ;;  %2956 = vperm.xlu1 %4807, %v2942_v41  }
 0x2d2   :  { %2999 = vst.msk [vmem:[#allocation5] sm:$0xff] %vm2410_vm0, %v2997_v29 }
 0x2d3   :  { %v2948_v32 = vmul.f32 1.442695, %v2946_v42 }
 0x2d6   :  { %v2939_v13 = vpop.xlane.xlu0 %2938 }
 0x2d7   :  { %v2943_v43 = vmax.f32 %v2941_v26, %v2939_v13 }
 0x2d8   :  { %v3006_v10 = vld [vmem:[#allocation3] sm:$0xff] }
 0x2d9   :  { %v2947_v44 = vsub.f32 %v2941_v26, %v2943_v43  ;;  %2980 = vst.msk [vmem:[#allocation3 + $0x8] sm:$0xff] %vm2410_vm0, %v2943_v43  ;;  %2961 = vperm.xlu1 %4807, %v2943_v43   ;;  %v3016_v15 = vld [vmem:[#allocation5] sm:$0xff] }
 0x2db   :  { %v2950_v40 = vmul.f32 1.442695, %v2947_v44 }
 0x2e0   :  { %v3007_v21 = vld [vmem:[#allocation3 + $0x8] sm:$0xff] }
 0x343   :  { %v2957_v46 = vpop.permute.xlu1 %2956 }
 0x344   :  { %v2964_v47 = vsub.f32 %v2921_v22, %v2957_v46 }
 0x346   :  { %v2966_v48 = vmul.f32 1.442695, %v2964_v47 }
 0x348   :  { %4811 = vpow2.f32 %v2966_v48 }
 0x34b   :  { %v2962_v50 = vpop.permute.xlu1 %2961 }
 0x34c   :  { %v2965_v51 = vsub.f32 %v2923_v28, %v2962_v50 }
 0x34e   :  { %v4812_v52 = vpop.eup %4811  ;;  %v2968_v53 = vmul.f32 1.442695, %v2965_v51 }
 0x34f   :  { %2970 = vadd.xlane.f32.xlu0 %v4812_v52 }
 0x350   :  { %4813 = vpow2.f32 %v2968_v53 }
 0x351   :  { %4815 = vpow2.f32 %v2948_v32 }
 0x352   :  { %4817 = vpow2.f32 %v2950_v40 }
 0x356   :  { %v4814_v54 = vpop.eup %4813 }
 0x357   :  { %2995 = vadd.xlane.f32.xlu0 %v2992_v49  ;;  %2972 = vadd.xlane.f32.xlu1 %v4814_v54  ;;  %v4816_v56 = vpop.eup %4815 }
 0x358   :  { %v2952_v33 = vmul.f32 %v4816_v56, %v2944_v58  ;;  %v4818_v60 = vpop.eup %4817 }
 0x359   :  { %v2953_v63 = vmul.f32 %v4818_v60, %v2945_v61 }
 0x3c2   :  { %v2971_v16 = vpop.xlane.xlu0 %2970 }
 0x3c3   :  { %v2974_v59 = vadd.f32 %v2971_v16, %v2952_v33 }
 0x3c5   :  { %2977 = vst.msk [vmem:[#allocation4] sm:$0xff] %vm2410_vm0, %v2974_v59 }
 0x3ca   :  { %v2973_v0 = vpop.xlane.xlu1 %2972  ;;  %v2996_v1 = vpop.xlane.xlu0 %2995 }
 0x3cb   :  { %v2975_v2 = vadd.f32 %v2973_v0, %v2953_v63  ;;  %v2998_v3 = vadd.f32 %v2996_v1, %v2982_v62 }
 0x3cc   :  { %v3008_v4 = vld [vmem:[#allocation4] sm:$0xff] }
 0x3cd   :  { %4819 = vlog2.f32 %v3008_v4  ;;  %2978 = vst.msk [vmem:[#allocation4 + $0x8] sm:$0xff] %vm2410_vm0, %v2975_v2 }
 0x3ce   :  { %3000 = vst.msk [vmem:[#allocation5 + $0x8] sm:$0xff] %vm2410_vm0, %v2998_v3 }
 0x3d3   :  { %v4820_v7 = vpop.eup %4819 }
 0x3d4   :  { %v3011_v8 = vmul.f32 0.6931472, %v4820_v7  ;;  %v3009_v9 = vld [vmem:[#allocation4 + $0x8] sm:$0xff] }
 0x3d5   :  { %4821 = vlog2.f32 %v3009_v9  ;;  %v3017_v19 = vld [vmem:[#allocation5 + $0x8] sm:$0xff] }
 0x3d6   :  { %v3014_v11 = vadd.f32 %v3011_v8, %v3006_v10 }
 0x3d8   :  { %v3018_v55 = vsub.f32 %v3014_v11, %v3016_v15 }
 0x3da   :  { %v3020_v45 = vsel %vm3004_vm3, %v3018_v55, 0.0 }
 0x3db   :  { %v4822_v14 = vpop.eup %4821  ;;  %3022 = vst.msk [vmem:[%s5216_s7] sm:$0xff] %vm2410_vm0, %v3020_v45 }
 0x3dc   :  { %v3013_v57 = vmul.f32 0.6931472, %v4822_v14 }
 0x3de   :  { %v3015_v18 = vadd.f32 %v3013_v57, %v3007_v21 }
 0x3e0   :  { %v3019_v20 = vsub.f32 %v3015_v18, %v3017_v19 }
 0x3e2   :  { %v3021_v24 = vsel %vm3005_vm4, %v3019_v20, 0.0 }
 0x3e3   :  { %3023 = vst.msk [vmem:[%s5216_s7 + $0x8] sm:$0xff] %vm2410_vm0, %v3021_v24 }
 0x3e4   :  { %4974 = dma.done.wait [#allocation8], 128  }
 0x3e5   :  { %4975 = vsyncadd [#allocation8], 4294967168 }
 0x3e6   :  { %3045 = vsyncpa [#allocation7], 1 }
 0x3e7   :  { %3046 = vsyncpa [#allocation10], 1 }
 0x3e8   :  { %3047 = vsyncpa [#allocation13], 1 }
 0x3e9   :  { %3048 = vsyncpa [#allocation8], 1 }

</bundles_post_ra>
